<compile_context>
chip_gen: v6e
topology: v6e:2x2x1
jax: 0.10.0
libtpu: 0.0.40
codegen_flags: <defaults>
</compile_context>

<pallas_src>
import functools

import jax
import jax.numpy as jnp
from jax.experimental import pallas as pl
from jax.experimental.pallas import tpu as pltpu


def _round_up(x, m):
    return ((x + m - 1) // m) * m


def _fused_mlp_kernel(x_ref, w0_ref, b0_ref, wh_ref, bh_ref, wl_ref, bl_ref,
                      o_ref, act_ref, *, n_hidden):
    """Whole-MLP forward. Grid: (n_hidden,) -- one step per width->width layer.

    act_ref: VMEM scratch (2, Bp, width) bf16 -- ping-pong activation buffers.
    Layer 0 runs once at l == 0; the final projection runs once at the last
    grid step (its read of the just-stored activation relies on in-order
    program semantics, so it must stay AFTER the hidden-layer store).
    """
    l = pl.program_id(0)
    cdt = wh_ref.dtype            # bf16 -- MXU operand dtype

    # ---- Layer 0: relu(x @ W0 + b0), once, at the very first grid step ----
    @pl.when(l == 0)
    def _():
        h = jnp.dot(x_ref[...].astype(cdt), w0_ref[...],
                    preferred_element_type=jnp.float32)          # (Bp, width) f32
        act_ref[0] = jnp.maximum(h + b0_ref[...], 0.0).astype(cdt)

    # ---- Hidden layer l: relu(a @ W_l + b_l) -- one full-K MXU dot ----
    src = l % 2                   # buffer holding layer l's input
    dst = (l + 1) % 2             # buffer receiving layer l's output
    h = jnp.dot(act_ref[src], wh_ref[0], preferred_element_type=jnp.float32)
    act_ref[dst] = jnp.maximum(h + bh_ref[0], 0.0).astype(cdt)

    # ---- Final layer: a @ W_last + b_last (lanes zero-padded to 128) ----
    @pl.when(l == n_hidden - 1)
    def _():
        fin = n_hidden % 2        # static int == dst at the last step
        out = jnp.dot(act_ref[fin], wl_ref[...],
                      preferred_element_type=jnp.float32)
        o_ref[...] = (out + bl_ref[...]).astype(o_ref.dtype)


def pack_params(params, weight_dtype=jnp.bfloat16):
    """One-time repack of per-layer (w, b) into the fused kernel's operands.

    Weights cast to bf16 (kernel is HBM-BW bound on weight streaming); biases
    stay f32.  First-layer rows padded to 16, last-layer columns to 128 (zeros).
    Done ONCE, outside the forward pass, so it adds no per-call HBM traffic.
    """
    n_layers = len(params)
    assert n_layers >= 3, "expected input layer, >=1 hidden layer, output layer"
    input_dim, width = params[0][0].shape
    out_dim = params[-1][0].shape[1]
    kpad = max(16, _round_up(input_dim, 16))   # bf16 sublane pack = 16
    npad = _round_up(out_dim, 128)

    w0 = jnp.zeros((kpad, width), weight_dtype).at[:input_dim, :].set(
        params[0][0].astype(weight_dtype))
    b0 = params[0][1].astype(jnp.float32)                        # (1, width)
    wh = jnp.stack([w.astype(weight_dtype) for w, _ in params[1:-1]])
    bh = jnp.stack([b.astype(jnp.float32) for _, b in params[1:-1]])
    wl = jnp.zeros((width, npad), weight_dtype).at[:, :out_dim].set(
        params[-1][0].astype(weight_dtype))
    bl = jnp.zeros((1, npad), jnp.float32).at[:, :out_dim].set(
        params[-1][1].astype(jnp.float32))
    return {"w0": w0, "b0": b0, "wh": wh, "bh": bh, "wl": wl, "bl": bl}


def neural_network_forward(x, packed, *, out_dim=1):
    """Fused MLP forward: one pallas_call for all layers. x: (B, input_dim)."""
    w0, b0 = packed["w0"], packed["b0"]
    wh, bh = packed["wh"], packed["bh"]
    wl, bl = packed["wl"], packed["bl"]

    kpad, width = w0.shape
    n_hidden = wh.shape[0]
    npad = wl.shape[1]

    B, in_dim = x.shape
    bpad = max(16, _round_up(B, 16))   # 16 keeps bf16 activations sublane-dense
    x_p = jnp.zeros((bpad, kpad), jnp.float32).at[:B, :in_dim].set(x)

    kernel = functools.partial(_fused_mlp_kernel, n_hidden=n_hidden)

    out_p = pl.pallas_call(
        kernel,
        out_shape=jax.ShapeDtypeStruct((bpad, npad), jnp.float32),
        grid=(n_hidden,),
        in_specs=[
            pl.BlockSpec((bpad, kpad), lambda l: (0, 0)),          # x (padded)
            pl.BlockSpec((kpad, width), lambda l: (0, 0)),         # W0 (padded)
            pl.BlockSpec((1, width), lambda l: (0, 0)),            # b0
            pl.BlockSpec((1, width, width), lambda l: (l, 0, 0)),  # W_l (2 MiB bf16)
            pl.BlockSpec((1, 1, width), lambda l: (l, 0, 0)),      # b_l
            pl.BlockSpec((width, npad), lambda l: (0, 0)),         # W_last (padded)
            pl.BlockSpec((1, npad), lambda l: (0, 0)),             # b_last (padded)
        ],
        out_specs=pl.BlockSpec((bpad, npad), lambda l: (0, 0)),
        scratch_shapes=[pltpu.VMEM((2, bpad, width), wh.dtype)],   # bf16 ping-pong
        compiler_params=pltpu.CompilerParams(
            dimension_semantics=("arbitrary",),
            vmem_limit_bytes=32 * 1024 * 1024,
        ),
    )(x_p, w0, b0, wh, bh, wl, bl)

    return out_p[:B, :out_dim]


def init_params(key, input_dim=2, width=1024, depth=3):
    """Deterministic init matching the PyTorch module's layer shapes.

    Layers: Linear(input_dim,width), [Linear(width,width)]*(depth-1),
    Linear(width,1).  Weights stored as (in, out); biases as (1, out).
    """
    dims = [input_dim] + [width] * depth + [1]
    params = []
    for i in range(len(dims) - 1):
        key, wk, bk = jax.random.split(key, 3)
        bound = 1.0 / jnp.sqrt(dims[i])
        w = jax.random.uniform(wk, (dims[i], dims[i + 1]), jnp.float32,
                               minval=-bound, maxval=bound)
        b = jax.random.uniform(bk, (1, dims[i + 1]), jnp.float32,
                               minval=-bound, maxval=bound)
        params.append((w, b))
    return params


if __name__ == "__main__":
    key = jax.random.PRNGKey(0)
    key, xk = jax.random.split(key)

    batch, input_dim, width, depth = 8, 2, 1024, 3
    x = jax.random.normal(xk, (batch, input_dim), jnp.float32)
    params = init_params(key, input_dim=input_dim, width=width, depth=depth)

    packed = pack_params(params)          # one-time weight repack (outside jit)
    fwd = jax.jit(functools.partial(neural_network_forward, out_dim=1))

    out = jax.block_until_ready(fwd(x, packed))

    # Reference in plain JAX mirroring the kernel's numerics:
    # bf16 matmul operands (activations + weights), f32 accumulation,
    # f32 bias add + ReLU.
    ref = x
    for i, (w, b) in enumerate(params):
        ref = jnp.dot(ref.astype(jnp.bfloat16), w.astype(jnp.bfloat16),
                      preferred_element_type=jnp.float32) + b
        if i < len(params) - 1:
            ref = jnp.maximum(ref, 0.0)

    assert out.shape == (batch, 1)
    assert jnp.allclose(out, ref, atol=1e-2, rtol=1e-2), (
        f"max abs err {jnp.max(jnp.abs(out - ref))}")

    print("KERNEL_OK")
</pallas_src>

<mosaic_0001>
module attributes {stable_mosaic.version = 11 : i64} {
  func.func @_fused_mlp_kernel(%arg0: i32, %arg1: memref<16x16xf32, #tpu.memory_space<vmem>>, %arg2: memref<16x1024xbf16, #tpu.memory_space<vmem>>, %arg3: memref<1x1024xf32, #tpu.memory_space<vmem>>, %arg4: memref<1x1024x1024xbf16, #tpu.memory_space<vmem>>, %arg5: memref<1x1x1024xf32, #tpu.memory_space<vmem>>, %arg6: memref<1024x128xbf16, #tpu.memory_space<vmem>>, %arg7: memref<1x128xf32, #tpu.memory_space<vmem>>, %arg8: memref<16x128xf32, #tpu.memory_space<vmem>>, %arg9: memref<2x16x1024xbf16, #tpu.memory_space<vmem>>) attributes {dimension_semantics = [#tpu.dimension_semantics<arbitrary>], iteration_bounds = array<i64: 2>, scalar_prefetch = 0 : i64, scratch_operands = 1 : i64, tpu.core_type = #tpu.core_type<tc>, window_params = [{pipeline_mode = #tpu.pipeline_mode<synchronous>, transform_indices = @transform_0, window_bounds = array<i64: 16, 16>}, {pipeline_mode = #tpu.pipeline_mode<synchronous>, transform_indices = @transform_1, window_bounds = array<i64: 16, 1024>}, {pipeline_mode = #tpu.pipeline_mode<synchronous>, transform_indices = @transform_2, window_bounds = array<i64: 1, 1024>}, {transform_indices = @transform_3, window_bounds = array<i64: 1, 1024, 1024>}, {transform_indices = @transform_4, window_bounds = array<i64: 1, 1, 1024>}, {pipeline_mode = #tpu.pipeline_mode<synchronous>, transform_indices = @transform_5, window_bounds = array<i64: 1024, 128>}, {pipeline_mode = #tpu.pipeline_mode<synchronous>, transform_indices = @transform_6, window_bounds = array<i64: 1, 128>}, {pipeline_mode = #tpu.pipeline_mode<synchronous>, transform_indices = @transform_7, window_bounds = array<i64: 16, 128>}]} {
    %c0_i32 = arith.constant 0 : i32
    %0 = arith.cmpi eq, %arg0, %c0_i32 : i32
    %1 = arith.extui %0 : i1 to i32
    %c0_i32_0 = arith.constant 0 : i32
    %2 = arith.cmpi ne, %1, %c0_i32_0 : i32
    scf.if %2 {
      %c0_24 = arith.constant 0 : index
      %c0_25 = arith.constant 0 : index
      %44 = vector.load %arg1[%c0_24, %c0_25] : memref<16x16xf32, #tpu.memory_space<vmem>>, vector<16x16xf32>
      %45 = arith.truncf %44 : vector<16x16xf32> to vector<16x16xbf16>
      %c0_26 = arith.constant 0 : index
      %c0_27 = arith.constant 0 : index
      %46 = vector.load %arg2[%c0_26, %c0_27] : memref<16x1024xbf16, #tpu.memory_space<vmem>>, vector<16x1024xbf16>
      %cst_28 = arith.constant dense<0.000000e+00> : vector<16x1024xf32>
      %47 = tpu.matmul %45, %46, %cst_28 {dimension_numbers = #tpu.dot_dimension_numbers<[1], [0], [0], [1], [0, 0, 1, 1], [], []>} : vector<16x16xbf16>, vector<16x1024xbf16>, vector<16x1024xf32> -> vector<16x1024xf32>
      %c0_29 = arith.constant 0 : index
      %c0_30 = arith.constant 0 : index
      %48 = vector.load %arg3[%c0_29, %c0_30] : memref<1x1024xf32, #tpu.memory_space<vmem>>, vector<1x1024xf32>
      %49 = vector.broadcast %48 : vector<1x1024xf32> to vector<16x1024xf32>
      %50 = arith.addf %47, %49 : vector<16x1024xf32>
      %cst_31 = arith.constant 0.000000e+00 : f32
      %51 = vector.broadcast %cst_31 : f32 to vector<16x1024xf32>
      %52 = arith.maximumf %50, %51 : vector<16x1024xf32>
      %53 = arith.truncf %52 : vector<16x1024xf32> to vector<16x1024xbf16>
      %c0_32 = arith.constant 0 : index
      %c0_33 = arith.constant 0 : index
      %c0_34 = arith.constant 0 : index
      %54 = vector.load %arg9[%c0_32, %c0_33, %c0_34] : memref<2x16x1024xbf16, #tpu.memory_space<vmem>>, vector<1x16x1024xbf16>
      %55 = vector.shape_cast %54 : vector<1x16x1024xbf16> to vector<16x1024xbf16>
      %56 = vector.shape_cast %53 : vector<16x1024xbf16> to vector<1x16x1024xbf16>
      tpu.vector_store %arg9[%c0_32, %c0_33, %c0_34], %56 {strides = array<i32>} : memref<2x16x1024xbf16, #tpu.memory_space<vmem>>, vector<1x16x1024xbf16>,
    } else {
    }
    %c2_i32 = arith.constant 2 : i32
    %c0_i32_1 = arith.constant 0 : i32
    %3 = arith.cmpi eq, %c2_i32, %c0_i32_1 : i32
    %c1_i32 = arith.constant 1 : i32
    %4 = arith.select %3, %c1_i32, %c2_i32 : i32
    %5 = arith.remsi %arg0, %4 : i32
    %c0_i32_2 = arith.constant 0 : i32
    %6 = arith.cmpi ne, %5, %c0_i32_2 : i32
    %c0_i32_3 = arith.constant 0 : i32
    %7 = arith.cmpi slt, %5, %c0_i32_3 : i32
    %c0_i32_4 = arith.constant 0 : i32
    %8 = arith.cmpi slt, %4, %c0_i32_4 : i32
    %9 = arith.xori %7, %8 : i1
    %10 = arith.andi %9, %6 : i1
    %11 = arith.addi %5, %4 : i32
    %12 = arith.select %10, %11, %5 : i32
    %c1_i32_5 = arith.constant 1 : i32
    %13 = arith.addi %arg0, %c1_i32_5 : i32
    %c2_i32_6 = arith.constant 2 : i32
    %c0_i32_7 = arith.constant 0 : i32
    %14 = arith.cmpi eq, %c2_i32_6, %c0_i32_7 : i32
    %c1_i32_8 = arith.constant 1 : i32
    %15 = arith.select %14, %c1_i32_8, %c2_i32_6 : i32
    %16 = arith.remsi %13, %15 : i32
    %c0_i32_9 = arith.constant 0 : i32
    %17 = arith.cmpi ne, %16, %c0_i32_9 : i32
    %c0_i32_10 = arith.constant 0 : i32
    %18 = arith.cmpi slt, %16, %c0_i32_10 : i32
    %c0_i32_11 = arith.constant 0 : i32
    %19 = arith.cmpi slt, %15, %c0_i32_11 : i32
    %20 = arith.xori %18, %19 : i1
    %21 = arith.andi %20, %17 : i1
    %22 = arith.addi %16, %15 : i32
    %23 = arith.select %21, %22, %16 : i32
    %24 = arith.index_cast %12 : i32 to index
    %c0 = arith.constant 0 : index
    %c0_12 = arith.constant 0 : index
    %25 = vector.load %arg9[%24, %c0, %c0_12] : memref<2x16x1024xbf16, #tpu.memory_space<vmem>>, vector<1x16x1024xbf16>
    %26 = vector.shape_cast %25 : vector<1x16x1024xbf16> to vector<16x1024xbf16>
    %c0_13 = arith.constant 0 : index
    %c0_14 = arith.constant 0 : index
    %c0_15 = arith.constant 0 : index
    %27 = vector.load %arg4[%c0_13, %c0_14, %c0_15] : memref<1x1024x1024xbf16, #tpu.memory_space<vmem>>, vector<1x1024x1024xbf16>
    %28 = vector.shape_cast %27 : vector<1x1024x1024xbf16> to vector<1024x1024xbf16>
    %cst = arith.constant dense<0.000000e+00> : vector<16x1024xf32>
    %29 = tpu.matmul %26, %28, %cst {dimension_numbers = #tpu.dot_dimension_numbers<[1], [0], [0], [1], [0, 0, 1, 1], [], []>} : vector<16x1024xbf16>, vector<1024x1024xbf16>, vector<16x1024xf32> -> vector<16x1024xf32>
    %c0_16 = arith.constant 0 : index
    %c0_17 = arith.constant 0 : index
    %c0_18 = arith.constant 0 : index
    %30 = vector.load %arg5[%c0_16, %c0_17, %c0_18] : memref<1x1x1024xf32, #tpu.memory_space<vmem>>, vector<1x1x1024xf32>
    %31 = vector.shape_cast %30 : vector<1x1x1024xf32> to vector<1x1024xf32>
    %32 = vector.broadcast %31 : vector<1x1024xf32> to vector<16x1024xf32>
    %33 = arith.addf %29, %32 : vector<16x1024xf32>
    %cst_19 = arith.constant 0.000000e+00 : f32
    %34 = vector.broadcast %cst_19 : f32 to vector<16x1024xf32>
    %35 = arith.maximumf %33, %34 : vector<16x1024xf32>
    %36 = arith.truncf %35 : vector<16x1024xf32> to vector<16x1024xbf16>
    %37 = arith.index_cast %23 : i32 to index
    %c0_20 = arith.constant 0 : index
    %c0_21 = arith.constant 0 : index
    %38 = vector.load %arg9[%37, %c0_20, %c0_21] : memref<2x16x1024xbf16, #tpu.memory_space<vmem>>, vector<1x16x1024xbf16>
    %39 = vector.shape_cast %38 : vector<1x16x1024xbf16> to vector<16x1024xbf16>
    %40 = vector.shape_cast %36 : vector<16x1024xbf16> to vector<1x16x1024xbf16>
    tpu.vector_store %arg9[%37, %c0_20, %c0_21], %40 {strides = array<i32>} : memref<2x16x1024xbf16, #tpu.memory_space<vmem>>, vector<1x16x1024xbf16>,
    %c1_i32_22 = arith.constant 1 : i32
    %41 = arith.cmpi eq, %arg0, %c1_i32_22 : i32
    %42 = arith.extui %41 : i1 to i32
    %c0_i32_23 = arith.constant 0 : i32
    %43 = arith.cmpi ne, %42, %c0_i32_23 : i32
    scf.if %43 {
      %c0_24 = arith.constant 0 : index
      %c0_25 = arith.constant 0 : index
      %c0_26 = arith.constant 0 : index
      %44 = vector.load %arg9[%c0_24, %c0_25, %c0_26] : memref<2x16x1024xbf16, #tpu.memory_space<vmem>>, vector<1x16x1024xbf16>
      %45 = vector.shape_cast %44 : vector<1x16x1024xbf16> to vector<16x1024xbf16>
      %c0_27 = arith.constant 0 : index
      %c0_28 = arith.constant 0 : index
      %46 = vector.load %arg6[%c0_27, %c0_28] : memref<1024x128xbf16, #tpu.memory_space<vmem>>, vector<1024x128xbf16>
      %cst_29 = arith.constant dense<0.000000e+00> : vector<16x128xf32>
      %47 = tpu.matmul %45, %46, %cst_29 {dimension_numbers = #tpu.dot_dimension_numbers<[1], [0], [0], [1], [0, 0, 1, 1], [], []>} : vector<16x1024xbf16>, vector<1024x128xbf16>, vector<16x128xf32> -> vector<16x128xf32>
      %c0_30 = arith.constant 0 : index
      %c0_31 = arith.constant 0 : index
      %48 = vector.load %arg7[%c0_30, %c0_31] : memref<1x128xf32, #tpu.memory_space<vmem>>, vector<1x128xf32>
      %49 = vector.broadcast %48 : vector<1x128xf32> to vector<16x128xf32>
      %50 = arith.addf %47, %49 : vector<16x128xf32>
      %c0_32 = arith.constant 0 : index
      %c0_33 = arith.constant 0 : index
      %51 = vector.load %arg8[%c0_32, %c0_33] : memref<16x128xf32, #tpu.memory_space<vmem>>, vector<16x128xf32>
      tpu.vector_store %arg8[%c0_32, %c0_33], %50 {strides = array<i32>} : memref<16x128xf32, #tpu.memory_space<vmem>>, vector<16x128xf32>,
    } else {
    }
    return
  }
  func.func @transform_0(%arg0: i32) -> (i32, i32) {
    %c0_i32 = arith.constant 0 : i32
    %c0_i32_0 = arith.constant 0 : i32
    %c0_i32_1 = arith.constant 0 : i32
    return %c0_i32, %c0_i32_0 : i32, i32
  }
  func.func @transform_1(%arg0: i32) -> (i32, i32) {
    %c0_i32 = arith.constant 0 : i32
    %c0_i32_0 = arith.constant 0 : i32
    %c0_i32_1 = arith.constant 0 : i32
    return %c0_i32, %c0_i32_0 : i32, i32
  }
  func.func @transform_2(%arg0: i32) -> (i32, i32) {
    %c0_i32 = arith.constant 0 : i32
    %c0_i32_0 = arith.constant 0 : i32
    %c0_i32_1 = arith.constant 0 : i32
    return %c0_i32, %c0_i32_0 : i32, i32
  }
  func.func @transform_3(%arg0: i32) -> (i32, i32, i32) {
    %c0_i32 = arith.constant 0 : i32
    %c0_i32_0 = arith.constant 0 : i32
    %c0_i32_1 = arith.constant 0 : i32
    return %arg0, %c0_i32, %c0_i32_0 : i32, i32, i32
  }
  func.func @transform_4(%arg0: i32) -> (i32, i32, i32) {
    %c0_i32 = arith.constant 0 : i32
    %c0_i32_0 = arith.constant 0 : i32
    %c0_i32_1 = arith.constant 0 : i32
    return %arg0, %c0_i32, %c0_i32_0 : i32, i32, i32
  }
  func.func @transform_5(%arg0: i32) -> (i32, i32) {
    %c0_i32 = arith.constant 0 : i32
    %c0_i32_0 = arith.constant 0 : i32
    %c0_i32_1 = arith.constant 0 : i32
    return %c0_i32, %c0_i32_0 : i32, i32
  }
  func.func @transform_6(%arg0: i32) -> (i32, i32) {
    %c0_i32 = arith.constant 0 : i32
    %c0_i32_0 = arith.constant 0 : i32
    %c0_i32_1 = arith.constant 0 : i32
    return %c0_i32, %c0_i32_0 : i32, i32
  }
  func.func @transform_7(%arg0: i32) -> (i32, i32) {
    %c0_i32 = arith.constant 0 : i32
    %c0_i32_0 = arith.constant 0 : i32
    %c0_i32_1 = arith.constant 0 : i32
    return %c0_i32, %c0_i32_0 : i32, i32
  }
}

</mosaic_0001>

<bundles_post_ra>
// kernel: neural_network_forward.1
= control target key start
LH: loop header
LB: loop body
LE: loop exit
PB: predicated region body
PF: predicated region fallthrough
CT: control target
= control target key end

     0   :  { %12 = vsyncpa [#allocation4], 0  ;;  %s7569_s0 = inlined_call_operand.vmem [shape: f32[16,16], index: 0, kind: input, shape index: {}]   ;;  %s7570_s1 = inlined_call_operand.hbm [shape: bf16[16,1024], index: 1, kind: input, shape index: {}]   ;;  %s7571_s2 = inlined_call_operand.hbm [shape: f32[1,1024], index: 2, kind: input, shape index: {}]   ;;  %s7572_s3 = inlined_call_operand.hbm [shape: bf16[2,1024,1024], index: 3, kind: input, shape index: {}]   ;;  %s7573_s4 = inlined_call_operand.hbm [shape: f32[2,1,1024], index: 4, kind: input, shape index: {}]   ;;  %s7574_s5 = inlined_call_operand.hbm [shape: bf16[1024,128], index: 5, kind: input, shape index: {}]   ;;  %s7575_s6 = inlined_call_operand.hbm [shape: f32[1,128], index: 6, kind: input, shape index: {}]   ;;  %s7576_s7 = inlined_call_operand.vmem [shape: f32[16,128], index: 7, kind: output, shape index: {}]  }
   0x1   :  { %13 = vsyncpa [#allocation6], 0 }
   0x2   :  { %14 = vsyncpa [#allocation11], 0  ;;  %s6689_s24 = smov 0   ;;  %s6691_s25 = smov 0  }
   0x3   :  { %s6693_s26 = smov 0   ;;  %s6695_s27 = smov 0  }
   0x4 LB: > { %s6708_s28 = sadd.s32 4294967295, %s6636_s27   ;;  %p103_p0 = scmp.ne.s32.totalorder %s6628_s25, %s6624_s24  ;;  %s6636_s27 = sphi %s6695_s27, %s7605_s27   ;;  %s6632_s26 = sphi %s6693_s26, %s7604_s26   ;;  %s6628_s25 = sphi %s6691_s25, %s7603_s25   ;;  %s6624_s24 = sphi %s6689_s24, %s7602_s24  }
   0x5   : > { %p7579_p1 = scmp.eq.s32.totalorder %s6708_s28, 0  ;;  %p5509_p2 = scmp.ge.s32.totalorder %s6636_s27, 1 }
   0x6   : > { %p203_p3 = scmp.lt.s32.totalorder %s6636_s27, 3  ;;  %s6638_s8 = smov [#allocation3]  }
   0x7   : > { %p6717_p5 = por %p7579_p1, %p103_p0  ;;  %s218_s9 = sshll.u32 %s6638_s8, 4  ;;  %s219_s9 = int_to_ptr.vmem [resolvable:$true] %s218_s9 }
   0x8   : > { %p6721_p6 = pnand %p5509_p2, %p203_p3  ;;  %s6639_s11 = smov [#allocation5]  }
   0x9   : > { %s7583_s29 = scalar_select %p6717_p5, 1, 0 }
   0xa   : > { %s7584_s30 = scalar_select %p6721_p6, 1, 0 }
   0xb   : > { %p6291_p7 = pneg %p6721_p6  ;;  %s232_s12 = sshll.u32 %s6639_s11, 4  ;;  %s233_s12 = int_to_ptr.vmem [resolvable:$true] %s232_s12 }
   0xc   : > { %s6437_s13 = scalar_lea.vmem %s219_s9, 1024  ;;  %p6445_p13 = scmp.lt.s32.totalorder %s219_s9, %s219_s9 }
   0xd   : > { %p6729_p8 = pnand %p6291_p7, %p7579_p1  ;;  %p6438_p10 = scmp.ne.s32.totalorder %s219_s9, %s6437_s13 }
   0xe   : > { %p6446_p0 = scmp.lt.s32.totalorder %s6437_s13, %s6437_s13 }
   0xf   : > { %p7580_p9 = pneg %p6729_p8 }
  0x10   : > { %p6447_p2 = por %p6446_p0, %p6445_p13 }
  0x11   : > { %p6440_p11 = pnand %p6438_p10, %p7580_p9 }
  0x13   : > { %p6441_p12 = pneg %p6440_p11 }
  0x15   : > { %p6448_p3 = pnand %p6447_p2, %p6441_p12 }
  0x17   : > { %6451 = shalt.err (!%p6448_p3)
}
  0x18   : > { %s7578_s14 = smov 512   ;;  %s6641_s15 = smov 32  }
  0x19   : > { %6294 = dma.hbm_to_vmem [thread:$0]  (!%p6729_p8), %s7570_s1, 1024, %s219_s9, [#allocation4], %s7578_s14, %s7578_s14, %s6641_s15  }
  0x1a   : > { %s6463_s18 = scalar_lea.vmem %s233_s12, 128  ;;  %p6471_p12 = scmp.lt.s32.totalorder %s233_s12, %s233_s12 }
  0x1b   : > { %p6464_p7 = scmp.ne.s32.totalorder %s233_s12, %s6463_s18  ;;  %p6472_p13 = scmp.lt.s32.totalorder %s6463_s18, %s6463_s18 }
  0x1d   : > { %p6466_p10 = pnand %p6464_p7, %p7580_p9  ;;  %p6473_p0 = por %p6472_p13, %p6471_p12 }
  0x1f   : > { %p6467_p11 = pneg %p6466_p10 }
  0x21   : > { %p6474_p2 = pnand %p6473_p0, %p6467_p11 }
  0x23   : > { %6477 = shalt.err (!%p6474_p2)
}
  0x24   : > { %6297 = dma.hbm_to_vmem [thread:$0]  (!%p6729_p8), %s7571_s2, 128, %s233_s12, [#allocation6]  }
  0x25   : > { %s6755_s21 = sadd.s32 1, %s6636_s27   ;;  %s90_s22 = sadd.s32 1, %s6632_s26 }
  0x26   : > { %s87_s23 = ssub.s32 %s6636_s27, %s6755_s21  ;;  %p97_p3 = scmp.ne.s32.totalorder %s6632_s26, %s6628_s25 }
  0x27   : > { %p88_p7 = scmp.eq.s32.totalorder %s87_s23, 0  ;;  %p98_p10 = scmp.eq.s32.totalorder %s6636_s27, 0 }
  0x28   : > { %p6315_p11 = scmp.lt.s32.totalorder %s6636_s27, 2  ;;  %s267_s24 = sand.u32 1, %s6636_s27  }
  0x29   : > { %s6766_s8 = scalar_select %p88_p7, %s6632_s26, %s90_s22  }
  0x2a   : > { %p99_p12 = por %p98_p10, %p97_p3  ;;  %s7577_s9 = sand.u32 1, %s6632_s26  }
  0x2b   : > { %s6163_s11 = sshll.u32 %s6636_s27, 16  ;;  %s5515_s13 = sshll.u32 %s7577_s9, 12 }
  0x2c   : > { %s6775_s12 = scalar_lea.hbm %s7572_s3, %s6163_s11  ;;  %p6777_p13 = pnand %p6315_p11, %p99_p12 }
  0x2d   : > { %s271_s19 = scalar_lea.vmem [#allocation7], %s5515_s13  ;;  %s6783_s22 = scalar_lea.sflag [#allocation4], %s267_s24 }
  0x2e   : > { %s278_s20 = sshll.u32 %s271_s19, 4  ;;  %s6478_s23 = scalar_lea.hbm %s6775_s12, 65536  ;;  %s6781_s20 = int_to_ptr.vmem [resolvable:$true] %s278_s20 }
  0x2f   : > { %p6479_p0 = scmp.ne.s32.totalorder %s6775_s12, %s6478_s23  ;;  %p6480_p2 = pneg %p6777_p13 }
  0x30   : > { %s6483_s17 = scalar_lea.hbm %s7572_s3, 131072  ;;  %p6484_p10 = scmp.lt.s32.totalorder %s6775_s12, %s7572_s3 }
  0x31   : > { %p6481_p3 = pnand %p6480_p2, %p6479_p0  ;;  %p6485_p11 = scmp.lt.s32.totalorder %s6483_s17, %s6478_s23 }
  0x33   : > { %p6482_p7 = pneg %p6481_p3  ;;  %p6486_p12 = por %p6485_p11, %p6484_p10 }
  0x35   : > { %p6487_p4 = pnand %p6486_p12, %p6482_p7 }
  0x37   : > { %6490 = shalt.err (!%p6487_p4)
}
  0x38   : > { %s6491_s24 = scalar_lea.vmem %s6781_s20, 65536  ;;  %s6642_s13 = smov [#allocation7]  }
  0x39   : > { %p6492_p1 = scmp.ne.s32.totalorder %s6781_s20, %s6491_s24  ;;  %s6496_s19 = sshll.u32 %s6642_s13, 4  ;;  %s6497_s19 = int_to_ptr.vmem [resolvable:$false] %s6496_s19 }
  0x3a   : > { %s6498_s11 = scalar_lea.vmem %s6497_s19, 131072  ;;  %p6499_p9 = scmp.lt.s32.totalorder %s6781_s20, %s6497_s19 }
  0x3b   : > { %p6494_p0 = pnand %p6492_p1, %p6480_p2  ;;  %p6500_p5 = scmp.lt.s32.totalorder %s6498_s11, %s6491_s24 }
  0x3d   : > { %p6495_p3 = pneg %p6494_p0  ;;  %p6501_p6 = por %p6500_p5, %p6499_p9 }
  0x3f   : > { %p6502_p10 = pnand %p6501_p6, %p6495_p3 }
  0x41   : > { %6505 = shalt.err (!%p6502_p10)
}
  0x42   : > { %s7587_s14 = smov 512   ;;  %s6643_s9 = smov [#allocation9]  }
  0x43   : > { %6307 = dma.hbm_to_vmem [thread:$0]  (!%p6777_p13), %s6775_s12, 65536, %s6781_s20, %s6783_s22, %s7587_s14, %s7587_s14, %s6641_s15  }
  0x44   : > { %s242_s23 = sshll.u32 %s6643_s9, 4  ;;  %p7588_p4 = pneg %p6729_p8  ;;  %s243_s23 = int_to_ptr.vmem [resolvable:$true] %s242_s23 }
  0x45   : > { %s6517_s16 = scalar_lea.vmem %s243_s23, 8192  ;;  %p6525_p9 = scmp.lt.s32.totalorder %s243_s23, %s243_s23 }
  0x46   : > { %p6518_p1 = scmp.ne.s32.totalorder %s243_s23, %s6517_s16  ;;  %p6526_p7 = scmp.lt.s32.totalorder %s6517_s16, %s6517_s16 }
  0x48   : > { %p6520_p5 = pnand %p6518_p1, %p7588_p4  ;;  %p6527_p11 = por %p6526_p7, %p6525_p9 }
  0x4a   : > { %p6521_p6 = pneg %p6520_p5 }
  0x4c   : > { %p6528_p12 = pnand %p6527_p11, %p6521_p6 }
  0x4e   : > { %6531 = shalt.err (!%p6528_p12)
}
  0x4f   : > { %s6644_s17 = smov 64   ;;  %s6645_s15 = smov 4  }
  0x50   : > { %6300 = dma.hbm_to_vmem [thread:$0]  (!%p6729_p8), %s7574_s5, 8192, %s243_s23, [#allocation6], %s6644_s17, %s6644_s17, %s6645_s15  }
  0x51   : > { %s7589_s24 = sand.u32 1, %s6632_s26   ;;  %s6646_s19 = smov [#allocation10]  }
  0x52   : > { %s5518_s13 = sshll.u32 %s7589_s24, 3  ;;  %s256_s11 = sshll.u32 %s6646_s19, 4  ;;  %s257_s11 = int_to_ptr.vmem [resolvable:$true] %s256_s11 }
  0x53   : > { %s6164_s14 = sshll.u32 %s6636_s27, 7  ;;  %s6543_s9 = scalar_lea.vmem %s257_s11, 16 }
  0x54   : > { %p6544_p0 = scmp.ne.s32.totalorder %s257_s11, %s6543_s9  ;;  %p7590_p3 = pmov %p7588_p4 }
  0x55   : > { %s6550_s16 = scalar_lea.vmem %s257_s11, 32  ;;  %p6551_p4 = scmp.lt.s32.totalorder %s257_s11, %s257_s11 }
  0x56   : > { %p6546_p10 = pnand %p6544_p0, %p7590_p3  ;;  %p6552_p5 = scmp.lt.s32.totalorder %s6550_s16, %s6543_s9 }
  0x58   : > { %p6547_p1 = pneg %p6546_p10  ;;  %p6553_p6 = por %p6552_p5, %p6551_p4 }
  0x5a   : > { %p6554_p9 = pnand %p6553_p6, %p6547_p1 }
  0x5c   : > { %6557 = shalt.err (!%p6554_p9)
}
  0x5d   : > { %6303 = dma.hbm_to_vmem [thread:$0]  (!%p6729_p8), %s7575_s6, 16, %s257_s11, [#allocation11]  }
  0x5e   : > { %s298_s12 = scalar_lea.hbm %s7573_s4, %s6164_s14  ;;  %s292_s20 = scalar_lea.vmem [#allocation8], %s5518_s13 }
  0x5f   : > { %s300_s24 = sshll.u32 %s292_s20, 4  ;;  %s6558_s19 = scalar_lea.hbm %s298_s12, 128  ;;  %s301_s24 = int_to_ptr.vmem [resolvable:$true] %s300_s24 }
  0x60   : > { %p6559_p7 = scmp.ne.s32.totalorder %s298_s12, %s6558_s19  ;;  %s6563_s16 = scalar_lea.hbm %s7573_s4, 256 }
  0x61   : > { %p6564_p8 = scmp.lt.s32.totalorder %s298_s12, %s7573_s4  ;;  %p6565_p0 = scmp.lt.s32.totalorder %s6563_s16, %s6558_s19 }
  0x62   : > { %p6561_p11 = pnand %p6559_p7, %p6480_p2 }
  0x63   : > { %p6566_p3 = por %p6565_p0, %p6564_p8 }
  0x64   : > { %p6562_p12 = pneg %p6561_p11 }
  0x66   : > { %p6567_p10 = pnand %p6566_p3, %p6562_p12 }
  0x68   : > { %6570 = shalt.err (!%p6567_p10)
}
  0x69   : > { %s6571_s13 = scalar_lea.vmem %s301_s24, 128  ;;  %s6647_s11 = smov [#allocation8]  }
  0x6a   : > { %p6572_p1 = scmp.ne.s32.totalorder %s301_s24, %s6571_s13  ;;  %s6576_s14 = sshll.u32 %s6647_s11, 4  ;;  %s6577_s14 = int_to_ptr.vmem [resolvable:$false] %s6576_s14 }
  0x6b   : > { %s6578_s27 = scalar_lea.vmem %s6577_s14, 256  ;;  %p6579_p6 = scmp.lt.s32.totalorder %s301_s24, %s6577_s14 }
  0x6c   : > { %p6574_p4 = pnand %p6572_p1, %p6480_p2  ;;  %p6580_p9 = scmp.lt.s32.totalorder %s6578_s27, %s6571_s13 }
  0x6e   : > { %p6575_p5 = pneg %p6574_p4  ;;  %p6581_p7 = por %p6580_p9, %p6579_p6 }
  0x70   : > { %p6582_p11 = pnand %p6581_p7, %p6575_p5 }
  0x72   : > { %6585 = shalt.err (!%p6582_p11)
}
  0x73   : > { %6310 = dma.hbm_to_vmem [thread:$0]  (!%p6777_p13), %s298_s12, 128, %s301_s24, %s6783_s22  }
  0x74   : > { %p7591_p12 = scmp.ne.s32.totalorder %s7584_s30, 0 }
  0x75   : > { %p7592_p8 = scmp.eq.s32.totalorder (!%p7591_p12), %s6708_s28, 0 }
  0x76   : > { %309 = sbr.rel (%p7591_p12) target bundleno = 1366 (0x556), region = 48 }
  0x7b   : > { %6603 = dma.done.wait (%p7592_p8), [#allocation4], 1024   ;;  %p7593_p2 = pmov %p7592_p8 }
  0x7d   : > { %6605 = vsyncadd (%p7593_p2), [#allocation4], 4294966272  ;;  %p7594_p0 = pmov %p7593_p2 }
  0x7f   : > { %6607 = dma.done.wait (%p7594_p0), [#allocation6], 128   ;;  %p7595_p3 = pmov %p7594_p0 }
  0x80   : > { %s319_s18 = sand.u32 1, %s6708_s28   ;;  %s321_s22 = sand.u32 1, %s6628_s25  }
  0x81   : > { %6609 = vsyncadd (%p7595_p3), [#allocation6], 4294967168  ;;  %s5524_s15 = sshll.u32 %s321_s22, 12  ;;  %s320_s30 = scalar_lea.sflag [#allocation4], %s319_s18 }
  0x82   : > { %s6862_s12 = scalar_lea.vmem [#allocation7], %s5524_s15  ;;  %p7596_p13 = scmp.ne.s32.totalorder %s7583_s29, 0 }
  0x84   : > { %6611 = dma.done.wait (%p7596_p13), %s320_s30, 65664  }
  0x85   : > { %6613 = vsyncadd (%p7596_p13), %s320_s30, 4294901632  ;;  %s6868_s20 = sshll.u32 %s321_s22, 3  ;;  %p7597_p10 = pmov %p7594_p0 }
  0x86   : > { %s332_s24 = scalar_lea.vmem [#allocation8], %s6868_s20 }
  0x87   : > { %6615 = dma.done.wait (%p7597_p10), [#allocation6], 8192   ;;  %p7598_p1 = pmov %p7594_p0 }
  0x88   : > { %p7599_p4 = pmov %p7594_p0 }
  0x89   : > { %6617 = vsyncadd (%p7598_p1), [#allocation6], 4294959104 }
  0x8a   : > { %6619 = dma.done.wait (%p7599_p4), [#allocation11], 16   ;;  %p7600_p5 = pmov %p7594_p0 }
  0x8b   : > { %p7601_p6 = scmp.ne.s32.totalorder %s6708_s28, 0 }
  0x8c   : > { %6621 = vsyncadd (%p7600_p5), [#allocation11], 4294967280 }
  0x8d   : > { %375 = sbr.rel (%p7601_p6) target bundleno = 368 (0x170), region = 76 }
  0x92   : > { %v379_v0 = vld [vmem:[#allocation3] sm:$0xff]  ;;  %v380_v2 = vld [vmem:[#allocation3 + $0x8] sm:$0xff]  ;;  %v6648_v6 = vmov 0   ;;  %v381_v11 = vld [vmem:[#allocation3 + $0x10] sm:$0xff]  ;;  %vm469_vm0 = vcmask 130048   ;;  %v389_v20 = vlaneseq }
  0x93   : > { %v383_v1 = vld [vmem:[#allocation3 + $0x20] sm:$0xff]  ;;  %v384_v4 = vld [vmem:[#allocation3 + $0x28] sm:$0xff]  ;;  %505 = vmatprep.mubr.bf16.mxu0 %v6648_v6  ;;  %548 = vmatprep.mubr.bf16.mxu1 %v6648_v6  ;;  %v385_v12 = vld [vmem:[#allocation3 + $0x30] sm:$0xff] }
  0x94   : > { %v5530_v3 = vcombine.high %v379_v0, %v383_v1  ;;  %v5529_v5 = vcombine.low %v379_v0, %v383_v1  ;;  %v376_v7 = vld [vmem:[%s7569_s0] sm:$0xff]  ;;  %v377_v8 = vld [vmem:[%s7569_s0 + $0x8] sm:$0xff]  ;;  %v5532_v9 = vcombine.high %v380_v2, %v384_v4  ;;  %v5531_v10 = vcombine.low %v380_v2, %v384_v4  ;;  %v382_v13 = vld [vmem:[#allocation3 + $0x18] sm:$0xff] }
  0x95   : > { %v378_v14 = vpack.c.bf16 %v377_v8, %v376_v7  ;;  %v5534_v15 = vcombine.high %v381_v11, %v385_v12  ;;  %v386_v16 = vld [vmem:[#allocation3 + $0x38] sm:$0xff]  ;;  %v5533_v17 = vcombine.low %v381_v11, %v385_v12  ;;  %v390_v21 = vshrl.u32 %v389_v20, 7  ;;  %v387_v23 = vld [vmem:[#allocation5] sm:$0xff] }
  0x96   : > { %487 = vmatprep.subr.bf16.mxu0 %v5530_v3  ;;  %530 = vmatprep.subr.bf16.mxu1 %v5532_v9  ;;  %v5536_v18 = vcombine.high %v382_v13, %v386_v16  ;;  %v5535_v19 = vcombine.low %v382_v13, %v386_v16 }
  0x97   : > { %488 = vmatpush1.bf16.msra.mxu0 %v5529_v5  ;;  %531 = vmatpush1.bf16.msra.mxu1 %v5531_v10  ;;  %v391_v22 = vsub.s32 0, %v390_v21  ;;  %v399_v24 = vsub.s32 2, %v390_v21  ;;  %v395_v25 = vsub.s32 1, %v390_v21  ;;  %v403_v26 = vsub.s32 3, %v390_v21 }
  0x98   : > { %573 = vmatprep.subr.bf16.mxu0 %v5534_v15  ;;  %616 = vmatprep.subr.bf16.mxu1 %v5536_v18  ;;  %v407_v34 = vsub.s32 4, %v390_v21  ;;  %v415_v37 = vsub.s32 6, %v390_v21  ;;  %v411_v40 = vsub.s32 5, %v390_v21  ;;  %v419_v43 = vsub.s32 7, %v390_v21 }
  0x99   : > { %v392_v27 = vrot.slane %v387_v23, %v391_v22  ;;  %v400_v28 = vrot.slane %v387_v23, %v399_v24  ;;  %v396_v29 = vrot.slane %v387_v23, %v395_v25  ;;  %v404_v31 = vrot.slane %v387_v23, %v403_v26 }
  0x9a   : > { %5537 = vmatmul.mubr.msk.bf16.vlgmr.msra.gmra.mxu0 %vm469_vm0, %v378_v14  ;;  %5538 = vmatmul.mubr.msk.bf16.vlgmr.msra.gmra.mxu1 %vm469_vm0, %v378_v14  ;;  %v408_v48 = vrot.slane %v387_v23, %v407_v34  ;;  %v416_v53 = vrot.slane %v387_v23, %v415_v37  ;;  %v412_v57 = vrot.slane %v387_v23, %v411_v40 }
  0x9b   : > { %574 = vmatpush1.bf16.msra.mxu0 %v5533_v17  ;;  %617 = vmatpush1.bf16.msra.mxu1 %v5535_v19  ;;  %v420_v61 = vrot.slane %v387_v23, %v419_v43 }
  0x9c   : > { %591 = vmatprep.mubr.bf16.mxu0 %v6648_v6  ;;  %634 = vmatprep.mubr.bf16.mxu1 %v6648_v6 }
  0xa2   : > { %5539 = vmatmul.mubr.msk.bf16.vlgmr.msra.gmra.mxu0 %vm469_vm0, %v378_v14  ;;  %5540 = vmatmul.mubr.msk.bf16.vlgmr.msra.gmra.mxu1 %vm469_vm0, %v378_v14 }
 0x15a   : > { %v507_v30 = vpop.f32.mrf.mxu0  ;;  %v550_v33 = vpop.f32.mrf.mxu1 }
 0x15b   : > { %v508_v32 = vadd.f32 %v507_v30, %v392_v27  ;;  %v551_v35 = vadd.f32 %v550_v33, %v400_v28 }
 0x15c   : > { %v509_v36 = vpop.f32.mrf.mxu0  ;;  %v552_v39 = vpop.f32.mrf.mxu1 }
 0x15d   : > { %v510_v38 = vadd.f32 %v509_v36, %v396_v29  ;;  %v553_v41 = vadd.f32 %v552_v39, %v404_v31  ;;  %v645_v44 = vmax.f32 %v508_v32, 0.0  ;;  %v647_v49 = vmax.f32 %v551_v35, 0.0 }
 0x15e   : > { %v511_v42 = vpop.f32.mrf.mxu0  ;;  %v554_v47 = vpop.f32.mrf.mxu1 }
 0x15f   : > { %v646_v45 = vmax.f32 %v510_v38, 0.0  ;;  %v512_v46 = vadd.f32 %v511_v42, %v392_v27  ;;  %v648_v50 = vmax.f32 %v553_v41, 0.0  ;;  %v555_v51 = vadd.f32 %v554_v47, %v400_v28 }
 0x160   : > { %v513_v52 = vpop.f32.mrf.mxu0  ;;  %v556_v56 = vpop.f32.mrf.mxu1 }
 0x161   : > { %v6165_v54 = vpack.c.bf16 %v646_v45, %v645_v44  ;;  %v514_v55 = vadd.f32 %v513_v52, %v396_v29  ;;  %v6166_v58 = vpack.c.bf16 %v648_v50, %v647_v49  ;;  %v557_v59 = vadd.f32 %v556_v56, %v404_v31 }
 0x162   : > { %v593_v60 = vpop.f32.mrf.mxu0  ;;  %v653_v62 = vmax.f32 %v512_v46, 0.0  ;;  %v636_v1 = vpop.f32.mrf.mxu1  ;;  %v655_v2 = vmax.f32 %v555_v51, 0.0 }
 0x163   : > { %709 = vst [vmem:[#allocation2] sm:$0xff] %v6165_v54  ;;  %v654_v63 = vmax.f32 %v514_v55, 0.0  ;;  %v594_v0 = vadd.f32 %v593_v60, %v408_v48  ;;  %710 = vst [vmem:[#allocation2 + $0x8] sm:$0xff] %v6166_v58  ;;  %v656_v3 = vmax.f32 %v557_v59, 0.0  ;;  %v637_v4 = vadd.f32 %v636_v1, %v416_v53 }
 0x164   : > { %v595_v5 = vpop.f32.mrf.mxu0  ;;  %v638_v8 = vpop.f32.mrf.mxu1 }
 0x165   : > { %v6169_v6 = vpack.c.bf16 %v654_v63, %v653_v62  ;;  %v596_v7 = vadd.f32 %v595_v5, %v412_v57  ;;  %v6170_v9 = vpack.c.bf16 %v656_v3, %v655_v2  ;;  %v639_v10 = vadd.f32 %v638_v8, %v420_v61 }
 0x166   : > { %v597_v11 = vpop.f32.mrf.mxu0  ;;  %v649_v12 = vmax.f32 %v594_v0, 0.0  ;;  %v640_v15 = vpop.f32.mrf.mxu1  ;;  %v651_v16 = vmax.f32 %v637_v4, 0.0 }
 0x167   : > { %713 = vst [vmem:[#allocation2 + $0x20] sm:$0xff] %v6169_v6  ;;  %v650_v13 = vmax.f32 %v596_v7, 0.0  ;;  %v598_v14 = vadd.f32 %v597_v11, %v408_v48  ;;  %714 = vst [vmem:[#allocation2 + $0x28] sm:$0xff] %v6170_v9  ;;  %v652_v17 = vmax.f32 %v639_v10, 0.0  ;;  %v641_v18 = vadd.f32 %v640_v15, %v416_v53 }
 0x168   : > { %v599_v19 = vpop.f32.mrf.mxu0  ;;  %v642_v22 = vpop.f32.mrf.mxu1 }
 0x169   : > { %v6167_v20 = vpack.c.bf16 %v650_v13, %v649_v12  ;;  %v600_v21 = vadd.f32 %v599_v19, %v412_v57  ;;  %v6168_v23 = vpack.c.bf16 %v652_v17, %v651_v16  ;;  %v643_v24 = vadd.f32 %v642_v22, %v420_v61 }
 0x16a   : > { %v657_v25 = vmax.f32 %v598_v14, 0.0  ;;  %v659_v27 = vmax.f32 %v641_v18, 0.0 }
 0x16b   : > { %711 = vst [vmem:[#allocation2 + $0x10] sm:$0xff] %v6167_v20  ;;  %v658_v26 = vmax.f32 %v600_v21, 0.0  ;;  %712 = vst [vmem:[#allocation2 + $0x18] sm:$0xff] %v6168_v23  ;;  %v660_v28 = vmax.f32 %v643_v24, 0.0 }
 0x16d   : > { %v6171_v29 = vpack.c.bf16 %v658_v26, %v657_v25  ;;  %v6172_v30 = vpack.c.bf16 %v660_v28, %v659_v27 }
 0x16f   : > { %715 = vst [vmem:[#allocation2 + $0x30] sm:$0xff] %v6171_v29  ;;  %716 = vst [vmem:[#allocation2 + $0x38] sm:$0xff] %v6172_v30 }
 0x170 PF: > { %v809_v31 = vld [vmem:[%s6862_s12 + $0x1c0] sm:$0xff]  ;;  %p717_p9 = scmp.lt.s32.totalorder %s6708_s28, 0  ;;  %s718_s16 = ssub.s32 0, %s6708_s28 }
 0x171   : > { %v813_v32 = vld [vmem:[%s6862_s12 + $0x1e0] sm:$0xff]  ;;  %s5549_s23 = smin.u32 %s6708_s28, %s718_s16  ;;  %s7281_s18 = sadd.s32 1, %s6708_s28 }
 0x172   : > { %v937_v33 = vld [vmem:[%s6862_s12 + $0x5c0] sm:$0xff]  ;;  %v5622_v34 = vcombine.high %v809_v31, %v813_v32  ;;  %v5621_v36 = vcombine.low %v809_v31, %v813_v32  ;;  %s720_s17 = sand.u32 1, %s5549_s23   ;;  %s731_s22 = ssub.s32 0, %s7281_s18 }
 0x173   : > { %v941_v35 = vld [vmem:[%s6862_s12 + $0x5e0] sm:$0xff]  ;;  %s721_s13 = ssub.s32 0, %s720_s17  ;;  %s7295_s15 = smin.u32 %s731_s22, %s7281_s18 }
 0x174   : > { %v801_v37 = vld [vmem:[%s6862_s12 + $0x180] sm:$0xff]  ;;  %v5750_v39 = vcombine.high %v937_v33, %v941_v35  ;;  %v5749_v40 = vcombine.low %v937_v33, %v941_v35  ;;  %3907 = vmatprep.subr.bf16.mxu0 %v5622_v34  ;;  %s7607_s13 = smov (!%p717_p9, %s721_s13), %s720_s17  ;;  %s733_s30 = sand.u32 1, %s7295_s15  }
 0x175   : > { %v805_v38 = vld [vmem:[%s6862_s12 + $0x1a0] sm:$0xff]  ;;  %3908 = vmatpush1.bf16.msra.mxu0 %v5621_v36  ;;  %p5551_p7 = scmp.lt.s32.totalorder %s7607_s13, 0  ;;  %s727_s11 = sadd.s32 2, %s7607_s13 }
 0x176   : > { %v5614_v41 = vcombine.high %v801_v37, %v805_v38  ;;  %v929_v42 = vld [vmem:[%s6862_s12 + $0x580] sm:$0xff]  ;;  %3950 = vmatprep.subr.bf16.mxu1 %v5750_v39  ;;  %v5613_v49 = vcombine.low %v801_v37, %v805_v38  ;;  %p730_p11 = scmp.lt.s32.totalorder %s7281_s18, 0  ;;  %s734_s29 = ssub.s32 0, %s733_s30 }
 0x177   : > { %v933_v43 = vld [vmem:[%s6862_s12 + $0x5a0] sm:$0xff]  ;;  %3951 = vmatpush1.bf16.msra.mxu1 %v5749_v40  ;;  %s7609_s11 = smov (!%p5551_p7, %s727_s11), %s7607_s13  ;;  %p6087_p8 = scmp.ne.s32.totalorder %s6708_s28, 1 }
 0x178   : > { %v793_v44 = vld [vmem:[%s6862_s12 + $0x140] sm:$0xff]  ;;  %v5742_v45 = vcombine.high %v929_v42, %v933_v43  ;;  %3909 = vmatprep.subr.bf16.mxu0 %v5614_v41  ;;  %v5741_v50 = vcombine.low %v929_v42, %v933_v43  ;;  %s6173_s14 = sshll.u32 %s7609_s11, 6  ;;  %s7611_s29 = smov (!%p730_p11, %s734_s29), %s733_s30 }
 0x179   : > { %v797_v46 = vld [vmem:[%s6862_s12 + $0x160] sm:$0xff]  ;;  %3910 = vmatpush1.bf16.msra.mxu0 %v5613_v49  ;;  %s6925_s27 = scalar_lea.vmem [#allocation2], %s6173_s14  ;;  %p5554_p12 = scmp.lt.s32.totalorder %s7611_s29, 0 }
 0x17a   : > { %v921_v47 = vld [vmem:[%s6862_s12 + $0x540] sm:$0xff]  ;;  %v5606_v51 = vcombine.high %v793_v44, %v797_v46  ;;  %3952 = vmatprep.subr.bf16.mxu1 %v5742_v45  ;;  %v5605_v57 = vcombine.low %v793_v44, %v797_v46  ;;  %v6928_v21 = vld [vmem:[%s6925_s27] sm:$0xff]  ;;  %s740_s19 = sadd.s32 2, %s7611_s29 }
 0x17b   : > { %v925_v48 = vld [vmem:[%s6862_s12 + $0x560] sm:$0xff]  ;;  %3953 = vmatpush1.bf16.msra.mxu1 %v5741_v50  ;;  %v6931_v22 = vld [vmem:[%s6925_s27 + $0x20] sm:$0xff]  ;;  %s7613_s19 = smov (!%p5554_p12, %s740_s19), %s7611_s29 }
 0x17c   : > { %v5734_v52 = vcombine.high %v921_v47, %v925_v48  ;;  %v785_v53 = vld [vmem:[%s6862_s12 + $0x100] sm:$0xff]  ;;  %3911 = vmatprep.subr.bf16.mxu0 %v5606_v51  ;;  %v5733_v58 = vcombine.low %v921_v47, %v925_v48  ;;  %v6936_v25 = vcombine.high %v6928_v21, %v6931_v22  ;;  %s6182_s9 = sshll.u32 %s7613_s19, 6 }
 0x17d   : > { %v789_v54 = vld [vmem:[%s6862_s12 + $0x120] sm:$0xff]  ;;  %3912 = vmatpush1.bf16.msra.mxu0 %v5605_v57  ;;  %s7347_s10 = scalar_lea.vmem [#allocation2], %s6182_s9 }
 0x17e   : > { %v913_v55 = vld [vmem:[%s6862_s12 + $0x500] sm:$0xff]  ;;  %v5598_v59 = vcombine.high %v785_v53, %v789_v54  ;;  %3954 = vmatprep.subr.bf16.mxu1 %v5734_v52  ;;  %v5597_v1 = vcombine.low %v785_v53, %v789_v54  ;;  %3939 = vmatprep.mubr.bf16.mxu0 %v6936_v25 }
 0x17f   : > { %v917_v56 = vld [vmem:[%s6862_s12 + $0x520] sm:$0xff]  ;;  %3955 = vmatpush1.bf16.msra.mxu1 %v5733_v58 }
 0x180   : > { %v5726_v60 = vcombine.high %v913_v55, %v917_v56  ;;  %v777_v61 = vld [vmem:[%s6862_s12 + $0xc0] sm:$0xff]  ;;  %3913 = vmatprep.subr.bf16.mxu0 %v5598_v59  ;;  %v5725_v2 = vcombine.low %v913_v55, %v917_v56 }
 0x181   : > { %v781_v62 = vld [vmem:[%s6862_s12 + $0xe0] sm:$0xff]  ;;  %3914 = vmatpush1.bf16.msra.mxu0 %v5597_v1 }
 0x182   : > { %v905_v63 = vld [vmem:[%s6862_s12 + $0x4c0] sm:$0xff]  ;;  %v5590_v3 = vcombine.high %v777_v61, %v781_v62  ;;  %3956 = vmatprep.subr.bf16.mxu1 %v5726_v60  ;;  %v5589_v9 = vcombine.low %v777_v61, %v781_v62 }
 0x183   : > { %v909_v0 = vld [vmem:[%s6862_s12 + $0x4e0] sm:$0xff]  ;;  %3957 = vmatpush1.bf16.msra.mxu1 %v5725_v2 }
 0x184   : > { %v5718_v4 = vcombine.high %v905_v63, %v909_v0  ;;  %v769_v5 = vld [vmem:[%s6862_s12 + $0x80] sm:$0xff]  ;;  %3915 = vmatprep.subr.bf16.mxu0 %v5590_v3  ;;  %v5717_v10 = vcombine.low %v905_v63, %v909_v0 }
 0x185   : > { %v773_v6 = vld [vmem:[%s6862_s12 + $0xa0] sm:$0xff]  ;;  %3916 = vmatpush1.bf16.msra.mxu0 %v5589_v9 }
 0x186   : > { %v897_v7 = vld [vmem:[%s6862_s12 + $0x480] sm:$0xff]  ;;  %v5582_v11 = vcombine.high %v769_v5, %v773_v6  ;;  %3958 = vmatprep.subr.bf16.mxu1 %v5718_v4  ;;  %v5581_v17 = vcombine.low %v769_v5, %v773_v6 }
 0x187   : > { %v901_v8 = vld [vmem:[%s6862_s12 + $0x4a0] sm:$0xff]  ;;  %3959 = vmatpush1.bf16.msra.mxu1 %v5717_v10 }
 0x188   : > { %v5710_v12 = vcombine.high %v897_v7, %v901_v8  ;;  %v761_v13 = vld [vmem:[%s6862_s12 + $0x40] sm:$0xff]  ;;  %3917 = vmatprep.subr.bf16.mxu0 %v5582_v11  ;;  %v5709_v18 = vcombine.low %v897_v7, %v901_v8 }
 0x189   : > { %v765_v14 = vld [vmem:[%s6862_s12 + $0x60] sm:$0xff]  ;;  %3918 = vmatpush1.bf16.msra.mxu0 %v5581_v17 }
 0x18a   : > { %v889_v15 = vld [vmem:[%s6862_s12 + $0x440] sm:$0xff]  ;;  %v5574_v19 = vcombine.high %v761_v13, %v765_v14  ;;  %3960 = vmatprep.subr.bf16.mxu1 %v5710_v12  ;;  %v5573_v31 = vcombine.low %v761_v13, %v765_v14 }
 0x18b   : > { %v893_v16 = vld [vmem:[%s6862_s12 + $0x460] sm:$0xff]  ;;  %3961 = vmatpush1.bf16.msra.mxu1 %v5709_v18 }
 0x18c   : > { %v753_v20 = vld [vmem:[%s6862_s12] sm:$0xff]  ;;  %v5702_v23 = vcombine.high %v889_v15, %v893_v16  ;;  %3919 = vmatprep.subr.bf16.mxu0 %v5574_v19  ;;  %v5701_v32 = vcombine.low %v889_v15, %v893_v16 }
 0x18d   : > { %v757_v24 = vld [vmem:[%s6862_s12 + $0x20] sm:$0xff]  ;;  %3920 = vmatpush1.bf16.msra.mxu0 %v5573_v31 }
 0x18e   : > { %v6939_v26 = vld [vmem:[%s6925_s27 + $0x8] sm:$0xff]  ;;  %v5566_v33 = vcombine.high %v753_v20, %v757_v24  ;;  %3962 = vmatprep.subr.bf16.mxu1 %v5702_v23  ;;  %v5565_v39 = vcombine.low %v753_v20, %v757_v24 }
 0x18f   : > { %v6942_v27 = vld [vmem:[%s6925_s27 + $0x28] sm:$0xff]  ;;  %3963 = vmatpush1.bf16.msra.mxu1 %v5701_v32 }
 0x190   : > { %v881_v28 = vld [vmem:[%s6862_s12 + $0x400] sm:$0xff]  ;;  %v6948_v30 = vcombine.high %v6939_v26, %v6942_v27  ;;  %3921 = vmatprep.subr.bf16.mxu0 %v5566_v33 }
 0x191   : > { %v885_v29 = vld [vmem:[%s6862_s12 + $0x420] sm:$0xff]  ;;  %3922 = vmatpush1.bf16.msra.mxu0 %v5565_v39 }
 0x192   : > { %v5694_v34 = vcombine.high %v881_v28, %v885_v29  ;;  %v873_v35 = vld [vmem:[%s6862_s12 + $0x3c0] sm:$0xff]  ;;  %3982 = vmatprep.mubr.bf16.mxu1 %v6948_v30  ;;  %v5693_v40 = vcombine.low %v881_v28, %v885_v29 }
 0x193   : > { %v877_v36 = vld [vmem:[%s6862_s12 + $0x3e0] sm:$0xff] }
 0x194   : > { %v1001_v37 = vld [vmem:[%s6862_s12 + $0x7c0] sm:$0xff]  ;;  %v5686_v41 = vcombine.high %v873_v35, %v877_v36  ;;  %3964 = vmatprep.subr.bf16.mxu1 %v5694_v34  ;;  %v5685_v47 = vcombine.low %v873_v35, %v877_v36 }
 0x195   : > { %v1005_v38 = vld [vmem:[%s6862_s12 + $0x7e0] sm:$0xff]  ;;  %3965 = vmatpush1.bf16.msra.mxu1 %v5693_v40 }
 0x196   : > { %v5814_v42 = vcombine.high %v1001_v37, %v1005_v38  ;;  %v865_v43 = vld [vmem:[%s6862_s12 + $0x380] sm:$0xff]  ;;  %3923 = vmatprep.subr.bf16.mxu0 %v5686_v41  ;;  %v5813_v48 = vcombine.low %v1001_v37, %v1005_v38 }
 0x197   : > { %v869_v44 = vld [vmem:[%s6862_s12 + $0x3a0] sm:$0xff]  ;;  %3924 = vmatpush2.bf16.msra.mxu0 %v5685_v47 }
 0x198   : > { %v993_v45 = vld [vmem:[%s6862_s12 + $0x780] sm:$0xff]  ;;  %v5678_v49 = vcombine.high %v865_v43, %v869_v44  ;;  %3966 = vmatprep.subr.bf16.mxu1 %v5814_v42  ;;  %v5677_v55 = vcombine.low %v865_v43, %v869_v44 }
 0x199   : > { %v997_v46 = vld [vmem:[%s6862_s12 + $0x7a0] sm:$0xff]  ;;  %3967 = vmatpush2.bf16.msra.mxu1 %v5813_v48 }
 0x19a   : > { %v5806_v50 = vcombine.high %v993_v45, %v997_v46  ;;  %v857_v51 = vld [vmem:[%s6862_s12 + $0x340] sm:$0xff]  ;;  %3925 = vmatprep.subr.bf16.mxu0 %v5678_v49  ;;  %v5805_v56 = vcombine.low %v993_v45, %v997_v46 }
 0x19b   : > { %v861_v52 = vld [vmem:[%s6862_s12 + $0x360] sm:$0xff]  ;;  %3926 = vmatpush2.bf16.msra.mxu0 %v5677_v55  ;;  %v7000_v55 = vld [vmem:[%s6925_s27 + $0x30] sm:$0xff] }
 0x19c   : > { %v985_v53 = vld [vmem:[%s6862_s12 + $0x740] sm:$0xff]  ;;  %v5670_v57 = vcombine.high %v857_v51, %v861_v52  ;;  %3968 = vmatprep.subr.bf16.mxu1 %v5806_v50  ;;  %v5669_v63 = vcombine.low %v857_v51, %v861_v52  ;;  %v6993_v52 = vcombine.low %v6928_v21, %v6931_v22 }
 0x19d   : > { %v989_v54 = vld [vmem:[%s6862_s12 + $0x760] sm:$0xff]  ;;  %3969 = vmatpush2.bf16.msra.mxu1 %v5805_v56  ;;  %v7004_v56 = vcombine.low %v6939_v26, %v6942_v27 }
 0x19e   : > { %v5798_v58 = vcombine.high %v985_v53, %v989_v54  ;;  %v849_v59 = vld [vmem:[%s6862_s12 + $0x300] sm:$0xff]  ;;  %3927 = vmatprep.subr.bf16.mxu0 %v5670_v57  ;;  %v5797_v0 = vcombine.low %v985_v53, %v989_v54  ;;  %v6997_v54 = vld [vmem:[%s6925_s27 + $0x10] sm:$0xff] }
 0x19f   : > { %v853_v60 = vld [vmem:[%s6862_s12 + $0x320] sm:$0xff]  ;;  %3928 = vmatpush2.bf16.msra.mxu0 %v5669_v63  ;;  %v7016_v63 = vcombine.high %v6997_v54, %v7000_v55 }
 0x1a0   : > { %v977_v61 = vld [vmem:[%s6862_s12 + $0x700] sm:$0xff]  ;;  %v5662_v1 = vcombine.high %v849_v59, %v853_v60  ;;  %3970 = vmatprep.subr.bf16.mxu1 %v5798_v58  ;;  %v5661_v7 = vcombine.low %v849_v59, %v853_v60  ;;  %v7007_v58 = vld [vmem:[%s6925_s27 + $0x18] sm:$0xff] }
 0x1a1   : > { %v981_v62 = vld [vmem:[%s6862_s12 + $0x720] sm:$0xff]  ;;  %3971 = vmatpush2.bf16.msra.mxu1 %v5797_v0  ;;  %v7010_v59 = vld [vmem:[%s6925_s27 + $0x38] sm:$0xff] }
 0x1a2   : > { %v5790_v2 = vcombine.high %v977_v61, %v981_v62  ;;  %v841_v3 = vld [vmem:[%s6862_s12 + $0x2c0] sm:$0xff]  ;;  %3929 = vmatprep.subr.bf16.mxu0 %v5662_v1  ;;  %v5789_v8 = vcombine.low %v977_v61, %v981_v62  ;;  %v7023_v0 = vcombine.high %v7007_v58, %v7010_v59 }
 0x1a3   : > { %v845_v4 = vld [vmem:[%s6862_s12 + $0x2e0] sm:$0xff]  ;;  %3930 = vmatpush2.bf16.msra.mxu0 %v5661_v7 }
 0x1a4   : > { %v969_v5 = vld [vmem:[%s6862_s12 + $0x6c0] sm:$0xff]  ;;  %v5654_v9 = vcombine.high %v841_v3, %v845_v4  ;;  %3972 = vmatprep.subr.bf16.mxu1 %v5790_v2  ;;  %v5653_v15 = vcombine.low %v841_v3, %v845_v4 }
 0x1a5   : > { %v973_v6 = vld [vmem:[%s6862_s12 + $0x6e0] sm:$0xff]  ;;  %3973 = vmatpush2.bf16.msra.mxu1 %v5789_v8 }
 0x1a6   : > { %v5782_v10 = vcombine.high %v969_v5, %v973_v6  ;;  %v833_v11 = vld [vmem:[%s6862_s12 + $0x280] sm:$0xff]  ;;  %3931 = vmatprep.subr.bf16.mxu0 %v5654_v9  ;;  %v5781_v16 = vcombine.low %v969_v5, %v973_v6 }
 0x1a7   : > { %v837_v12 = vld [vmem:[%s6862_s12 + $0x2a0] sm:$0xff]  ;;  %3932 = vmatpush2.bf16.msra.mxu0 %v5653_v15 }
 0x1a8   : > { %v961_v13 = vld [vmem:[%s6862_s12 + $0x680] sm:$0xff]  ;;  %v5646_v17 = vcombine.high %v833_v11, %v837_v12  ;;  %3974 = vmatprep.subr.bf16.mxu1 %v5782_v10  ;;  %v5645_v28 = vcombine.low %v833_v11, %v837_v12 }
 0x1a9   : > { %v965_v14 = vld [vmem:[%s6862_s12 + $0x6a0] sm:$0xff]  ;;  %3975 = vmatpush2.bf16.msra.mxu1 %v5781_v16 }
 0x1aa   : > { %v5774_v18 = vcombine.high %v961_v13, %v965_v14  ;;  %v825_v19 = vld [vmem:[%s6862_s12 + $0x240] sm:$0xff]  ;;  %3933 = vmatprep.subr.bf16.mxu0 %v5646_v17  ;;  %v5773_v29 = vcombine.low %v961_v13, %v965_v14 }
 0x1ab   : > { %v829_v20 = vld [vmem:[%s6862_s12 + $0x260] sm:$0xff]  ;;  %3934 = vmatpush2.bf16.msra.mxu0 %v5645_v28 }
 0x1ac   : > { %v953_v23 = vld [vmem:[%s6862_s12 + $0x640] sm:$0xff]  ;;  %v5638_v31 = vcombine.high %v825_v19, %v829_v20  ;;  %3976 = vmatprep.subr.bf16.mxu1 %v5774_v18  ;;  %v5637_v37 = vcombine.low %v825_v19, %v829_v20 }
 0x1ad   : > { %v957_v24 = vld [vmem:[%s6862_s12 + $0x660] sm:$0xff]  ;;  %3977 = vmatpush2.bf16.msra.mxu1 %v5773_v29 }
 0x1ae   : > { %v5766_v32 = vcombine.high %v953_v23, %v957_v24  ;;  %v817_v33 = vld [vmem:[%s6862_s12 + $0x200] sm:$0xff]  ;;  %3935 = vmatprep.subr.bf16.mxu0 %v5638_v31  ;;  %v5765_v38 = vcombine.low %v953_v23, %v957_v24 }
 0x1af   : > { %v821_v34 = vld [vmem:[%s6862_s12 + $0x220] sm:$0xff]  ;;  %3936 = vmatpush2.bf16.msra.mxu0 %v5637_v37 }
 0x1b0   : > { %v945_v35 = vld [vmem:[%s6862_s12 + $0x600] sm:$0xff]  ;;  %v5630_v39 = vcombine.high %v817_v33, %v821_v34  ;;  %3978 = vmatprep.subr.bf16.mxu1 %v5766_v32  ;;  %v5629_v45 = vcombine.low %v817_v33, %v821_v34 }
 0x1b1   : > { %v949_v36 = vld [vmem:[%s6862_s12 + $0x620] sm:$0xff]  ;;  %3979 = vmatpush2.bf16.msra.mxu1 %v5765_v38 }
 0x1b2   : > { %v5758_v40 = vcombine.high %v945_v35, %v949_v36  ;;  %v1065_v41 = vld [vmem:[%s6862_s12 + $0x9c0] sm:$0xff]  ;;  %3937 = vmatprep.subr.bf16.mxu0 %v5630_v39  ;;  %v5757_v46 = vcombine.low %v945_v35, %v949_v36 }
 0x1b3   : > { %v1069_v42 = vld [vmem:[%s6862_s12 + $0x9e0] sm:$0xff]  ;;  %3938 = vmatpush2.bf16.msra.mxu0 %v5629_v45 }
 0x1b4   : > { %v1193_v43 = vld [vmem:[%s6862_s12 + $0xdc0] sm:$0xff]  ;;  %v5878_v47 = vcombine.high %v1065_v41, %v1069_v42  ;;  %3980 = vmatprep.subr.bf16.mxu1 %v5758_v40  ;;  %v5877_v57 = vcombine.low %v1065_v41, %v1069_v42 }
 0x1b5   : > { %v1197_v44 = vld [vmem:[%s6862_s12 + $0xde0] sm:$0xff]  ;;  %3981 = vmatpush2.bf16.msra.mxu1 %v5757_v46 }
 0x1b6   : > { %v6006_v48 = vcombine.high %v1193_v43, %v1197_v44  ;;  %v1057_v49 = vld [vmem:[%s6862_s12 + $0x980] sm:$0xff]  ;;  %3993 = vmatprep.subr.bf16.mxu0 %v5878_v47  ;;  %v6005_v21 = vcombine.low %v1193_v43, %v1197_v44  ;;  %3940 = vmatmul.mubr.bf16.vlgmr.msra.gmra.mxu0 %v6993_v52 }
 0x1b7   : > { %v1061_v50 = vld [vmem:[%s6862_s12 + $0x9a0] sm:$0xff]  ;;  %3994 = vmatpush1.bf16.msra.mxu0 %v5877_v57  ;;  %4025 = vmatprep.mubr.bf16.mxu0 %v7016_v63 }
 0x1b8   : > { %v1185_v51 = vld [vmem:[%s6862_s12 + $0xd80] sm:$0xff]  ;;  %v5870_v22 = vcombine.high %v1057_v49, %v1061_v50  ;;  %4036 = vmatprep.subr.bf16.mxu1 %v6006_v48  ;;  %3983 = vmatmul.mubr.bf16.vlgmr.msra.gmra.mxu1 %v7004_v56  ;;  %v5869_v1 = vcombine.low %v1057_v49, %v1061_v50 }
 0x1b9   : > { %v1189_v53 = vld [vmem:[%s6862_s12 + $0xda0] sm:$0xff]  ;;  %4037 = vmatpush1.bf16.msra.mxu1 %v6005_v21  ;;  %4068 = vmatprep.mubr.bf16.mxu1 %v7023_v0 }
 0x1ba   : > { %v5998_v60 = vcombine.high %v1185_v51, %v1189_v53  ;;  %v1049_v61 = vld [vmem:[%s6862_s12 + $0x940] sm:$0xff]  ;;  %3995 = vmatprep.subr.bf16.mxu0 %v5870_v22  ;;  %v5997_v2 = vcombine.low %v1185_v51, %v1189_v53 }
 0x1bb   : > { %v1053_v62 = vld [vmem:[%s6862_s12 + $0x960] sm:$0xff]  ;;  %3996 = vmatpush1.bf16.msra.mxu0 %v5869_v1 }
 0x1bc   : > { %v1177_v26 = vld [vmem:[%s6862_s12 + $0xd40] sm:$0xff]  ;;  %v5862_v3 = vcombine.high %v1049_v61, %v1053_v62  ;;  %4038 = vmatprep.subr.bf16.mxu1 %v5998_v60  ;;  %v5861_v9 = vcombine.low %v1049_v61, %v1053_v62 }
 0x1bd   : > { %v1181_v27 = vld [vmem:[%s6862_s12 + $0xd60] sm:$0xff]  ;;  %4039 = vmatpush1.bf16.msra.mxu1 %v5997_v2 }
 0x1be   : > { %v5990_v4 = vcombine.high %v1177_v26, %v1181_v27  ;;  %v1041_v5 = vld [vmem:[%s6862_s12 + $0x900] sm:$0xff]  ;;  %3997 = vmatprep.subr.bf16.mxu0 %v5862_v3  ;;  %v5989_v10 = vcombine.low %v1177_v26, %v1181_v27 }
 0x1bf   : > { %v1045_v6 = vld [vmem:[%s6862_s12 + $0x920] sm:$0xff]  ;;  %3998 = vmatpush1.bf16.msra.mxu0 %v5861_v9 }
 0x1c0   : > { %v1169_v7 = vld [vmem:[%s6862_s12 + $0xd00] sm:$0xff]  ;;  %v5854_v11 = vcombine.high %v1041_v5, %v1045_v6  ;;  %4040 = vmatprep.subr.bf16.mxu1 %v5990_v4  ;;  %v5853_v17 = vcombine.low %v1041_v5, %v1045_v6 }
 0x1c1   : > { %v1173_v8 = vld [vmem:[%s6862_s12 + $0xd20] sm:$0xff]  ;;  %4041 = vmatpush1.bf16.msra.mxu1 %v5989_v10 }
 0x1c2   : > { %v5982_v12 = vcombine.high %v1169_v7, %v1173_v8  ;;  %v1033_v13 = vld [vmem:[%s6862_s12 + $0x8c0] sm:$0xff]  ;;  %3999 = vmatprep.subr.bf16.mxu0 %v5854_v11  ;;  %v5981_v18 = vcombine.low %v1169_v7, %v1173_v8 }
 0x1c3   : > { %v1037_v14 = vld [vmem:[%s6862_s12 + $0x8e0] sm:$0xff]  ;;  %4000 = vmatpush1.bf16.msra.mxu0 %v5853_v17 }
 0x1c4   : > { %v1161_v15 = vld [vmem:[%s6862_s12 + $0xcc0] sm:$0xff]  ;;  %v5846_v19 = vcombine.high %v1033_v13, %v1037_v14  ;;  %4042 = vmatprep.subr.bf16.mxu1 %v5982_v12  ;;  %v5845_v31 = vcombine.low %v1033_v13, %v1037_v14 }
 0x1c5   : > { %v1165_v16 = vld [vmem:[%s6862_s12 + $0xce0] sm:$0xff]  ;;  %4043 = vmatpush1.bf16.msra.mxu1 %v5981_v18 }
 0x1c6   : > { %v5974_v20 = vcombine.high %v1161_v15, %v1165_v16  ;;  %v1025_v23 = vld [vmem:[%s6862_s12 + $0x880] sm:$0xff]  ;;  %4001 = vmatprep.subr.bf16.mxu0 %v5846_v19  ;;  %v5973_v32 = vcombine.low %v1161_v15, %v1165_v16 }
 0x1c7   : > { %v1029_v24 = vld [vmem:[%s6862_s12 + $0x8a0] sm:$0xff]  ;;  %4002 = vmatpush1.bf16.msra.mxu0 %v5845_v31 }
 0x1c8   : > { %v1153_v28 = vld [vmem:[%s6862_s12 + $0xc80] sm:$0xff]  ;;  %v5838_v33 = vcombine.high %v1025_v23, %v1029_v24  ;;  %4044 = vmatprep.subr.bf16.mxu1 %v5974_v20  ;;  %v5837_v39 = vcombine.low %v1025_v23, %v1029_v24 }
 0x1c9   : > { %v1157_v29 = vld [vmem:[%s6862_s12 + $0xca0] sm:$0xff]  ;;  %4045 = vmatpush1.bf16.msra.mxu1 %v5973_v32 }
 0x1ca   : > { %v5966_v34 = vcombine.high %v1153_v28, %v1157_v29  ;;  %v1017_v35 = vld [vmem:[%s6862_s12 + $0x840] sm:$0xff]  ;;  %4003 = vmatprep.subr.bf16.mxu0 %v5838_v33  ;;  %v5965_v40 = vcombine.low %v1153_v28, %v1157_v29 }
 0x1cb   : > { %v1021_v36 = vld [vmem:[%s6862_s12 + $0x860] sm:$0xff]  ;;  %4004 = vmatpush1.bf16.msra.mxu0 %v5837_v39 }
 0x1cc   : > { %v1145_v37 = vld [vmem:[%s6862_s12 + $0xc40] sm:$0xff]  ;;  %v5830_v41 = vcombine.high %v1017_v35, %v1021_v36  ;;  %4046 = vmatprep.subr.bf16.mxu1 %v5966_v34  ;;  %v5829_v47 = vcombine.low %v1017_v35, %v1021_v36 }
 0x1cd   : > { %v1149_v38 = vld [vmem:[%s6862_s12 + $0xc60] sm:$0xff]  ;;  %4047 = vmatpush1.bf16.msra.mxu1 %v5965_v40 }
 0x1ce   : > { %v5958_v42 = vcombine.high %v1145_v37, %v1149_v38  ;;  %v1009_v43 = vld [vmem:[%s6862_s12 + $0x800] sm:$0xff]  ;;  %4005 = vmatprep.subr.bf16.mxu0 %v5830_v41  ;;  %v5957_v48 = vcombine.low %v1145_v37, %v1149_v38 }
 0x1cf   : > { %v1013_v44 = vld [vmem:[%s6862_s12 + $0x820] sm:$0xff]  ;;  %4006 = vmatpush1.bf16.msra.mxu0 %v5829_v47 }
 0x1d0   : > { %v1137_v45 = vld [vmem:[%s6862_s12 + $0xc00] sm:$0xff]  ;;  %v5822_v49 = vcombine.high %v1009_v43, %v1013_v44  ;;  %4048 = vmatprep.subr.bf16.mxu1 %v5958_v42  ;;  %v5821_v22 = vcombine.low %v1009_v43, %v1013_v44 }
 0x1d1   : > { %v1141_v46 = vld [vmem:[%s6862_s12 + $0xc20] sm:$0xff]  ;;  %4049 = vmatpush1.bf16.msra.mxu1 %v5957_v48 }
 0x1d2   : > { %v5950_v50 = vcombine.high %v1137_v45, %v1141_v46  ;;  %v1129_v51 = vld [vmem:[%s6862_s12 + $0xbc0] sm:$0xff]  ;;  %4007 = vmatprep.subr.bf16.mxu0 %v5822_v49  ;;  %v5949_v60 = vcombine.low %v1137_v45, %v1141_v46 }
 0x1d3   : > { %v1133_v53 = vld [vmem:[%s6862_s12 + $0xbe0] sm:$0xff]  ;;  %4008 = vmatpush1.bf16.msra.mxu0 %v5821_v22 }
 0x1d4   : > { %v1257_v57 = vld [vmem:[%s6862_s12 + $0xfc0] sm:$0xff]  ;;  %v5942_v61 = vcombine.high %v1129_v51, %v1133_v53  ;;  %4050 = vmatprep.subr.bf16.mxu1 %v5950_v50  ;;  %v5941_v3 = vcombine.low %v1129_v51, %v1133_v53 }
 0x1d5   : > { %v1261_v21 = vld [vmem:[%s6862_s12 + $0xfe0] sm:$0xff]  ;;  %4051 = vmatpush1.bf16.msra.mxu1 %v5949_v60 }
 0x1d6   : > { %v6070_v62 = vcombine.high %v1257_v57, %v1261_v21  ;;  %v1121_v26 = vld [vmem:[%s6862_s12 + $0xb80] sm:$0xff]  ;;  %4009 = vmatprep.subr.bf16.mxu0 %v5942_v61  ;;  %v6069_v4 = vcombine.low %v1257_v57, %v1261_v21 }
 0x1d7   : > { %v1125_v27 = vld [vmem:[%s6862_s12 + $0xba0] sm:$0xff]  ;;  %4010 = vmatpush2.bf16.msra.mxu0 %v5941_v3  ;;  %v938_v3 = vld [vmem:[%s6862_s12 + $0x5c8] sm:$0xff] }
 0x1d8   : > { %v1249_v1 = vld [vmem:[%s6862_s12 + $0xf80] sm:$0xff]  ;;  %v5934_v5 = vcombine.high %v1121_v26, %v1125_v27  ;;  %4052 = vmatprep.subr.bf16.mxu1 %v6070_v62  ;;  %v5933_v11 = vcombine.low %v1121_v26, %v1125_v27 }
 0x1d9   : > { %v1253_v2 = vld [vmem:[%s6862_s12 + $0xfa0] sm:$0xff]  ;;  %4053 = vmatpush2.bf16.msra.mxu1 %v6069_v4  ;;  %v942_v4 = vld [vmem:[%s6862_s12 + $0x5e8] sm:$0xff] }
 0x1da   : > { %v6062_v6 = vcombine.high %v1249_v1, %v1253_v2  ;;  %v1113_v7 = vld [vmem:[%s6862_s12 + $0xb40] sm:$0xff]  ;;  %4011 = vmatprep.subr.bf16.mxu0 %v5934_v5  ;;  %v6061_v12 = vcombine.low %v1249_v1, %v1253_v2  ;;  %v810_v1 = vld [vmem:[%s6862_s12 + $0x1c8] sm:$0xff] }
 0x1db   : > { %v1117_v8 = vld [vmem:[%s6862_s12 + $0xb60] sm:$0xff]  ;;  %4012 = vmatpush2.bf16.msra.mxu0 %v5933_v11  ;;  %v814_v2 = vld [vmem:[%s6862_s12 + $0x1e8] sm:$0xff]  ;;  %v7088_v11 = vcombine.low %v6997_v54, %v7000_v55 }
 0x1dc   : > { %v1241_v9 = vld [vmem:[%s6862_s12 + $0xf40] sm:$0xff]  ;;  %v5926_v13 = vcombine.high %v1113_v7, %v1117_v8  ;;  %4054 = vmatprep.subr.bf16.mxu1 %v6062_v6  ;;  %v5925_v19 = vcombine.low %v1113_v7, %v1117_v8  ;;  %v5624_v7 = vcombine.high %v810_v1, %v814_v2  ;;  %v5752_v8 = vcombine.high %v938_v3, %v942_v4  ;;  %v798_v54 = vld [vmem:[%s6862_s12 + $0x168] sm:$0xff] }
 0x1dd   : > { %v1245_v10 = vld [vmem:[%s6862_s12 + $0xf60] sm:$0xff]  ;;  %4055 = vmatpush2.bf16.msra.mxu1 %v6061_v12  ;;  %v930_v12 = vld [vmem:[%s6862_s12 + $0x588] sm:$0xff] }
 0x1de   : > { %v6054_v14 = vcombine.high %v1241_v9, %v1245_v10  ;;  %v1105_v15 = vld [vmem:[%s6862_s12 + $0xb00] sm:$0xff]  ;;  %4013 = vmatprep.subr.bf16.mxu0 %v5926_v13  ;;  %v6053_v20 = vcombine.low %v1241_v9, %v1245_v10  ;;  %v802_v9 = vld [vmem:[%s6862_s12 + $0x188] sm:$0xff] }
 0x1df   : > { %v1109_v16 = vld [vmem:[%s6862_s12 + $0xb20] sm:$0xff]  ;;  %4014 = vmatpush2.bf16.msra.mxu0 %v5925_v19  ;;  %v806_v10 = vld [vmem:[%s6862_s12 + $0x1a8] sm:$0xff] }
 0x1e0   : > { %v1233_v17 = vld [vmem:[%s6862_s12 + $0xf00] sm:$0xff]  ;;  %v5918_v23 = vcombine.high %v1105_v15, %v1109_v16  ;;  %4056 = vmatprep.subr.bf16.mxu1 %v6054_v14  ;;  %v5917_v33 = vcombine.low %v1105_v15, %v1109_v16  ;;  %v934_v13 = vld [vmem:[%s6862_s12 + $0x5a8] sm:$0xff]  ;;  %v7094_v14 = vcombine.low %v7007_v58, %v7010_v59  ;;  %v5623_v15 = vcombine.low %v810_v1, %v814_v2 }
 0x1e1   : > { %v1237_v18 = vld [vmem:[%s6862_s12 + $0xf20] sm:$0xff]  ;;  %4057 = vmatpush2.bf16.msra.mxu1 %v6053_v20  ;;  %v5751_v16 = vcombine.low %v938_v3, %v942_v4  ;;  %v794_v19 = vld [vmem:[%s6862_s12 + $0x148] sm:$0xff]  ;;  %v5615_v58 = vcombine.low %v802_v9, %v806_v10  ;;  %v5743_v59 = vcombine.low %v930_v12, %v934_v13 }
 0x1e2   : > { %v6046_v24 = vcombine.high %v1233_v17, %v1237_v18  ;;  %v1097_v28 = vld [vmem:[%s6862_s12 + $0xac0] sm:$0xff]  ;;  %4015 = vmatprep.subr.bf16.mxu0 %v5918_v23  ;;  %v6045_v34 = vcombine.low %v1233_v17, %v1237_v18  ;;  %v5616_v17 = vcombine.high %v802_v9, %v806_v10  ;;  %v5744_v18 = vcombine.high %v930_v12, %v934_v13  ;;  %v922_v55 = vld [vmem:[%s6862_s12 + $0x548] sm:$0xff] }
 0x1e3   : > { %v1101_v29 = vld [vmem:[%s6862_s12 + $0xae0] sm:$0xff]  ;;  %4016 = vmatpush2.bf16.msra.mxu0 %v5917_v33  ;;  %v926_v20 = vld [vmem:[%s6862_s12 + $0x568] sm:$0xff]  ;;  %v5608_v23 = vcombine.high %v794_v19, %v798_v54  ;;  %v5607_v33 = vcombine.low %v794_v19, %v798_v54 }
 0x1e4   : > { %v1225_v31 = vld [vmem:[%s6862_s12 + $0xec0] sm:$0xff]  ;;  %v5910_v35 = vcombine.high %v1097_v28, %v1101_v29  ;;  %4058 = vmatprep.subr.bf16.mxu1 %v6046_v24  ;;  %v5909_v41 = vcombine.low %v1097_v28, %v1101_v29  ;;  %v5736_v24 = vcombine.high %v922_v55, %v926_v20  ;;  %v786_v28 = vld [vmem:[%s6862_s12 + $0x108] sm:$0xff] }
 0x1e5   : > { %v1229_v32 = vld [vmem:[%s6862_s12 + $0xee0] sm:$0xff]  ;;  %4059 = vmatpush2.bf16.msra.mxu1 %v6045_v34  ;;  %v790_v29 = vld [vmem:[%s6862_s12 + $0x128] sm:$0xff]  ;;  %v5735_v34 = vcombine.low %v922_v55, %v926_v20 }
 0x1e6   : > { %v6038_v36 = vcombine.high %v1225_v31, %v1229_v32  ;;  %v1089_v37 = vld [vmem:[%s6862_s12 + $0xa80] sm:$0xff]  ;;  %4017 = vmatprep.subr.bf16.mxu0 %v5910_v35  ;;  %v6037_v42 = vcombine.low %v1225_v31, %v1229_v32  ;;  %v914_v31 = vld [vmem:[%s6862_s12 + $0x508] sm:$0xff]  ;;  %v5600_v35 = vcombine.high %v786_v28, %v790_v29 }
 0x1e7   : > { %v1093_v38 = vld [vmem:[%s6862_s12 + $0xaa0] sm:$0xff]  ;;  %4018 = vmatpush2.bf16.msra.mxu0 %v5909_v41  ;;  %v918_v32 = vld [vmem:[%s6862_s12 + $0x528] sm:$0xff]  ;;  %v5599_v41 = vcombine.low %v786_v28, %v790_v29 }
 0x1e8   : > { %v1217_v39 = vld [vmem:[%s6862_s12 + $0xe80] sm:$0xff]  ;;  %v5902_v43 = vcombine.high %v1089_v37, %v1093_v38  ;;  %4060 = vmatprep.subr.bf16.mxu1 %v6038_v36  ;;  %v5901_v49 = vcombine.low %v1089_v37, %v1093_v38  ;;  %v5728_v36 = vcombine.high %v914_v31, %v918_v32  ;;  %v778_v37 = vld [vmem:[%s6862_s12 + $0xc8] sm:$0xff] }
 0x1e9   : > { %v1221_v40 = vld [vmem:[%s6862_s12 + $0xea0] sm:$0xff]  ;;  %4061 = vmatpush2.bf16.msra.mxu1 %v6037_v42  ;;  %v782_v38 = vld [vmem:[%s6862_s12 + $0xe8] sm:$0xff]  ;;  %v5727_v42 = vcombine.low %v914_v31, %v918_v32 }
 0x1ea   : > { %v6030_v44 = vcombine.high %v1217_v39, %v1221_v40  ;;  %v1081_v45 = vld [vmem:[%s6862_s12 + $0xa40] sm:$0xff]  ;;  %4019 = vmatprep.subr.bf16.mxu0 %v5902_v43  ;;  %v6029_v50 = vcombine.low %v1217_v39, %v1221_v40  ;;  %v906_v39 = vld [vmem:[%s6862_s12 + $0x4c8] sm:$0xff]  ;;  %v5592_v43 = vcombine.high %v778_v37, %v782_v38 }
 0x1eb   : > { %v1085_v46 = vld [vmem:[%s6862_s12 + $0xa60] sm:$0xff]  ;;  %4020 = vmatpush2.bf16.msra.mxu0 %v5901_v49  ;;  %v910_v40 = vld [vmem:[%s6862_s12 + $0x4e8] sm:$0xff]  ;;  %v5591_v49 = vcombine.low %v778_v37, %v782_v38 }
 0x1ec   : > { %v1209_v47 = vld [vmem:[%s6862_s12 + $0xe40] sm:$0xff]  ;;  %v5894_v51 = vcombine.high %v1081_v45, %v1085_v46  ;;  %4062 = vmatprep.subr.bf16.mxu1 %v6030_v44  ;;  %v5893_v61 = vcombine.low %v1081_v45, %v1085_v46  ;;  %v5720_v44 = vcombine.high %v906_v39, %v910_v40  ;;  %v770_v45 = vld [vmem:[%s6862_s12 + $0x88] sm:$0xff] }
 0x1ed   : > { %v1213_v48 = vld [vmem:[%s6862_s12 + $0xe60] sm:$0xff]  ;;  %4063 = vmatpush2.bf16.msra.mxu1 %v6029_v50  ;;  %v774_v46 = vld [vmem:[%s6862_s12 + $0xa8] sm:$0xff]  ;;  %v5719_v50 = vcombine.low %v906_v39, %v910_v40 }
 0x1ee   : > { %v6022_v53 = vcombine.high %v1209_v47, %v1213_v48  ;;  %v1073_v57 = vld [vmem:[%s6862_s12 + $0xa00] sm:$0xff]  ;;  %4021 = vmatprep.subr.bf16.mxu0 %v5894_v51  ;;  %v6021_v62 = vcombine.low %v1209_v47, %v1213_v48  ;;  %v898_v47 = vld [vmem:[%s6862_s12 + $0x488] sm:$0xff]  ;;  %v5584_v51 = vcombine.high %v770_v45, %v774_v46 }
 0x1ef   : > { %v1077_v21 = vld [vmem:[%s6862_s12 + $0xa20] sm:$0xff]  ;;  %4022 = vmatpush2.bf16.msra.mxu0 %v5893_v61  ;;  %v902_v48 = vld [vmem:[%s6862_s12 + $0x4a8] sm:$0xff]  ;;  %v5583_v61 = vcombine.low %v770_v45, %v774_v46 }
 0x1f0   : > { %v1201_v22 = vld [vmem:[%s6862_s12 + $0xe00] sm:$0xff]  ;;  %v5886_v26 = vcombine.high %v1073_v57, %v1077_v21  ;;  %4064 = vmatprep.subr.bf16.mxu1 %v6022_v53  ;;  %v5885_v5 = vcombine.low %v1073_v57, %v1077_v21  ;;  %v5712_v53 = vcombine.high %v898_v47, %v902_v48  ;;  %v762_v57 = vld [vmem:[%s6862_s12 + $0x48] sm:$0xff] }
 0x1f1   : > { %v1205_v60 = vld [vmem:[%s6862_s12 + $0xe20] sm:$0xff]  ;;  %4065 = vmatpush2.bf16.msra.mxu1 %v6021_v62  ;;  %v766_v21 = vld [vmem:[%s6862_s12 + $0x68] sm:$0xff]  ;;  %v5711_v62 = vcombine.low %v898_v47, %v902_v48 }
 0x1f2   : > { %v6014_v27 = vcombine.high %v1201_v22, %v1205_v60  ;;  %4023 = vmatprep.subr.bf16.mxu0 %v5886_v26  ;;  %v6013_v6 = vcombine.low %v1201_v22, %v1205_v60  ;;  %v890_v22 = vld [vmem:[%s6862_s12 + $0x448] sm:$0xff]  ;;  %v5576_v26 = vcombine.high %v762_v57, %v766_v21 }
 0x1f3   : > { %4024 = vmatpush2.bf16.msra.mxu0 %v5885_v5  ;;  %v894_v60 = vld [vmem:[%s6862_s12 + $0x468] sm:$0xff]  ;;  %v5575_v5 = vcombine.low %v762_v57, %v766_v21 }
 0x1f4   : > { %4066 = vmatprep.subr.bf16.mxu1 %v6014_v27  ;;  %4079 = vmatprep.subr.bf16.mxu0 %v5624_v7  ;;  %v5704_v27 = vcombine.high %v890_v22, %v894_v60  ;;  %v754_v1 = vld [vmem:[%s6862_s12 + $0x8] sm:$0xff] }
 0x1f5   : > { %4067 = vmatpush2.bf16.msra.mxu1 %v6013_v6  ;;  %v758_v2 = vld [vmem:[%s6862_s12 + $0x28] sm:$0xff]  ;;  %v5703_v6 = vcombine.low %v890_v22, %v894_v60 }
 0x1f6   : > { %4122 = vmatprep.subr.bf16.mxu1 %v5752_v8  ;;  %4026 = vmatmul.mubr.bf16.vlgmr.msra.gmra.mxu0 %v7088_v11  ;;  %v882_v3 = vld [vmem:[%s6862_s12 + $0x408] sm:$0xff]  ;;  %v5568_v7 = vcombine.high %v754_v1, %v758_v2 }
 0x1f7   : > { %4080 = vmatpush1.bf16.msra.mxu0 %v5623_v15  ;;  %4111 = vmatprep.mubr.bf16.mxu0 %v6936_v25  ;;  %v886_v4 = vld [vmem:[%s6862_s12 + $0x428] sm:$0xff]  ;;  %v5567_v15 = vcombine.low %v754_v1, %v758_v2 }
 0x1f8   : > { %4069 = vmatmul.mubr.bf16.vlgmr.msra.gmra.mxu1 %v7094_v14  ;;  %4081 = vmatprep.subr.bf16.mxu0 %v5616_v17  ;;  %v5696_v8 = vcombine.high %v882_v3, %v886_v4  ;;  %v874_v9 = vld [vmem:[%s6862_s12 + $0x3c8] sm:$0xff] }
 0x1f9   : > { %4123 = vmatpush1.bf16.msra.mxu1 %v5751_v16  ;;  %4154 = vmatprep.mubr.bf16.mxu1 %v6948_v30  ;;  %v878_v10 = vld [vmem:[%s6862_s12 + $0x3e8] sm:$0xff]  ;;  %v5695_v16 = vcombine.low %v882_v3, %v886_v4 }
 0x1fa   : > { %4124 = vmatprep.subr.bf16.mxu1 %v5744_v18  ;;  %v1002_v12 = vld [vmem:[%s6862_s12 + $0x7c8] sm:$0xff]  ;;  %v5688_v17 = vcombine.high %v874_v9, %v878_v10 }
 0x1fb   : > { %4082 = vmatpush1.bf16.msra.mxu0 %v5615_v58  ;;  %v1006_v13 = vld [vmem:[%s6862_s12 + $0x7e8] sm:$0xff]  ;;  %v5687_v58 = vcombine.low %v874_v9, %v878_v10 }
 0x1fc   : > { %4083 = vmatprep.subr.bf16.mxu0 %v5608_v23  ;;  %v5816_v18 = vcombine.high %v1002_v12, %v1006_v13  ;;  %v866_v19 = vld [vmem:[%s6862_s12 + $0x388] sm:$0xff] }
 0x1fd   : > { %4125 = vmatpush1.bf16.msra.mxu1 %v5743_v59  ;;  %v870_v54 = vld [vmem:[%s6862_s12 + $0x3a8] sm:$0xff]  ;;  %v5815_v59 = vcombine.low %v1002_v12, %v1006_v13 }
 0x1fe   : > { %4126 = vmatprep.subr.bf16.mxu1 %v5736_v24  ;;  %v994_v55 = vld [vmem:[%s6862_s12 + $0x788] sm:$0xff]  ;;  %v5680_v23 = vcombine.high %v866_v19, %v870_v54 }
 0x1ff   : > { %4084 = vmatpush1.bf16.msra.mxu0 %v5607_v33  ;;  %v998_v20 = vld [vmem:[%s6862_s12 + $0x7a8] sm:$0xff]  ;;  %v5679_v33 = vcombine.low %v866_v19, %v870_v54 }
 0x200   : > { %4085 = vmatprep.subr.bf16.mxu0 %v5600_v35  ;;  %v5808_v24 = vcombine.high %v994_v55, %v998_v20  ;;  %v858_v28 = vld [vmem:[%s6862_s12 + $0x348] sm:$0xff] }
 0x201   : > { %4127 = vmatpush1.bf16.msra.mxu1 %v5735_v34  ;;  %v862_v29 = vld [vmem:[%s6862_s12 + $0x368] sm:$0xff]  ;;  %v5807_v34 = vcombine.low %v994_v55, %v998_v20 }
 0x202   : > { %4128 = vmatprep.subr.bf16.mxu1 %v5728_v36  ;;  %v986_v31 = vld [vmem:[%s6862_s12 + $0x748] sm:$0xff]  ;;  %v5672_v35 = vcombine.high %v858_v28, %v862_v29 }
 0x203   : > { %4086 = vmatpush1.bf16.msra.mxu0 %v5599_v41  ;;  %v990_v32 = vld [vmem:[%s6862_s12 + $0x768] sm:$0xff]  ;;  %v5671_v41 = vcombine.low %v858_v28, %v862_v29 }
 0x204   : > { %4087 = vmatprep.subr.bf16.mxu0 %v5592_v43  ;;  %v5800_v36 = vcombine.high %v986_v31, %v990_v32  ;;  %v850_v37 = vld [vmem:[%s6862_s12 + $0x308] sm:$0xff] }
 0x205   : > { %4129 = vmatpush1.bf16.msra.mxu1 %v5727_v42  ;;  %v854_v38 = vld [vmem:[%s6862_s12 + $0x328] sm:$0xff]  ;;  %v5799_v42 = vcombine.low %v986_v31, %v990_v32 }
 0x206   : > { %4130 = vmatprep.subr.bf16.mxu1 %v5720_v44  ;;  %v978_v39 = vld [vmem:[%s6862_s12 + $0x708] sm:$0xff]  ;;  %v5664_v43 = vcombine.high %v850_v37, %v854_v38 }
 0x207   : > { %4088 = vmatpush1.bf16.msra.mxu0 %v5591_v49  ;;  %v982_v40 = vld [vmem:[%s6862_s12 + $0x728] sm:$0xff]  ;;  %v5663_v49 = vcombine.low %v850_v37, %v854_v38 }
 0x208   : > { %4089 = vmatprep.subr.bf16.mxu0 %v5584_v51  ;;  %v5792_v44 = vcombine.high %v978_v39, %v982_v40  ;;  %v842_v45 = vld [vmem:[%s6862_s12 + $0x2c8] sm:$0xff] }
 0x209   : > { %4131 = vmatpush1.bf16.msra.mxu1 %v5719_v50  ;;  %v846_v46 = vld [vmem:[%s6862_s12 + $0x2e8] sm:$0xff]  ;;  %v5791_v50 = vcombine.low %v978_v39, %v982_v40 }
 0x20a   : > { %4132 = vmatprep.subr.bf16.mxu1 %v5712_v53  ;;  %v970_v47 = vld [vmem:[%s6862_s12 + $0x6c8] sm:$0xff]  ;;  %v5656_v51 = vcombine.high %v842_v45, %v846_v46 }
 0x20b   : > { %4090 = vmatpush1.bf16.msra.mxu0 %v5583_v61  ;;  %v974_v48 = vld [vmem:[%s6862_s12 + $0x6e8] sm:$0xff]  ;;  %v5655_v61 = vcombine.low %v842_v45, %v846_v46 }
 0x20c   : > { %4091 = vmatprep.subr.bf16.mxu0 %v5576_v26  ;;  %v5784_v53 = vcombine.high %v970_v47, %v974_v48  ;;  %v834_v57 = vld [vmem:[%s6862_s12 + $0x288] sm:$0xff] }
 0x20d   : > { %4133 = vmatpush1.bf16.msra.mxu1 %v5711_v62  ;;  %v838_v21 = vld [vmem:[%s6862_s12 + $0x2a8] sm:$0xff]  ;;  %v5783_v62 = vcombine.low %v970_v47, %v974_v48 }
 0x20e   : > { %4134 = vmatprep.subr.bf16.mxu1 %v5704_v27  ;;  %v962_v22 = vld [vmem:[%s6862_s12 + $0x688] sm:$0xff]  ;;  %v5648_v26 = vcombine.high %v834_v57, %v838_v21 }
 0x20f   : > { %4092 = vmatpush1.bf16.msra.mxu0 %v5575_v5  ;;  %v966_v60 = vld [vmem:[%s6862_s12 + $0x6a8] sm:$0xff]  ;;  %v5647_v5 = vcombine.low %v834_v57, %v838_v21 }
 0x210   : > { %4093 = vmatprep.subr.bf16.mxu0 %v5568_v7  ;;  %v5776_v27 = vcombine.high %v962_v22, %v966_v60  ;;  %v826_v1 = vld [vmem:[%s6862_s12 + $0x248] sm:$0xff] }
 0x211   : > { %4135 = vmatpush1.bf16.msra.mxu1 %v5703_v6  ;;  %v830_v2 = vld [vmem:[%s6862_s12 + $0x268] sm:$0xff]  ;;  %v5775_v6 = vcombine.low %v962_v22, %v966_v60 }
 0x212   : > { %4136 = vmatprep.subr.bf16.mxu1 %v5696_v8  ;;  %v954_v3 = vld [vmem:[%s6862_s12 + $0x648] sm:$0xff]  ;;  %v5640_v7 = vcombine.high %v826_v1, %v830_v2 }
 0x213   : > { %4094 = vmatpush1.bf16.msra.mxu0 %v5567_v15  ;;  %v958_v4 = vld [vmem:[%s6862_s12 + $0x668] sm:$0xff]  ;;  %v5639_v15 = vcombine.low %v826_v1, %v830_v2 }
 0x214   : > { %4095 = vmatprep.subr.bf16.mxu0 %v5688_v17  ;;  %v5768_v8 = vcombine.high %v954_v3, %v958_v4  ;;  %v818_v9 = vld [vmem:[%s6862_s12 + $0x208] sm:$0xff] }
 0x215   : > { %4137 = vmatpush1.bf16.msra.mxu1 %v5695_v16  ;;  %v822_v10 = vld [vmem:[%s6862_s12 + $0x228] sm:$0xff]  ;;  %v5767_v16 = vcombine.low %v954_v3, %v958_v4 }
 0x216   : > { %4138 = vmatprep.subr.bf16.mxu1 %v5816_v18  ;;  %v946_v12 = vld [vmem:[%s6862_s12 + $0x608] sm:$0xff]  ;;  %v5632_v17 = vcombine.high %v818_v9, %v822_v10 }
 0x217   : > { %4096 = vmatpush2.bf16.msra.mxu0 %v5687_v58  ;;  %v950_v13 = vld [vmem:[%s6862_s12 + $0x628] sm:$0xff]  ;;  %v5631_v58 = vcombine.low %v818_v9, %v822_v10 }
 0x218   : > { %4097 = vmatprep.subr.bf16.mxu0 %v5680_v23  ;;  %v5760_v18 = vcombine.high %v946_v12, %v950_v13  ;;  %v1066_v19 = vld [vmem:[%s6862_s12 + $0x9c8] sm:$0xff] }
 0x219   : > { %4139 = vmatpush2.bf16.msra.mxu1 %v5815_v59  ;;  %v1070_v54 = vld [vmem:[%s6862_s12 + $0x9e8] sm:$0xff]  ;;  %v5759_v59 = vcombine.low %v946_v12, %v950_v13 }
 0x21a   : > { %4140 = vmatprep.subr.bf16.mxu1 %v5808_v24  ;;  %v1194_v55 = vld [vmem:[%s6862_s12 + $0xdc8] sm:$0xff]  ;;  %v5880_v23 = vcombine.high %v1066_v19, %v1070_v54 }
 0x21b   : > { %4098 = vmatpush2.bf16.msra.mxu0 %v5679_v33  ;;  %v1198_v20 = vld [vmem:[%s6862_s12 + $0xde8] sm:$0xff]  ;;  %v5879_v33 = vcombine.low %v1066_v19, %v1070_v54 }
 0x21c   : > { %4099 = vmatprep.subr.bf16.mxu0 %v5672_v35  ;;  %v6008_v24 = vcombine.high %v1194_v55, %v1198_v20  ;;  %v1058_v28 = vld [vmem:[%s6862_s12 + $0x988] sm:$0xff] }
 0x21d   : > { %4141 = vmatpush2.bf16.msra.mxu1 %v5807_v34  ;;  %v1062_v29 = vld [vmem:[%s6862_s12 + $0x9a8] sm:$0xff]  ;;  %v6007_v34 = vcombine.low %v1194_v55, %v1198_v20 }
 0x21e   : > { %4142 = vmatprep.subr.bf16.mxu1 %v5800_v36  ;;  %v1186_v31 = vld [vmem:[%s6862_s12 + $0xd88] sm:$0xff]  ;;  %v5872_v35 = vcombine.high %v1058_v28, %v1062_v29 }
 0x21f   : > { %4100 = vmatpush2.bf16.msra.mxu0 %v5671_v41  ;;  %v1190_v32 = vld [vmem:[%s6862_s12 + $0xda8] sm:$0xff]  ;;  %v5871_v41 = vcombine.low %v1058_v28, %v1062_v29 }
 0x220   : > { %4101 = vmatprep.subr.bf16.mxu0 %v5664_v43  ;;  %v6000_v36 = vcombine.high %v1186_v31, %v1190_v32  ;;  %v1050_v37 = vld [vmem:[%s6862_s12 + $0x948] sm:$0xff] }
 0x221   : > { %4143 = vmatpush2.bf16.msra.mxu1 %v5799_v42  ;;  %v1054_v38 = vld [vmem:[%s6862_s12 + $0x968] sm:$0xff]  ;;  %v5999_v42 = vcombine.low %v1186_v31, %v1190_v32 }
 0x222   : > { %4144 = vmatprep.subr.bf16.mxu1 %v5792_v44  ;;  %v1178_v39 = vld [vmem:[%s6862_s12 + $0xd48] sm:$0xff]  ;;  %v5864_v43 = vcombine.high %v1050_v37, %v1054_v38 }
 0x223   : > { %4102 = vmatpush2.bf16.msra.mxu0 %v5663_v49  ;;  %v1182_v40 = vld [vmem:[%s6862_s12 + $0xd68] sm:$0xff]  ;;  %v5863_v49 = vcombine.low %v1050_v37, %v1054_v38 }
 0x224   : > { %4103 = vmatprep.subr.bf16.mxu0 %v5656_v51  ;;  %v5992_v44 = vcombine.high %v1178_v39, %v1182_v40  ;;  %v1042_v45 = vld [vmem:[%s6862_s12 + $0x908] sm:$0xff] }
 0x225   : > { %4145 = vmatpush2.bf16.msra.mxu1 %v5791_v50  ;;  %v1046_v46 = vld [vmem:[%s6862_s12 + $0x928] sm:$0xff]  ;;  %v5991_v50 = vcombine.low %v1178_v39, %v1182_v40 }
 0x226   : > { %4146 = vmatprep.subr.bf16.mxu1 %v5784_v53  ;;  %v1170_v47 = vld [vmem:[%s6862_s12 + $0xd08] sm:$0xff]  ;;  %v5856_v51 = vcombine.high %v1042_v45, %v1046_v46 }
 0x227   : > { %4104 = vmatpush2.bf16.msra.mxu0 %v5655_v61  ;;  %v1174_v48 = vld [vmem:[%s6862_s12 + $0xd28] sm:$0xff]  ;;  %v5855_v61 = vcombine.low %v1042_v45, %v1046_v46 }
 0x228   : > { %4105 = vmatprep.subr.bf16.mxu0 %v5648_v26  ;;  %v5984_v53 = vcombine.high %v1170_v47, %v1174_v48  ;;  %v1034_v57 = vld [vmem:[%s6862_s12 + $0x8c8] sm:$0xff] }
 0x229   : > { %4147 = vmatpush2.bf16.msra.mxu1 %v5783_v62  ;;  %v1038_v21 = vld [vmem:[%s6862_s12 + $0x8e8] sm:$0xff]  ;;  %v5983_v62 = vcombine.low %v1170_v47, %v1174_v48 }
 0x22a   : > { %4148 = vmatprep.subr.bf16.mxu1 %v5776_v27  ;;  %v1162_v22 = vld [vmem:[%s6862_s12 + $0xcc8] sm:$0xff]  ;;  %v5848_v26 = vcombine.high %v1034_v57, %v1038_v21 }
 0x22b   : > { %4106 = vmatpush2.bf16.msra.mxu0 %v5647_v5  ;;  %v1166_v60 = vld [vmem:[%s6862_s12 + $0xce8] sm:$0xff]  ;;  %v5847_v5 = vcombine.low %v1034_v57, %v1038_v21 }
 0x22c   : > { %4107 = vmatprep.subr.bf16.mxu0 %v5640_v7  ;;  %v5976_v27 = vcombine.high %v1162_v22, %v1166_v60  ;;  %v1026_v1 = vld [vmem:[%s6862_s12 + $0x888] sm:$0xff] }
 0x22d   : > { %4149 = vmatpush2.bf16.msra.mxu1 %v5775_v6  ;;  %v1030_v2 = vld [vmem:[%s6862_s12 + $0x8a8] sm:$0xff]  ;;  %v5975_v6 = vcombine.low %v1162_v22, %v1166_v60 }
 0x22e   : > { %4150 = vmatprep.subr.bf16.mxu1 %v5768_v8  ;;  %v1154_v3 = vld [vmem:[%s6862_s12 + $0xc88] sm:$0xff]  ;;  %v5840_v7 = vcombine.high %v1026_v1, %v1030_v2 }
 0x22f   : > { %4108 = vmatpush2.bf16.msra.mxu0 %v5639_v15  ;;  %v1158_v4 = vld [vmem:[%s6862_s12 + $0xca8] sm:$0xff]  ;;  %v5839_v15 = vcombine.low %v1026_v1, %v1030_v2 }
 0x230   : > { %4109 = vmatprep.subr.bf16.mxu0 %v5632_v17  ;;  %v5968_v8 = vcombine.high %v1154_v3, %v1158_v4  ;;  %v1018_v9 = vld [vmem:[%s6862_s12 + $0x848] sm:$0xff] }
 0x231   : > { %4151 = vmatpush2.bf16.msra.mxu1 %v5767_v16  ;;  %v1022_v10 = vld [vmem:[%s6862_s12 + $0x868] sm:$0xff]  ;;  %v5967_v16 = vcombine.low %v1154_v3, %v1158_v4 }
 0x232   : > { %4152 = vmatprep.subr.bf16.mxu1 %v5760_v18  ;;  %v1146_v12 = vld [vmem:[%s6862_s12 + $0xc48] sm:$0xff]  ;;  %v5832_v17 = vcombine.high %v1018_v9, %v1022_v10 }
 0x233   : > { %4110 = vmatpush2.bf16.msra.mxu0 %v5631_v58  ;;  %v1150_v13 = vld [vmem:[%s6862_s12 + $0xc68] sm:$0xff]  ;;  %v5831_v58 = vcombine.low %v1018_v9, %v1022_v10 }
 0x234   : > { %4165 = vmatprep.subr.bf16.mxu0 %v5880_v23  ;;  %v5960_v18 = vcombine.high %v1146_v12, %v1150_v13  ;;  %v1010_v19 = vld [vmem:[%s6862_s12 + $0x808] sm:$0xff] }
 0x235   : > { %4153 = vmatpush2.bf16.msra.mxu1 %v5759_v59  ;;  %v1014_v54 = vld [vmem:[%s6862_s12 + $0x828] sm:$0xff]  ;;  %v5959_v59 = vcombine.low %v1146_v12, %v1150_v13 }
 0x236   : > { %4208 = vmatprep.subr.bf16.mxu1 %v6008_v24  ;;  %4112 = vmatmul.mubr.bf16.vlgmr.msra.gmra.mxu0 %v6993_v52  ;;  %v1138_v55 = vld [vmem:[%s6862_s12 + $0xc08] sm:$0xff]  ;;  %v5824_v23 = vcombine.high %v1010_v19, %v1014_v54 }
 0x237   : > { %4166 = vmatpush1.bf16.msra.mxu0 %v5879_v33  ;;  %4197 = vmatprep.mubr.bf16.mxu0 %v7016_v63  ;;  %v1142_v20 = vld [vmem:[%s6862_s12 + $0xc28] sm:$0xff]  ;;  %v5823_v33 = vcombine.low %v1010_v19, %v1014_v54 }
 0x238   : > { %4155 = vmatmul.mubr.bf16.vlgmr.msra.gmra.mxu1 %v7004_v56  ;;  %4167 = vmatprep.subr.bf16.mxu0 %v5872_v35  ;;  %v5952_v24 = vcombine.high %v1138_v55, %v1142_v20  ;;  %v1130_v28 = vld [vmem:[%s6862_s12 + $0xbc8] sm:$0xff] }
 0x239   : > { %4209 = vmatpush1.bf16.msra.mxu1 %v6007_v34  ;;  %4240 = vmatprep.mubr.bf16.mxu1 %v7023_v0  ;;  %v1134_v29 = vld [vmem:[%s6862_s12 + $0xbe8] sm:$0xff]  ;;  %v5951_v34 = vcombine.low %v1138_v55, %v1142_v20 }
 0x23a   : > { %4210 = vmatprep.subr.bf16.mxu1 %v6000_v36  ;;  %v1258_v31 = vld [vmem:[%s6862_s12 + $0xfc8] sm:$0xff]  ;;  %v5944_v35 = vcombine.high %v1130_v28, %v1134_v29 }
 0x23b   : > { %4168 = vmatpush1.bf16.msra.mxu0 %v5871_v41  ;;  %v1262_v32 = vld [vmem:[%s6862_s12 + $0xfe8] sm:$0xff]  ;;  %v5943_v41 = vcombine.low %v1130_v28, %v1134_v29 }
 0x23c   : > { %4169 = vmatprep.subr.bf16.mxu0 %v5864_v43  ;;  %v6072_v36 = vcombine.high %v1258_v31, %v1262_v32  ;;  %v1122_v37 = vld [vmem:[%s6862_s12 + $0xb88] sm:$0xff] }
 0x23d   : > { %4211 = vmatpush1.bf16.msra.mxu1 %v5999_v42  ;;  %v1126_v38 = vld [vmem:[%s6862_s12 + $0xba8] sm:$0xff]  ;;  %v6071_v42 = vcombine.low %v1258_v31, %v1262_v32 }
 0x23e   : > { %4212 = vmatprep.subr.bf16.mxu1 %v5992_v44  ;;  %v1250_v39 = vld [vmem:[%s6862_s12 + $0xf88] sm:$0xff]  ;;  %v5936_v43 = vcombine.high %v1122_v37, %v1126_v38 }
 0x23f   : > { %4170 = vmatpush1.bf16.msra.mxu0 %v5863_v49  ;;  %v1254_v40 = vld [vmem:[%s6862_s12 + $0xfa8] sm:$0xff]  ;;  %v5935_v49 = vcombine.low %v1122_v37, %v1126_v38  ;;  %v811_v37 = vld [vmem:[%s6862_s12 + $0x1d0] sm:$0xff] }
 0x240   : > { %4171 = vmatprep.subr.bf16.mxu0 %v5856_v51  ;;  %v6064_v44 = vcombine.high %v1250_v39, %v1254_v40  ;;  %v1114_v45 = vld [vmem:[%s6862_s12 + $0xb48] sm:$0xff]  ;;  %v815_v38 = vld [vmem:[%s6862_s12 + $0x1f0] sm:$0xff] }
 0x241   : > { %4213 = vmatpush1.bf16.msra.mxu1 %v5991_v50  ;;  %v1118_v46 = vld [vmem:[%s6862_s12 + $0xb68] sm:$0xff]  ;;  %v6063_v50 = vcombine.low %v1250_v39, %v1254_v40  ;;  %v939_v39 = vld [vmem:[%s6862_s12 + $0x5d0] sm:$0xff] }
 0x242   : > { %4214 = vmatprep.subr.bf16.mxu1 %v5984_v53  ;;  %v1242_v47 = vld [vmem:[%s6862_s12 + $0xf48] sm:$0xff]  ;;  %v5928_v51 = vcombine.high %v1114_v45, %v1118_v46  ;;  %v943_v40 = vld [vmem:[%s6862_s12 + $0x5f0] sm:$0xff] }
 0x243   : > { %4172 = vmatpush1.bf16.msra.mxu0 %v5855_v61  ;;  %v1246_v48 = vld [vmem:[%s6862_s12 + $0xf68] sm:$0xff]  ;;  %v5927_v61 = vcombine.low %v1114_v45, %v1118_v46  ;;  %v803_v45 = vld [vmem:[%s6862_s12 + $0x190] sm:$0xff] }
 0x244   : > { %4173 = vmatprep.subr.bf16.mxu0 %v5848_v26  ;;  %v6056_v53 = vcombine.high %v1242_v47, %v1246_v48  ;;  %v1106_v57 = vld [vmem:[%s6862_s12 + $0xb08] sm:$0xff]  ;;  %v807_v46 = vld [vmem:[%s6862_s12 + $0x1b0] sm:$0xff] }
 0x245   : > { %4215 = vmatpush1.bf16.msra.mxu1 %v5983_v62  ;;  %v1110_v21 = vld [vmem:[%s6862_s12 + $0xb28] sm:$0xff]  ;;  %v6055_v62 = vcombine.low %v1242_v47, %v1246_v48  ;;  %v931_v47 = vld [vmem:[%s6862_s12 + $0x590] sm:$0xff] }
 0x246   : > { %4216 = vmatprep.subr.bf16.mxu1 %v5976_v27  ;;  %v1234_v22 = vld [vmem:[%s6862_s12 + $0xf08] sm:$0xff]  ;;  %v5920_v26 = vcombine.high %v1106_v57, %v1110_v21  ;;  %v935_v48 = vld [vmem:[%s6862_s12 + $0x5b0] sm:$0xff] }
 0x247   : > { %4174 = vmatpush1.bf16.msra.mxu0 %v5847_v5  ;;  %v1238_v60 = vld [vmem:[%s6862_s12 + $0xf28] sm:$0xff]  ;;  %v5919_v5 = vcombine.low %v1106_v57, %v1110_v21  ;;  %v795_v57 = vld [vmem:[%s6862_s12 + $0x150] sm:$0xff] }
 0x248   : > { %4175 = vmatprep.subr.bf16.mxu0 %v5840_v7  ;;  %v6048_v27 = vcombine.high %v1234_v22, %v1238_v60  ;;  %v1098_v1 = vld [vmem:[%s6862_s12 + $0xac8] sm:$0xff]  ;;  %v799_v21 = vld [vmem:[%s6862_s12 + $0x170] sm:$0xff] }
 0x249   : > { %4217 = vmatpush1.bf16.msra.mxu1 %v5975_v6  ;;  %v1102_v2 = vld [vmem:[%s6862_s12 + $0xae8] sm:$0xff]  ;;  %v6047_v6 = vcombine.low %v1234_v22, %v1238_v60  ;;  %v923_v22 = vld [vmem:[%s6862_s12 + $0x550] sm:$0xff] }
 0x24a   : > { %4218 = vmatprep.subr.bf16.mxu1 %v5968_v8  ;;  %v1226_v3 = vld [vmem:[%s6862_s12 + $0xec8] sm:$0xff]  ;;  %v5912_v7 = vcombine.high %v1098_v1, %v1102_v2  ;;  %v927_v60 = vld [vmem:[%s6862_s12 + $0x570] sm:$0xff] }
 0x24b   : > { %4176 = vmatpush1.bf16.msra.mxu0 %v5839_v15  ;;  %v1230_v4 = vld [vmem:[%s6862_s12 + $0xee8] sm:$0xff]  ;;  %v5911_v15 = vcombine.low %v1098_v1, %v1102_v2  ;;  %v787_v1 = vld [vmem:[%s6862_s12 + $0x110] sm:$0xff] }
 0x24c   : > { %4177 = vmatprep.subr.bf16.mxu0 %v5832_v17  ;;  %v6040_v8 = vcombine.high %v1226_v3, %v1230_v4  ;;  %v1090_v9 = vld [vmem:[%s6862_s12 + $0xa88] sm:$0xff]  ;;  %v791_v2 = vld [vmem:[%s6862_s12 + $0x130] sm:$0xff] }
 0x24d   : > { %4219 = vmatpush1.bf16.msra.mxu1 %v5967_v16  ;;  %v1094_v10 = vld [vmem:[%s6862_s12 + $0xaa8] sm:$0xff]  ;;  %v6039_v16 = vcombine.low %v1226_v3, %v1230_v4  ;;  %v915_v3 = vld [vmem:[%s6862_s12 + $0x510] sm:$0xff] }
 0x24e   : > { %4220 = vmatprep.subr.bf16.mxu1 %v5960_v18  ;;  %v1218_v12 = vld [vmem:[%s6862_s12 + $0xe88] sm:$0xff]  ;;  %v5904_v17 = vcombine.high %v1090_v9, %v1094_v10  ;;  %v919_v4 = vld [vmem:[%s6862_s12 + $0x530] sm:$0xff] }
 0x24f   : > { %4178 = vmatpush1.bf16.msra.mxu0 %v5831_v58  ;;  %v1222_v13 = vld [vmem:[%s6862_s12 + $0xea8] sm:$0xff]  ;;  %v5903_v58 = vcombine.low %v1090_v9, %v1094_v10  ;;  %v779_v9 = vld [vmem:[%s6862_s12 + $0xd0] sm:$0xff] }
 0x250   : > { %4179 = vmatprep.subr.bf16.mxu0 %v5824_v23  ;;  %v6032_v18 = vcombine.high %v1218_v12, %v1222_v13  ;;  %v1082_v19 = vld [vmem:[%s6862_s12 + $0xa48] sm:$0xff]  ;;  %v783_v10 = vld [vmem:[%s6862_s12 + $0xf0] sm:$0xff] }
 0x251   : > { %4221 = vmatpush1.bf16.msra.mxu1 %v5959_v59  ;;  %v1086_v54 = vld [vmem:[%s6862_s12 + $0xa68] sm:$0xff]  ;;  %v6031_v59 = vcombine.low %v1218_v12, %v1222_v13  ;;  %v907_v12 = vld [vmem:[%s6862_s12 + $0x4d0] sm:$0xff] }
 0x252   : > { %4222 = vmatprep.subr.bf16.mxu1 %v5952_v24  ;;  %v1210_v55 = vld [vmem:[%s6862_s12 + $0xe48] sm:$0xff]  ;;  %v5896_v23 = vcombine.high %v1082_v19, %v1086_v54  ;;  %v911_v13 = vld [vmem:[%s6862_s12 + $0x4f0] sm:$0xff] }
 0x253   : > { %4180 = vmatpush1.bf16.msra.mxu0 %v5823_v33  ;;  %v1214_v20 = vld [vmem:[%s6862_s12 + $0xe68] sm:$0xff]  ;;  %v5895_v33 = vcombine.low %v1082_v19, %v1086_v54  ;;  %v771_v19 = vld [vmem:[%s6862_s12 + $0x90] sm:$0xff] }
 0x254   : > { %4181 = vmatprep.subr.bf16.mxu0 %v5944_v35  ;;  %v6024_v24 = vcombine.high %v1210_v55, %v1214_v20  ;;  %v1074_v28 = vld [vmem:[%s6862_s12 + $0xa08] sm:$0xff]  ;;  %v775_v54 = vld [vmem:[%s6862_s12 + $0xb0] sm:$0xff] }
 0x255   : > { %4223 = vmatpush1.bf16.msra.mxu1 %v5951_v34  ;;  %v1078_v29 = vld [vmem:[%s6862_s12 + $0xa28] sm:$0xff]  ;;  %v6023_v34 = vcombine.low %v1210_v55, %v1214_v20  ;;  %v899_v55 = vld [vmem:[%s6862_s12 + $0x490] sm:$0xff] }
 0x256   : > { %4224 = vmatprep.subr.bf16.mxu1 %v6072_v36  ;;  %v1202_v31 = vld [vmem:[%s6862_s12 + $0xe08] sm:$0xff]  ;;  %v5888_v35 = vcombine.high %v1074_v28, %v1078_v29  ;;  %v903_v20 = vld [vmem:[%s6862_s12 + $0x4b0] sm:$0xff] }
 0x257   : > { %4182 = vmatpush2.bf16.msra.mxu0 %v5943_v41  ;;  %v1206_v32 = vld [vmem:[%s6862_s12 + $0xe28] sm:$0xff]  ;;  %v5887_v41 = vcombine.low %v1074_v28, %v1078_v29  ;;  %v763_v28 = vld [vmem:[%s6862_s12 + $0x50] sm:$0xff] }
 0x258   : > { %4183 = vmatprep.subr.bf16.mxu0 %v5936_v43  ;;  %v6016_v36 = vcombine.high %v1202_v31, %v1206_v32  ;;  %v5626_v43 = vcombine.high %v811_v37, %v815_v38  ;;  %v767_v29 = vld [vmem:[%s6862_s12 + $0x70] sm:$0xff] }
 0x259   : > { %4225 = vmatpush2.bf16.msra.mxu1 %v6071_v42  ;;  %v6015_v42 = vcombine.low %v1202_v31, %v1206_v32  ;;  %v891_v31 = vld [vmem:[%s6862_s12 + $0x450] sm:$0xff] }
 0x25a   : > { %4226 = vmatprep.subr.bf16.mxu1 %v6064_v44  ;;  %v5754_v44 = vcombine.high %v939_v39, %v943_v40  ;;  %v895_v32 = vld [vmem:[%s6862_s12 + $0x470] sm:$0xff] }
 0x25b   : > { %4184 = vmatpush2.bf16.msra.mxu0 %v5935_v49  ;;  %v5625_v49 = vcombine.low %v811_v37, %v815_v38  ;;  %v755_v37 = vld [vmem:[%s6862_s12 + $0x10] sm:$0xff] }
 0x25c   : > { %4185 = vmatprep.subr.bf16.mxu0 %v5928_v51  ;;  %v5618_v51 = vcombine.high %v803_v45, %v807_v46  ;;  %v759_v38 = vld [vmem:[%s6862_s12 + $0x30] sm:$0xff] }
 0x25d   : > { %4227 = vmatpush2.bf16.msra.mxu1 %v6063_v50  ;;  %v5753_v50 = vcombine.low %v939_v39, %v943_v40  ;;  %v883_v39 = vld [vmem:[%s6862_s12 + $0x410] sm:$0xff] }
 0x25e   : > { %4228 = vmatprep.subr.bf16.mxu1 %v6056_v53  ;;  %v5746_v53 = vcombine.high %v931_v47, %v935_v48  ;;  %v887_v40 = vld [vmem:[%s6862_s12 + $0x430] sm:$0xff] }
 0x25f   : > { %4186 = vmatpush2.bf16.msra.mxu0 %v5927_v61  ;;  %v5617_v61 = vcombine.low %v803_v45, %v807_v46  ;;  %v875_v45 = vld [vmem:[%s6862_s12 + $0x3d0] sm:$0xff] }
 0x260   : > { %4187 = vmatprep.subr.bf16.mxu0 %v5920_v26  ;;  %v5610_v26 = vcombine.high %v795_v57, %v799_v21  ;;  %v879_v46 = vld [vmem:[%s6862_s12 + $0x3f0] sm:$0xff] }
 0x261   : > { %4229 = vmatpush2.bf16.msra.mxu1 %v6055_v62  ;;  %v5745_v62 = vcombine.low %v931_v47, %v935_v48  ;;  %v1003_v47 = vld [vmem:[%s6862_s12 + $0x7d0] sm:$0xff] }
 0x262   : > { %4230 = vmatprep.subr.bf16.mxu1 %v6048_v27  ;;  %v5738_v27 = vcombine.high %v923_v22, %v927_v60  ;;  %v1007_v48 = vld [vmem:[%s6862_s12 + $0x7f0] sm:$0xff] }
 0x263   : > { %4188 = vmatpush2.bf16.msra.mxu0 %v5919_v5  ;;  %v5609_v5 = vcombine.low %v795_v57, %v799_v21  ;;  %v867_v57 = vld [vmem:[%s6862_s12 + $0x390] sm:$0xff] }
 0x264   : > { %4189 = vmatprep.subr.bf16.mxu0 %v5912_v7  ;;  %v5602_v7 = vcombine.high %v787_v1, %v791_v2  ;;  %v871_v21 = vld [vmem:[%s6862_s12 + $0x3b0] sm:$0xff] }
 0x265   : > { %4231 = vmatpush2.bf16.msra.mxu1 %v6047_v6  ;;  %v5737_v6 = vcombine.low %v923_v22, %v927_v60  ;;  %v995_v22 = vld [vmem:[%s6862_s12 + $0x790] sm:$0xff] }
 0x266   : > { %4232 = vmatprep.subr.bf16.mxu1 %v6040_v8  ;;  %v5730_v8 = vcombine.high %v915_v3, %v919_v4  ;;  %v999_v60 = vld [vmem:[%s6862_s12 + $0x7b0] sm:$0xff] }
 0x267   : > { %4190 = vmatpush2.bf16.msra.mxu0 %v5911_v15  ;;  %v5601_v15 = vcombine.low %v787_v1, %v791_v2  ;;  %v859_v1 = vld [vmem:[%s6862_s12 + $0x350] sm:$0xff] }
 0x268   : > { %4191 = vmatprep.subr.bf16.mxu0 %v5904_v17  ;;  %v5594_v17 = vcombine.high %v779_v9, %v783_v10  ;;  %v863_v2 = vld [vmem:[%s6862_s12 + $0x370] sm:$0xff] }
 0x269   : > { %4233 = vmatpush2.bf16.msra.mxu1 %v6039_v16  ;;  %v5729_v16 = vcombine.low %v915_v3, %v919_v4  ;;  %v987_v3 = vld [vmem:[%s6862_s12 + $0x750] sm:$0xff] }
 0x26a   : > { %4234 = vmatprep.subr.bf16.mxu1 %v6032_v18  ;;  %v5722_v18 = vcombine.high %v907_v12, %v911_v13  ;;  %v991_v4 = vld [vmem:[%s6862_s12 + $0x770] sm:$0xff] }
 0x26b   : > { %4192 = vmatpush2.bf16.msra.mxu0 %v5903_v58  ;;  %v5593_v58 = vcombine.low %v779_v9, %v783_v10  ;;  %v851_v9 = vld [vmem:[%s6862_s12 + $0x310] sm:$0xff] }
 0x26c   : > { %4193 = vmatprep.subr.bf16.mxu0 %v5896_v23  ;;  %v5586_v23 = vcombine.high %v771_v19, %v775_v54  ;;  %v855_v10 = vld [vmem:[%s6862_s12 + $0x330] sm:$0xff] }
 0x26d   : > { %4235 = vmatpush2.bf16.msra.mxu1 %v6031_v59  ;;  %v5721_v59 = vcombine.low %v907_v12, %v911_v13  ;;  %v979_v12 = vld [vmem:[%s6862_s12 + $0x710] sm:$0xff] }
 0x26e   : > { %4236 = vmatprep.subr.bf16.mxu1 %v6024_v24  ;;  %v5714_v24 = vcombine.high %v899_v55, %v903_v20  ;;  %v983_v13 = vld [vmem:[%s6862_s12 + $0x730] sm:$0xff] }
 0x26f   : > { %4194 = vmatpush2.bf16.msra.mxu0 %v5895_v33  ;;  %v5585_v33 = vcombine.low %v771_v19, %v775_v54  ;;  %v843_v19 = vld [vmem:[%s6862_s12 + $0x2d0] sm:$0xff] }
 0x270   : > { %4195 = vmatprep.subr.bf16.mxu0 %v5888_v35  ;;  %v5578_v35 = vcombine.high %v763_v28, %v767_v29  ;;  %v847_v54 = vld [vmem:[%s6862_s12 + $0x2f0] sm:$0xff] }
 0x271   : > { %4237 = vmatpush2.bf16.msra.mxu1 %v6023_v34  ;;  %v5713_v34 = vcombine.low %v899_v55, %v903_v20  ;;  %v971_v55 = vld [vmem:[%s6862_s12 + $0x6d0] sm:$0xff] }
 0x272   : > { %4238 = vmatprep.subr.bf16.mxu1 %v6016_v36  ;;  %v5706_v36 = vcombine.high %v891_v31, %v895_v32  ;;  %v975_v20 = vld [vmem:[%s6862_s12 + $0x6f0] sm:$0xff] }
 0x273   : > { %4196 = vmatpush2.bf16.msra.mxu0 %v5887_v41  ;;  %v5577_v41 = vcombine.low %v763_v28, %v767_v29  ;;  %v5786_v28 = vcombine.high %v971_v55, %v975_v20  ;;  %v835_v29 = vld [vmem:[%s6862_s12 + $0x290] sm:$0xff] }
 0x274   : > { %4251 = vmatprep.subr.bf16.mxu0 %v5626_v43  ;;  %v5570_v43 = vcombine.high %v755_v37, %v759_v38 }
 0x275   : > { %4239 = vmatpush2.bf16.msra.mxu1 %v6015_v42  ;;  %v5705_v42 = vcombine.low %v891_v31, %v895_v32  ;;  %v839_v31 = vld [vmem:[%s6862_s12 + $0x2b0] sm:$0xff] }
 0x276   : > { %4294 = vmatprep.subr.bf16.mxu1 %v5754_v44  ;;  %4198 = vmatmul.mubr.bf16.vlgmr.msra.gmra.mxu0 %v7088_v11  ;;  %v5698_v44 = vcombine.high %v883_v39, %v887_v40  ;;  %v963_v32 = vld [vmem:[%s6862_s12 + $0x690] sm:$0xff] }
 0x277   : > { %4252 = vmatpush1.bf16.msra.mxu0 %v5625_v49  ;;  %4283 = vmatprep.mubr.bf16.mxu0 %v6936_v25  ;;  %v5569_v49 = vcombine.low %v755_v37, %v759_v38 }
 0x278   : > { %4241 = vmatmul.mubr.bf16.vlgmr.msra.gmra.mxu1 %v7094_v14  ;;  %4253 = vmatprep.subr.bf16.mxu0 %v5618_v51  ;;  %v5690_v51 = vcombine.high %v875_v45, %v879_v46 }
 0x279   : > { %4295 = vmatpush1.bf16.msra.mxu1 %v5753_v50  ;;  %4326 = vmatprep.mubr.bf16.mxu1 %v6948_v30  ;;  %v5697_v50 = vcombine.low %v883_v39, %v887_v40  ;;  %v827_v39 = vld [vmem:[%s6862_s12 + $0x250] sm:$0xff] }
 0x27a   : > { %4296 = vmatprep.subr.bf16.mxu1 %v5746_v53  ;;  %v5818_v53 = vcombine.high %v1003_v47, %v1007_v48  ;;  %v831_v40 = vld [vmem:[%s6862_s12 + $0x270] sm:$0xff] }
 0x27b   : > { %4254 = vmatpush1.bf16.msra.mxu0 %v5617_v61  ;;  %v5689_v61 = vcombine.low %v875_v45, %v879_v46  ;;  %v5642_v46 = vcombine.high %v827_v39, %v831_v40 }
 0x27c   : > { %4255 = vmatprep.subr.bf16.mxu0 %v5610_v26  ;;  %v5682_v26 = vcombine.high %v867_v57, %v871_v21 }
 0x27d   : > { %4297 = vmatpush1.bf16.msra.mxu1 %v5745_v62  ;;  %v5817_v62 = vcombine.low %v1003_v47, %v1007_v48  ;;  %v3984_v48 = vpop.f32.mrf.mxu1 }
 0x27e   : > { %4298 = vmatprep.subr.bf16.mxu1 %v5738_v27  ;;  %v5810_v27 = vcombine.high %v995_v22, %v999_v60 }
 0x27f   : > { %4256 = vmatpush1.bf16.msra.mxu0 %v5609_v5  ;;  %v5681_v5 = vcombine.low %v867_v57, %v871_v21  ;;  %v947_v57 = vld [vmem:[%s6862_s12 + $0x610] sm:$0xff] }
 0x280   : > { %4257 = vmatprep.subr.bf16.mxu0 %v5602_v7  ;;  %v5674_v7 = vcombine.high %v859_v1, %v863_v2  ;;  %v951_v21 = vld [vmem:[%s6862_s12 + $0x630] sm:$0xff] }
 0x281   : > { %4299 = vmatpush1.bf16.msra.mxu1 %v5737_v6  ;;  %v5809_v6 = vcombine.low %v995_v22, %v999_v60  ;;  %v5641_v60 = vcombine.low %v827_v39, %v831_v40 }
 0x282   : > { %4300 = vmatprep.subr.bf16.mxu1 %v5730_v8  ;;  %v5802_v8 = vcombine.high %v987_v3, %v991_v4 }
 0x283   : > { %4258 = vmatpush1.bf16.msra.mxu0 %v5601_v15  ;;  %v5673_v15 = vcombine.low %v859_v1, %v863_v2  ;;  %v3986_v1 = vpop.f32.mrf.mxu1  ;;  %v5762_v2 = vcombine.high %v947_v57, %v951_v21 }
 0x284   : > { %4259 = vmatprep.subr.bf16.mxu0 %v5594_v17  ;;  %v5666_v17 = vcombine.high %v851_v9, %v855_v10 }
 0x285   : > { %4301 = vmatpush1.bf16.msra.mxu1 %v5729_v16  ;;  %v5801_v16 = vcombine.low %v987_v3, %v991_v4  ;;  %v1067_v3 = vld [vmem:[%s6862_s12 + $0x9d0] sm:$0xff] }
 0x286   : > { %4302 = vmatprep.subr.bf16.mxu1 %v5722_v18  ;;  %v5794_v18 = vcombine.high %v979_v12, %v983_v13  ;;  %v1071_v4 = vld [vmem:[%s6862_s12 + $0x9f0] sm:$0xff] }
 0x287   : > { %4260 = vmatpush1.bf16.msra.mxu0 %v5593_v58  ;;  %v5665_v58 = vcombine.low %v851_v9, %v855_v10  ;;  %v5761_v10 = vcombine.low %v947_v57, %v951_v21  ;;  %v1047_v57 = vld [vmem:[%s6862_s12 + $0x930] sm:$0xff] }
 0x288   : > { %4261 = vmatprep.subr.bf16.mxu0 %v5586_v23  ;;  %v5658_v23 = vcombine.high %v843_v19, %v847_v54  ;;  %v1171_v21 = vld [vmem:[%s6862_s12 + $0xd10] sm:$0xff] }
 0x289   : > { %4303 = vmatpush1.bf16.msra.mxu1 %v5721_v59  ;;  %v5793_v59 = vcombine.low %v979_v12, %v983_v13  ;;  %v5882_v12 = vcombine.high %v1067_v3, %v1071_v4 }
 0x28a   : > { %4304 = vmatprep.subr.bf16.mxu1 %v5714_v24  ;;  %v1267_v24 = vlaneseq }
 0x28b   : > { %4262 = vmatpush1.bf16.msra.mxu0 %v5585_v33  ;;  %v967_v33 = vld [vmem:[%s6862_s12 + $0x6b0] sm:$0xff] }
 0x28c   : > { %4263 = vmatprep.subr.bf16.mxu0 %v5578_v35  ;;  %v5785_v35 = vcombine.low %v971_v55, %v975_v20  ;;  %v7288_v37 = vshrl.u32 %v1267_v24, 7  ;;  %v5778_v38 = vcombine.high %v963_v32, %v967_v33  ;;  %v5777_v45 = vcombine.low %v963_v32, %v967_v33  ;;  %v1051_v24 = vld [vmem:[%s6862_s12 + $0x950] sm:$0xff] }
 0x28d   : > { %4305 = vmatpush1.bf16.msra.mxu1 %v5713_v34  ;;  %v5657_v34 = vcombine.low %v843_v19, %v847_v54  ;;  %v1187_v19 = vld [vmem:[%s6862_s12 + $0xd90] sm:$0xff]  ;;  %v5881_v20 = vcombine.low %v1067_v3, %v1071_v4 }
 0x28e   : > { %4306 = vmatprep.subr.bf16.mxu1 %v5706_v36  ;;  %v5650_v36 = vcombine.high %v835_v29, %v839_v31  ;;  %v1269_v47 = vsub.s32 0, %v7288_v37  ;;  %v1273_v22 = vsub.s32 1, %v7288_v37  ;;  %v1191_v54 = vld [vmem:[%s6862_s12 + $0xdb0] sm:$0xff] }
 0x28f   : > { %4264 = vmatpush1.bf16.msra.mxu0 %v5577_v41  ;;  %v955_v41 = vld [vmem:[%s6862_s12 + $0x650] sm:$0xff]  ;;  %v6002_v32 = vcombine.high %v1187_v19, %v1191_v54 }
 0x290   : > { %4265 = vmatprep.subr.bf16.mxu0 %v5570_v43  ;;  %v5649_v43 = vcombine.low %v835_v29, %v839_v31  ;;  %v1055_v33 = vld [vmem:[%s6862_s12 + $0x970] sm:$0xff] }
 0x291   : > { %4307 = vmatpush1.bf16.msra.mxu1 %v5705_v42  ;;  %v959_v42 = vld [vmem:[%s6862_s12 + $0x670] sm:$0xff] }
 0x292   : > { %4308 = vmatprep.subr.bf16.mxu1 %v5698_v44  ;;  %v3941_v44 = vpop.f32.mrf.mxu0 }
 0x293   : > { %4266 = vmatpush1.bf16.msra.mxu0 %v5569_v49  ;;  %v5770_v49 = vcombine.high %v955_v41, %v959_v42 }
 0x294   : > { %4267 = vmatprep.subr.bf16.mxu0 %v5690_v51  ;;  %v823_v51 = vld [vmem:[%s6862_s12 + $0x230] sm:$0xff] }
 0x295   : > { %4309 = vmatpush1.bf16.msra.mxu1 %v5697_v50  ;;  %v819_v50 = vld [vmem:[%s6862_s12 + $0x210] sm:$0xff] }
 0x296   : > { %4310 = vmatprep.subr.bf16.mxu1 %v5818_v53  ;;  %v7303_v53 = vld [vmem:[%s332_s24] sm:$0xff] }
 0x297   : > { %4268 = vmatpush2.bf16.msra.mxu0 %v5689_v61  ;;  %v3943_v61 = vpop.f32.mrf.mxu0 }
 0x298   : > { %4269 = vmatprep.subr.bf16.mxu0 %v5682_v26  ;;  %v5634_v26 = vcombine.high %v819_v50, %v823_v51 }
 0x299   : > { %4311 = vmatpush2.bf16.msra.mxu1 %v5817_v62  ;;  %v5769_v62 = vcombine.low %v955_v41, %v959_v42  ;;  %v3945_v9 = vpop.f32.mrf.mxu0 }
 0x29a   : > { %4312 = vmatprep.subr.bf16.mxu1 %v5810_v27  ;;  %v1270_v27 = vrot.slane %v7303_v53, %v1269_v47  ;;  %v1043_v47 = vld [vmem:[%s6862_s12 + $0x910] sm:$0xff] }
 0x29b   : > { %4270 = vmatpush2.bf16.msra.mxu0 %v5681_v5  ;;  %v1195_v5 = vld [vmem:[%s6862_s12 + $0xdd0] sm:$0xff]  ;;  %v5858_v4 = vcombine.high %v1043_v47, %v1047_v57 }
 0x29c   : > { %4271 = vmatprep.subr.bf16.mxu0 %v5674_v7  ;;  %v1274_v7 = vrot.slane %v7303_v53, %v1273_v22  ;;  %v3942_v13 = vadd.f32 %v3941_v44, %v1270_v27  ;;  %v3946_v29 = vadd.f32 %v3945_v9, %v1270_v27  ;;  %v6001_v44 = vcombine.low %v1187_v19, %v1191_v54  ;;  %v1175_v22 = vld [vmem:[%s6862_s12 + $0xd30] sm:$0xff] }
 0x29d   : > { %4313 = vmatpush2.bf16.msra.mxu1 %v5809_v6  ;;  %v1199_v6 = vld [vmem:[%s6862_s12 + $0xdf0] sm:$0xff]  ;;  %v5857_v19 = vcombine.low %v1043_v47, %v1047_v57  ;;  %v5985_v54 = vcombine.low %v1171_v21, %v1175_v22 }
 0x29e   : > { %4314 = vmatprep.subr.bf16.mxu1 %v5802_v8  ;;  %v5633_v8 = vcombine.low %v819_v50, %v823_v51  ;;  %v3944_v55 = vadd.f32 %v3943_v61, %v1274_v7  ;;  %v1139_v47 = vld [vmem:[%s6862_s12 + $0xc10] sm:$0xff] }
 0x29f   : > { %4272 = vmatpush2.bf16.msra.mxu0 %v5673_v15  ;;  %v3988_v15 = vpop.f32.mrf.mxu1 }
 0x2a0   : > { %4273 = vmatprep.subr.bf16.mxu0 %v5666_v17  ;;  %v1059_v17 = vld [vmem:[%s6862_s12 + $0x990] sm:$0xff]  ;;  %v3987_v39 = vadd.f32 %v3986_v1, %v3944_v55  ;;  %v5865_v1 = vcombine.low %v1051_v24, %v1055_v33 }
 0x2a1   : > { %4315 = vmatpush2.bf16.msra.mxu1 %v5801_v16  ;;  %v6010_v16 = vcombine.high %v1195_v5, %v1199_v6  ;;  %v3990_v31 = vpop.f32.mrf.mxu1 }
 0x2a2   : > { %4316 = vmatprep.subr.bf16.mxu1 %v5794_v18  ;;  %v1063_v18 = vld [vmem:[%s6862_s12 + $0x9b0] sm:$0xff] }
 0x2a3   : > { %4274 = vmatpush2.bf16.msra.mxu0 %v5665_v58  ;;  %v3947_v58 = vpop.f32.mrf.mxu0 }
 0x2a4   : > { %4275 = vmatprep.subr.bf16.mxu0 %v5658_v23  ;;  %v5874_v23 = vcombine.high %v1059_v17, %v1063_v18  ;;  %v3948_v40 = vadd.f32 %v3947_v58, %v1274_v7 }
 0x2a5   : > { %4317 = vmatpush2.bf16.msra.mxu1 %v5793_v59  ;;  %v6009_v59 = vcombine.low %v1195_v5, %v1199_v6  ;;  %v5986_v5 = vcombine.high %v1171_v21, %v1175_v22  ;;  %v1131_v21 = vld [vmem:[%s6862_s12 + $0xbd0] sm:$0xff] }
 0x2a6   : > { %4318 = vmatprep.subr.bf16.mxu1 %v5786_v28  ;;  %v3985_v28 = vadd.f32 %v3984_v48, %v3942_v13  ;;  %v3989_v48 = vadd.f32 %v3988_v15, %v3946_v29  ;;  %v3991_v61 = vadd.f32 %v3990_v31, %v3948_v40  ;;  %v1163_v15 = vld [vmem:[%s6862_s12 + $0xcd0] sm:$0xff] }
 0x2a7   : > { %4276 = vmatpush2.bf16.msra.mxu0 %v5657_v34  ;;  %v1179_v34 = vld [vmem:[%s6862_s12 + $0xd50] sm:$0xff] }
 0x2a8   : > { %4277 = vmatprep.subr.bf16.mxu0 %v5650_v36  ;;  %v1159_v29 = vld [vmem:[%s6862_s12 + $0xcb0] sm:$0xff] }
 0x2a9   : > { %4319 = vmatpush2.bf16.msra.mxu1 %v5785_v35  ;;  %v1183_v35 = vld [vmem:[%s6862_s12 + $0xd70] sm:$0xff] }
 0x2aa   : > { %4320 = vmatprep.subr.bf16.mxu1 %v5778_v38  ;;  %v5873_v38 = vcombine.low %v1059_v17, %v1063_v18  ;;  %v5993_v3 = vcombine.low %v1179_v34, %v1183_v35  ;;  %v1151_v40 = vld [vmem:[%s6862_s12 + $0xc70] sm:$0xff] }
 0x2ab   : > { %4278 = vmatpush2.bf16.msra.mxu0 %v5649_v43  ;;  %v1135_v22 = vld [vmem:[%s6862_s12 + $0xbf0] sm:$0xff] }
 0x2ac   : > { %4279 = vmatprep.subr.bf16.mxu0 %v5642_v46  ;;  %v5994_v46 = vcombine.high %v1179_v34, %v1183_v35 }
 0x2ad   : > { %4321 = vmatpush2.bf16.msra.mxu1 %v5777_v45  ;;  %v5866_v45 = vcombine.high %v1051_v24, %v1055_v33  ;;  %v1031_v24 = vld [vmem:[%s6862_s12 + $0x8b0] sm:$0xff] }
 0x2ae   : > { %4322 = vmatprep.subr.bf16.mxu1 %v5770_v49 }
 0x2af   : > { %4280 = vmatpush2.bf16.msra.mxu0 %v5641_v60 }
 0x2b0   : > { %4281 = vmatprep.subr.bf16.mxu0 %v5634_v26 }
 0x2b1   : > { %4323 = vmatpush2.bf16.msra.mxu1 %v5769_v62 }
 0x2b2   : > { %4324 = vmatprep.subr.bf16.mxu1 %v5762_v2 }
 0x2b3   : > { %4282 = vmatpush2.bf16.msra.mxu0 %v5633_v8 }
 0x2b4   : > { %4337 = vmatprep.subr.bf16.mxu0 %v5882_v12  ;;  %v1039_v12 = vld [vmem:[%s6862_s12 + $0x8f0] sm:$0xff] }
 0x2b5   : > { %4325 = vmatpush2.bf16.msra.mxu1 %v5761_v10  ;;  %v1035_v10 = vld [vmem:[%s6862_s12 + $0x8d0] sm:$0xff] }
 0x2b6   : > { %4380 = vmatprep.subr.bf16.mxu1 %v6010_v16  ;;  %v4027_v36 = vpop.f32.mrf.mxu0  ;;  %4284 = vmatmul.mubr.bf16.vlgmr.msra.gmra.mxu0 %v6993_v52  ;;  %v1167_v16 = vld [vmem:[%s6862_s12 + $0xcf0] sm:$0xff]  ;;  %v5850_v55 = vcombine.high %v1035_v10, %v1039_v12 }
 0x2b7   : > { %v4028_v41 = vadd.f32 %v4027_v36, %v3985_v28  ;;  %4338 = vmatpush1.bf16.msra.mxu0 %v5881_v20  ;;  %4369 = vmatprep.mubr.bf16.mxu0 %v7016_v63  ;;  %v1155_v28 = vld [vmem:[%s6862_s12 + $0xc90] sm:$0xff]  ;;  %v5977_v33 = vcombine.low %v1163_v15, %v1167_v16 }
 0x2b8   : > { %v4070_v42 = vpop.f32.mrf.mxu1  ;;  %4327 = vmatmul.mubr.bf16.vlgmr.msra.gmra.mxu1 %v7004_v56  ;;  %v4029_v43 = vpop.f32.mrf.mxu0  ;;  %4339 = vmatprep.subr.bf16.mxu0 %v5874_v23  ;;  %v1027_v23 = vld [vmem:[%s6862_s12 + $0x890] sm:$0xff]  ;;  %v5970_v35 = vcombine.high %v1155_v28, %v1159_v29 }
 0x2b9   : > { %4381 = vmatpush1.bf16.msra.mxu1 %v6009_v59  ;;  %v4071_v49 = vadd.f32 %v4070_v42, %v4028_v41  ;;  %v4030_v50 = vadd.f32 %v4029_v43, %v3987_v39  ;;  %4412 = vmatprep.mubr.bf16.mxu1 %v7023_v0  ;;  %v5978_v59 = vcombine.high %v1163_v15, %v1167_v16  ;;  %v1019_v36 = vld [vmem:[%s6862_s12 + $0x850] sm:$0xff] }
 0x2ba   : > { %v4072_v51 = vpop.f32.mrf.mxu1  ;;  %4382 = vmatprep.subr.bf16.mxu1 %v6002_v32  ;;  %v4031_v60 = vpop.f32.mrf.mxu0  ;;  %v5849_v32 = vcombine.low %v1035_v10, %v1039_v12  ;;  %v5842_v34 = vcombine.high %v1027_v23, %v1031_v24  ;;  %v1147_v39 = vld [vmem:[%s6862_s12 + $0xc50] sm:$0xff]  ;;  %v5841_v41 = vcombine.low %v1027_v23, %v1031_v24  ;;  %v5969_v42 = vcombine.low %v1155_v28, %v1159_v29 }
 0x2bb   : > { %v4073_v62 = vadd.f32 %v4072_v51, %v4030_v50  ;;  %v4032_v26 = vadd.f32 %v4031_v60, %v3989_v48  ;;  %4340 = vmatpush1.bf16.msra.mxu0 %v5873_v38  ;;  %v4595_v6 = vmax.f32 %v4071_v49, 0.0  ;;  %v1023_v38 = vld [vmem:[%s6862_s12 + $0x870] sm:$0xff]  ;;  %v5961_v50 = vcombine.low %v1147_v39, %v1151_v40 }
 0x2bc   : > { %v4074_v27 = vpop.f32.mrf.mxu1  ;;  %v4033_v2 = vpop.f32.mrf.mxu0  ;;  %4341 = vmatprep.subr.bf16.mxu0 %v5866_v45  ;;  %v5834_v43 = vcombine.high %v1019_v36, %v1023_v38  ;;  %v1011_v45 = vld [vmem:[%s6862_s12 + $0x810] sm:$0xff]  ;;  %v5833_v49 = vcombine.low %v1019_v36, %v1023_v38 }
 0x2bd   : > { %4383 = vmatpush1.bf16.msra.mxu1 %v6001_v44  ;;  %v4596_v7 = vmax.f32 %v4073_v62, 0.0  ;;  %v4075_v8 = vadd.f32 %v4074_v27, %v4032_v26  ;;  %v4034_v9 = vadd.f32 %v4033_v2, %v3991_v61  ;;  %v5962_v44 = vcombine.high %v1147_v39, %v1151_v40  ;;  %v1143_v48 = vld [vmem:[%s6862_s12 + $0xc30] sm:$0xff] }
 0x2be   : > { %4384 = vmatprep.subr.bf16.mxu1 %v5994_v46  ;;  %v4076_v13 = vpop.f32.mrf.mxu1  ;;  %v1015_v46 = vld [vmem:[%s6862_s12 + $0x830] sm:$0xff]  ;;  %v5954_v57 = vcombine.high %v1139_v47, %v1143_v48  ;;  %v5953_v26 = vcombine.low %v1139_v47, %v1143_v48  ;;  %v5946_v27 = vcombine.high %v1131_v21, %v1135_v22 }
 0x2bf   : > { %v6174_v17 = vpack.c.bf16 %v4596_v7, %v4595_v6  ;;  %v4077_v18 = vadd.f32 %v4076_v13, %v4034_v9  ;;  %4342 = vmatpush1.bf16.msra.mxu0 %v5865_v1  ;;  %v4603_v20 = vmax.f32 %v4075_v8, 0.0  ;;  %v5826_v51 = vcombine.high %v1011_v45, %v1015_v46  ;;  %v1259_v60 = vld [vmem:[%s6862_s12 + $0xfd0] sm:$0xff] }
 0x2c0   : > { %4343 = vmatprep.subr.bf16.mxu0 %v5858_v4  ;;  %v1263_v61 = vld [vmem:[%s6862_s12 + $0xff0] sm:$0xff]  ;;  %v5825_v62 = vcombine.low %v1011_v45, %v1015_v46  ;;  %v5945_v6 = vcombine.low %v1131_v21, %v1135_v22 }
 0x2c1   : > { %4385 = vmatpush1.bf16.msra.mxu1 %v5993_v3  ;;  %4662 = vst [vmem:[%s7347_s10] sm:$0xff] %v6174_v17  ;;  %v4604_v58 = vmax.f32 %v4077_v18, 0.0  ;;  %v6074_v1 = vcombine.high %v1259_v60, %v1263_v61  ;;  %v1123_v2 = vld [vmem:[%s6862_s12 + $0xb90] sm:$0xff]  ;;  %v6073_v7 = vcombine.low %v1259_v60, %v1263_v61 }
 0x2c2   : > { %4386 = vmatprep.subr.bf16.mxu1 %v5986_v5  ;;  %v1127_v3 = vld [vmem:[%s6862_s12 + $0xbb0] sm:$0xff] }
 0x2c3   : > { %v6178_v31 = vpack.c.bf16 %v4604_v58, %v4603_v20  ;;  %4344 = vmatpush1.bf16.msra.mxu0 %v5857_v19  ;;  %v1251_v4 = vld [vmem:[%s6862_s12 + $0xf90] sm:$0xff]  ;;  %v5938_v8 = vcombine.high %v1123_v2, %v1127_v3  ;;  %v5937_v16 = vcombine.low %v1123_v2, %v1127_v3 }
 0x2c4   : > { %4345 = vmatprep.subr.bf16.mxu0 %v5850_v55  ;;  %v1255_v5 = vld [vmem:[%s6862_s12 + $0xfb0] sm:$0xff] }
 0x2c5   : > { %4387 = vmatpush1.bf16.msra.mxu1 %v5985_v54  ;;  %4666 = vst [vmem:[%s7347_s10 + $0x20] sm:$0xff] %v6178_v31  ;;  %v6066_v9 = vcombine.high %v1251_v4, %v1255_v5  ;;  %v1115_v10 = vld [vmem:[%s6862_s12 + $0xb50] sm:$0xff]  ;;  %v6065_v17 = vcombine.low %v1251_v4, %v1255_v5  ;;  %v812_v4 = vld [vmem:[%s6862_s12 + $0x1d8] sm:$0xff] }
 0x2c6   : > { %4388 = vmatprep.subr.bf16.mxu1 %v5978_v59  ;;  %v1119_v12 = vld [vmem:[%s6862_s12 + $0xb70] sm:$0xff]  ;;  %v816_v5 = vld [vmem:[%s6862_s12 + $0x1f8] sm:$0xff] }
 0x2c7   : > { %4346 = vmatpush1.bf16.msra.mxu0 %v5849_v32  ;;  %v1243_v13 = vld [vmem:[%s6862_s12 + $0xf50] sm:$0xff]  ;;  %v5930_v18 = vcombine.high %v1115_v10, %v1119_v12  ;;  %v5929_v59 = vcombine.low %v1115_v10, %v1119_v12  ;;  %v5628_v10 = vcombine.high %v812_v4, %v816_v5 }
 0x2c8   : > { %4347 = vmatprep.subr.bf16.mxu0 %v5842_v34  ;;  %v1247_v15 = vld [vmem:[%s6862_s12 + $0xf70] sm:$0xff] }
 0x2c9   : > { %4389 = vmatpush1.bf16.msra.mxu1 %v5977_v33  ;;  %v6058_v19 = vcombine.high %v1243_v13, %v1247_v15  ;;  %v1107_v54 = vld [vmem:[%s6862_s12 + $0xb10] sm:$0xff]  ;;  %v6057_v23 = vcombine.low %v1243_v13, %v1247_v15  ;;  %v804_v13 = vld [vmem:[%s6862_s12 + $0x198] sm:$0xff] }
 0x2ca   : > { %4390 = vmatprep.subr.bf16.mxu1 %v5970_v35  ;;  %v1111_v55 = vld [vmem:[%s6862_s12 + $0xb30] sm:$0xff]  ;;  %v808_v15 = vld [vmem:[%s6862_s12 + $0x1b8] sm:$0xff] }
 0x2cb   : > { %4348 = vmatpush1.bf16.msra.mxu0 %v5841_v41  ;;  %v1235_v20 = vld [vmem:[%s6862_s12 + $0xf10] sm:$0xff]  ;;  %v5922_v24 = vcombine.high %v1107_v54, %v1111_v55  ;;  %v5921_v34 = vcombine.low %v1107_v54, %v1111_v55  ;;  %v5620_v54 = vcombine.high %v804_v13, %v808_v15 }
 0x2cc   : > { %4349 = vmatprep.subr.bf16.mxu0 %v5834_v43  ;;  %v1239_v58 = vld [vmem:[%s6862_s12 + $0xf30] sm:$0xff] }
 0x2cd   : > { %4391 = vmatpush1.bf16.msra.mxu1 %v5969_v42  ;;  %v6050_v28 = vcombine.high %v1235_v20, %v1239_v58  ;;  %v1099_v29 = vld [vmem:[%s6862_s12 + $0xad0] sm:$0xff]  ;;  %v6049_v35 = vcombine.low %v1235_v20, %v1239_v58  ;;  %v796_v20 = vld [vmem:[%s6862_s12 + $0x158] sm:$0xff] }
 0x2ce   : > { %4392 = vmatprep.subr.bf16.mxu1 %v5962_v44  ;;  %v1103_v31 = vld [vmem:[%s6862_s12 + $0xaf0] sm:$0xff]  ;;  %v800_v58 = vld [vmem:[%s6862_s12 + $0x178] sm:$0xff] }
 0x2cf   : > { %4350 = vmatpush1.bf16.msra.mxu0 %v5833_v49  ;;  %v1227_v32 = vld [vmem:[%s6862_s12 + $0xed0] sm:$0xff]  ;;  %v5914_v36 = vcombine.high %v1099_v29, %v1103_v31  ;;  %v5913_v43 = vcombine.low %v1099_v29, %v1103_v31  ;;  %v5612_v29 = vcombine.high %v796_v20, %v800_v58 }
 0x2d0   : > { %4351 = vmatprep.subr.bf16.mxu0 %v5826_v51  ;;  %v1231_v33 = vld [vmem:[%s6862_s12 + $0xef0] sm:$0xff] }
 0x2d1   : > { %4393 = vmatpush1.bf16.msra.mxu1 %v5961_v50  ;;  %v6042_v38 = vcombine.high %v1227_v32, %v1231_v33  ;;  %v1091_v39 = vld [vmem:[%s6862_s12 + $0xa90] sm:$0xff]  ;;  %v6041_v44 = vcombine.low %v1227_v32, %v1231_v33  ;;  %v788_v32 = vld [vmem:[%s6862_s12 + $0x118] sm:$0xff] }
 0x2d2   : > { %4394 = vmatprep.subr.bf16.mxu1 %v5954_v57  ;;  %v1095_v40 = vld [vmem:[%s6862_s12 + $0xab0] sm:$0xff]  ;;  %v792_v33 = vld [vmem:[%s6862_s12 + $0x138] sm:$0xff] }
 0x2d3   : > { %4352 = vmatpush1.bf16.msra.mxu0 %v5825_v62  ;;  %v1219_v41 = vld [vmem:[%s6862_s12 + $0xe90] sm:$0xff]  ;;  %v5906_v45 = vcombine.high %v1091_v39, %v1095_v40  ;;  %v5905_v51 = vcombine.low %v1091_v39, %v1095_v40  ;;  %v5604_v39 = vcombine.high %v788_v32, %v792_v33 }
 0x2d4   : > { %4353 = vmatprep.subr.bf16.mxu0 %v5946_v27  ;;  %v1223_v42 = vld [vmem:[%s6862_s12 + $0xeb0] sm:$0xff] }
 0x2d5   : > { %4395 = vmatpush1.bf16.msra.mxu1 %v5953_v26  ;;  %v6034_v46 = vcombine.high %v1219_v41, %v1223_v42  ;;  %v1083_v47 = vld [vmem:[%s6862_s12 + $0xa50] sm:$0xff]  ;;  %v6033_v57 = vcombine.low %v1219_v41, %v1223_v42  ;;  %v780_v41 = vld [vmem:[%s6862_s12 + $0xd8] sm:$0xff] }
 0x2d6   : > { %4396 = vmatprep.subr.bf16.mxu1 %v6074_v1  ;;  %v1087_v48 = vld [vmem:[%s6862_s12 + $0xa70] sm:$0xff]  ;;  %v784_v42 = vld [vmem:[%s6862_s12 + $0xf8] sm:$0xff] }
 0x2d7   : > { %4354 = vmatpush2.bf16.msra.mxu0 %v5945_v6  ;;  %v1211_v49 = vld [vmem:[%s6862_s12 + $0xe50] sm:$0xff]  ;;  %v5898_v21 = vcombine.high %v1083_v47, %v1087_v48  ;;  %v5897_v27 = vcombine.low %v1083_v47, %v1087_v48  ;;  %v940_v6 = vld [vmem:[%s6862_s12 + $0x5d8] sm:$0xff] }
 0x2d8   : > { %4355 = vmatprep.subr.bf16.mxu0 %v5938_v8  ;;  %v1215_v50 = vld [vmem:[%s6862_s12 + $0xe70] sm:$0xff]  ;;  %v772_v47 = vld [vmem:[%s6862_s12 + $0x98] sm:$0xff] }
 0x2d9   : > { %4397 = vmatpush2.bf16.msra.mxu1 %v6073_v7  ;;  %v6026_v22 = vcombine.high %v1211_v49, %v1215_v50  ;;  %v1075_v60 = vld [vmem:[%s6862_s12 + $0xa10] sm:$0xff]  ;;  %v6025_v1 = vcombine.low %v1211_v49, %v1215_v50  ;;  %v944_v7 = vld [vmem:[%s6862_s12 + $0x5f8] sm:$0xff] }
 0x2da   : > { %4398 = vmatprep.subr.bf16.mxu1 %v6066_v9  ;;  %v1079_v61 = vld [vmem:[%s6862_s12 + $0xa30] sm:$0xff]  ;;  %v5756_v12 = vcombine.high %v940_v6, %v944_v7  ;;  %v776_v48 = vld [vmem:[%s6862_s12 + $0xb8] sm:$0xff] }
 0x2db   : > { %4356 = vmatpush2.bf16.msra.mxu0 %v5937_v16  ;;  %v1203_v62 = vld [vmem:[%s6862_s12 + $0xe10] sm:$0xff]  ;;  %v5890_v2 = vcombine.high %v1075_v60, %v1079_v61  ;;  %v5889_v8 = vcombine.low %v1075_v60, %v1079_v61  ;;  %v932_v16 = vld [vmem:[%s6862_s12 + $0x598] sm:$0xff] }
 0x2dc   : > { %4357 = vmatprep.subr.bf16.mxu0 %v5930_v18  ;;  %v1207_v26 = vld [vmem:[%s6862_s12 + $0xe30] sm:$0xff]  ;;  %v5627_v18 = vcombine.low %v812_v4, %v816_v5  ;;  %v900_v49 = vld [vmem:[%s6862_s12 + $0x498] sm:$0xff] }
 0x2dd   : > { %4399 = vmatpush2.bf16.msra.mxu1 %v6065_v17  ;;  %v6018_v3 = vcombine.high %v1203_v62, %v1207_v26  ;;  %v6017_v9 = vcombine.low %v1203_v62, %v1207_v26  ;;  %v936_v17 = vld [vmem:[%s6862_s12 + $0x5b8] sm:$0xff] }
 0x2de   : > { %4400 = vmatprep.subr.bf16.mxu1 %v6058_v19  ;;  %v5755_v19 = vcombine.low %v940_v6, %v944_v7  ;;  %v5748_v55 = vcombine.high %v932_v16, %v936_v17  ;;  %v904_v50 = vld [vmem:[%s6862_s12 + $0x4b8] sm:$0xff] }
 0x2df   : > { %4358 = vmatpush2.bf16.msra.mxu0 %v5929_v59  ;;  %v924_v59 = vld [vmem:[%s6862_s12 + $0x558] sm:$0xff] }
 0x2e0   : > { %4359 = vmatprep.subr.bf16.mxu0 %v5922_v24  ;;  %v5619_v24 = vcombine.low %v804_v13, %v808_v15  ;;  %v764_v60 = vld [vmem:[%s6862_s12 + $0x58] sm:$0xff] }
 0x2e1   : > { %4401 = vmatpush2.bf16.msra.mxu1 %v6057_v23  ;;  %v928_v23 = vld [vmem:[%s6862_s12 + $0x578] sm:$0xff] }
 0x2e2   : > { %4402 = vmatprep.subr.bf16.mxu1 %v6050_v28  ;;  %v5747_v28 = vcombine.low %v932_v16, %v936_v17  ;;  %v5740_v31 = vcombine.high %v924_v59, %v928_v23  ;;  %v768_v61 = vld [vmem:[%s6862_s12 + $0x78] sm:$0xff] }
 0x2e3   : > { %4360 = vmatpush2.bf16.msra.mxu0 %v5921_v34  ;;  %v916_v34 = vld [vmem:[%s6862_s12 + $0x518] sm:$0xff] }
 0x2e4   : > { %4361 = vmatprep.subr.bf16.mxu0 %v5914_v36  ;;  %v5611_v36 = vcombine.low %v796_v20, %v800_v58  ;;  %v892_v62 = vld [vmem:[%s6862_s12 + $0x458] sm:$0xff] }
 0x2e5   : > { %4403 = vmatpush2.bf16.msra.mxu1 %v6049_v35  ;;  %v920_v35 = vld [vmem:[%s6862_s12 + $0x538] sm:$0xff] }
 0x2e6   : > { %4404 = vmatprep.subr.bf16.mxu1 %v6042_v38  ;;  %v5739_v38 = vcombine.low %v924_v59, %v928_v23  ;;  %v5732_v40 = vcombine.high %v916_v34, %v920_v35  ;;  %v896_v26 = vld [vmem:[%s6862_s12 + $0x478] sm:$0xff] }
 0x2e7   : > { %4362 = vmatpush2.bf16.msra.mxu0 %v5913_v43  ;;  %v908_v43 = vld [vmem:[%s6862_s12 + $0x4d8] sm:$0xff] }
 0x2e8   : > { %4363 = vmatprep.subr.bf16.mxu0 %v5906_v45  ;;  %v5596_v45 = vcombine.high %v780_v41, %v784_v42  ;;  %v756_v4 = vld [vmem:[%s6862_s12 + $0x18] sm:$0xff] }
 0x2e9   : > { %4405 = vmatpush2.bf16.msra.mxu1 %v6041_v44  ;;  %v5603_v44 = vcombine.low %v788_v32, %v792_v33  ;;  %v760_v5 = vld [vmem:[%s6862_s12 + $0x38] sm:$0xff] }
 0x2ea   : > { %4406 = vmatprep.subr.bf16.mxu1 %v6034_v46  ;;  %v884_v6 = vld [vmem:[%s6862_s12 + $0x418] sm:$0xff] }
 0x2eb   : > { %4364 = vmatpush2.bf16.msra.mxu0 %v5905_v51  ;;  %v5595_v51 = vcombine.low %v780_v41, %v784_v42  ;;  %v888_v7 = vld [vmem:[%s6862_s12 + $0x438] sm:$0xff] }
 0x2ec   : > { %4365 = vmatprep.subr.bf16.mxu0 %v5898_v21  ;;  %v5588_v21 = vcombine.high %v772_v47, %v776_v48  ;;  %v876_v13 = vld [vmem:[%s6862_s12 + $0x3d8] sm:$0xff] }
 0x2ed   : > { %4407 = vmatpush2.bf16.msra.mxu1 %v6033_v57  ;;  %v880_v15 = vld [vmem:[%s6862_s12 + $0x3f8] sm:$0xff] }
 0x2ee   : > { %4408 = vmatprep.subr.bf16.mxu1 %v6026_v22  ;;  %v5716_v22 = vcombine.high %v900_v49, %v904_v50  ;;  %v1004_v16 = vld [vmem:[%s6862_s12 + $0x7d8] sm:$0xff] }
 0x2ef   : > { %4366 = vmatpush2.bf16.msra.mxu0 %v5897_v27  ;;  %v5587_v27 = vcombine.low %v772_v47, %v776_v48  ;;  %v1008_v17 = vld [vmem:[%s6862_s12 + $0x7f8] sm:$0xff] }
 0x2f0   : > { %4367 = vmatprep.subr.bf16.mxu0 %v5890_v2  ;;  %v5580_v2 = vcombine.high %v764_v60, %v768_v61  ;;  %v868_v20 = vld [vmem:[%s6862_s12 + $0x398] sm:$0xff] }
 0x2f1   : > { %4409 = vmatpush2.bf16.msra.mxu1 %v6025_v1  ;;  %v5715_v1 = vcombine.low %v900_v49, %v904_v50  ;;  %v872_v58 = vld [vmem:[%s6862_s12 + $0x3b8] sm:$0xff] }
 0x2f2   : > { %4410 = vmatprep.subr.bf16.mxu1 %v6018_v3  ;;  %v5708_v3 = vcombine.high %v892_v62, %v896_v26  ;;  %v996_v59 = vld [vmem:[%s6862_s12 + $0x798] sm:$0xff] }
 0x2f3   : > { %4368 = vmatpush2.bf16.msra.mxu0 %v5889_v8  ;;  %v5579_v8 = vcombine.low %v764_v60, %v768_v61  ;;  %v1000_v23 = vld [vmem:[%s6862_s12 + $0x7b8] sm:$0xff] }
 0x2f4   : > { %4423 = vmatprep.subr.bf16.mxu0 %v5628_v10  ;;  %v5572_v10 = vcombine.high %v756_v4, %v760_v5  ;;  %v860_v32 = vld [vmem:[%s6862_s12 + $0x358] sm:$0xff] }
 0x2f5   : > { %4411 = vmatpush2.bf16.msra.mxu1 %v6017_v9  ;;  %v5707_v9 = vcombine.low %v892_v62, %v896_v26  ;;  %v864_v33 = vld [vmem:[%s6862_s12 + $0x378] sm:$0xff] }
 0x2f6   : > { %4466 = vmatprep.subr.bf16.mxu1 %v5756_v12  ;;  %4370 = vmatmul.mubr.bf16.vlgmr.msra.gmra.mxu0 %v7088_v11  ;;  %v5700_v12 = vcombine.high %v884_v6, %v888_v7  ;;  %v852_v41 = vld [vmem:[%s6862_s12 + $0x318] sm:$0xff] }
 0x2f7   : > { %4424 = vmatpush1.bf16.msra.mxu0 %v5627_v18  ;;  %4455 = vmatprep.mubr.bf16.mxu0 %v6936_v25  ;;  %v912_v25 = vld [vmem:[%s6862_s12 + $0x4f8] sm:$0xff]  ;;  %v5571_v18 = vcombine.low %v756_v4, %v760_v5 }
 0x2f8   : > { %4413 = vmatmul.mubr.bf16.vlgmr.msra.gmra.mxu1 %v7094_v14  ;;  %4425 = vmatprep.subr.bf16.mxu0 %v5620_v54  ;;  %v5724_v46 = vcombine.high %v908_v43, %v912_v25  ;;  %v5723_v57 = vcombine.low %v908_v43, %v912_v25  ;;  %v5692_v54 = vcombine.high %v876_v13, %v880_v15  ;;  %v856_v42 = vld [vmem:[%s6862_s12 + $0x338] sm:$0xff] }
 0x2f9   : > { %4467 = vmatpush1.bf16.msra.mxu1 %v5755_v19  ;;  %4498 = vmatprep.mubr.bf16.mxu1 %v6948_v30  ;;  %v5731_v30 = vcombine.low %v916_v34, %v920_v35  ;;  %v5699_v19 = vcombine.low %v884_v6, %v888_v7  ;;  %v988_v34 = vld [vmem:[%s6862_s12 + $0x758] sm:$0xff] }
 0x2fa   : > { %4468 = vmatprep.subr.bf16.mxu1 %v5748_v55  ;;  %v5820_v55 = vcombine.high %v1004_v16, %v1008_v17  ;;  %v992_v35 = vld [vmem:[%s6862_s12 + $0x778] sm:$0xff] }
 0x2fb   : > { %4426 = vmatpush1.bf16.msra.mxu0 %v5619_v24  ;;  %v5691_v24 = vcombine.low %v876_v13, %v880_v15  ;;  %v980_v43 = vld [vmem:[%s6862_s12 + $0x718] sm:$0xff]  ;;  %v1277_v13 = vsub.s32 2, %v7288_v37  ;;  %v4156_v15 = vpop.f32.mrf.mxu1 }
 0x2fc   : > { %4427 = vmatprep.subr.bf16.mxu0 %v5612_v29  ;;  %v5684_v29 = vcombine.high %v868_v20, %v872_v58  ;;  %v984_v25 = vld [vmem:[%s6862_s12 + $0x738] sm:$0xff] }
 0x2fd   : > { %4469 = vmatpush1.bf16.msra.mxu1 %v5747_v28  ;;  %v5819_v28 = vcombine.low %v1004_v16, %v1008_v17  ;;  %v844_v47 = vld [vmem:[%s6862_s12 + $0x2d8] sm:$0xff] }
 0x2fe   : > { %4470 = vmatprep.subr.bf16.mxu1 %v5740_v31  ;;  %v5812_v31 = vcombine.high %v996_v59, %v1000_v23  ;;  %v848_v48 = vld [vmem:[%s6862_s12 + $0x2f8] sm:$0xff] }
 0x2ff   : > { %4428 = vmatpush1.bf16.msra.mxu0 %v5611_v36  ;;  %v5683_v36 = vcombine.low %v868_v20, %v872_v58  ;;  %v972_v49 = vld [vmem:[%s6862_s12 + $0x6d8] sm:$0xff] }
 0x300   : > { %4429 = vmatprep.subr.bf16.mxu0 %v5604_v39  ;;  %v5676_v39 = vcombine.high %v860_v32, %v864_v33  ;;  %v976_v50 = vld [vmem:[%s6862_s12 + $0x6f8] sm:$0xff] }
 0x301   : > { %4471 = vmatpush1.bf16.msra.mxu1 %v5739_v38  ;;  %v5811_v38 = vcombine.low %v996_v59, %v1000_v23  ;;  %v836_v60 = vld [vmem:[%s6862_s12 + $0x298] sm:$0xff] }
 0x302   : > { %4472 = vmatprep.subr.bf16.mxu1 %v5732_v40  ;;  %v5804_v40 = vcombine.high %v988_v34, %v992_v35  ;;  %v840_v61 = vld [vmem:[%s6862_s12 + $0x2b8] sm:$0xff] }
 0x303   : > { %4430 = vmatpush1.bf16.msra.mxu0 %v5603_v44  ;;  %v5675_v44 = vcombine.low %v860_v32, %v864_v33  ;;  %v964_v62 = vld [vmem:[%s6862_s12 + $0x698] sm:$0xff] }
 0x304   : > { %4431 = vmatprep.subr.bf16.mxu0 %v5596_v45  ;;  %v5668_v45 = vcombine.high %v852_v41, %v856_v42  ;;  %v968_v26 = vld [vmem:[%s6862_s12 + $0x6b8] sm:$0xff] }
 0x305   : > { %4473 = vmatpush1.bf16.msra.mxu1 %v5731_v30  ;;  %v5803_v30 = vcombine.low %v988_v34, %v992_v35  ;;  %v828_v4 = vld [vmem:[%s6862_s12 + $0x258] sm:$0xff] }
 0x306   : > { %4474 = vmatprep.subr.bf16.mxu1 %v5724_v46  ;;  %v5796_v46 = vcombine.high %v980_v43, %v984_v25  ;;  %v832_v5 = vld [vmem:[%s6862_s12 + $0x278] sm:$0xff] }
 0x307   : > { %4432 = vmatpush1.bf16.msra.mxu0 %v5595_v51  ;;  %v5667_v51 = vcombine.low %v852_v41, %v856_v42  ;;  %v956_v6 = vld [vmem:[%s6862_s12 + $0x658] sm:$0xff]  ;;  %v5643_v20 = vcombine.low %v828_v4, %v832_v5 }
 0x308   : > { %4433 = vmatprep.subr.bf16.mxu0 %v5588_v21  ;;  %v5660_v21 = vcombine.high %v844_v47, %v848_v48  ;;  %v960_v7 = vld [vmem:[%s6862_s12 + $0x678] sm:$0xff] }
 0x309   : > { %4475 = vmatpush1.bf16.msra.mxu1 %v5723_v57  ;;  %v5795_v57 = vcombine.low %v980_v43, %v984_v25  ;;  %v5772_v16 = vcombine.high %v956_v6, %v960_v7  ;;  %v820_v17 = vld [vmem:[%s6862_s12 + $0x218] sm:$0xff]  ;;  %v5771_v59 = vcombine.low %v956_v6, %v960_v7 }
 0x30a   : > { %4476 = vmatprep.subr.bf16.mxu1 %v5716_v22  ;;  %v5788_v22 = vcombine.high %v972_v49, %v976_v50  ;;  %v1072_v32 = vld [vmem:[%s6862_s12 + $0x9f8] sm:$0xff] }
 0x30b   : > { %4434 = vmatpush1.bf16.msra.mxu0 %v5587_v27  ;;  %v5659_v27 = vcombine.low %v844_v47, %v848_v48  ;;  %v1196_v33 = vld [vmem:[%s6862_s12 + $0xdd8] sm:$0xff] }
 0x30c   : > { %4435 = vmatprep.subr.bf16.mxu0 %v5580_v2  ;;  %v5652_v2 = vcombine.high %v836_v60, %v840_v61  ;;  %v1200_v34 = vld [vmem:[%s6862_s12 + $0xdf8] sm:$0xff] }
 0x30d   : > { %4477 = vmatpush1.bf16.msra.mxu1 %v5715_v1  ;;  %v5787_v1 = vcombine.low %v972_v49, %v976_v50  ;;  %v6012_v43 = vcombine.high %v1196_v33, %v1200_v34  ;;  %v1060_v25 = vld [vmem:[%s6862_s12 + $0x998] sm:$0xff]  ;;  %v6011_v48 = vcombine.low %v1196_v33, %v1200_v34 }
 0x30e   : > { %4478 = vmatprep.subr.bf16.mxu1 %v5708_v3  ;;  %v5780_v3 = vcombine.high %v964_v62, %v968_v26  ;;  %v1052_v50 = vld [vmem:[%s6862_s12 + $0x958] sm:$0xff] }
 0x30f   : > { %4436 = vmatpush1.bf16.msra.mxu0 %v5579_v8  ;;  %v5651_v8 = vcombine.low %v836_v60, %v840_v61  ;;  %v1056_v60 = vld [vmem:[%s6862_s12 + $0x978] sm:$0xff] }
 0x310   : > { %4437 = vmatprep.subr.bf16.mxu0 %v5572_v10  ;;  %v5779_v10 = vcombine.low %v964_v62, %v968_v26  ;;  %v1180_v61 = vld [vmem:[%s6862_s12 + $0xd58] sm:$0xff]  ;;  %v5868_v7 = vcombine.high %v1052_v50, %v1056_v60 }
 0x311   : > { %4479 = vmatpush1.bf16.msra.mxu1 %v5707_v9  ;;  %v4113_v9 = vpop.f32.mrf.mxu0  ;;  %v1184_v62 = vld [vmem:[%s6862_s12 + $0xd78] sm:$0xff] }
 0x312   : > { %4480 = vmatprep.subr.bf16.mxu1 %v5700_v12  ;;  %v5644_v12 = vcombine.high %v828_v4, %v832_v5  ;;  %v1164_v34 = vld [vmem:[%s6862_s12 + $0xcd8] sm:$0xff] }
 0x313   : > { %4438 = vmatpush1.bf16.msra.mxu0 %v5571_v18  ;;  %v824_v18 = vld [vmem:[%s6862_s12 + $0x238] sm:$0xff]  ;;  %v4115_v58 = vpop.f32.mrf.mxu0 }
 0x314   : > { %4439 = vmatprep.subr.bf16.mxu0 %v5692_v54  ;;  %v952_v54 = vld [vmem:[%s6862_s12 + $0x638] sm:$0xff]  ;;  %v5636_v23 = vcombine.high %v820_v17, %v824_v18 }
 0x315   : > { %4481 = vmatpush1.bf16.msra.mxu1 %v5699_v19  ;;  %v948_v19 = vld [vmem:[%s6862_s12 + $0x618] sm:$0xff] }
 0x316   : > { %4482 = vmatprep.subr.bf16.mxu1 %v5820_v55  ;;  %v1281_v55 = vsub.s32 3, %v7288_v37 }
 0x317   : > { %4440 = vmatpush2.bf16.msra.mxu0 %v5691_v24  ;;  %v1278_v24 = vrot.slane %v7303_v53, %v1277_v13 }
 0x318   : > { %4441 = vmatprep.subr.bf16.mxu0 %v5684_v29  ;;  %v5764_v29 = vcombine.high %v948_v19, %v952_v54  ;;  %v1282_v35 = vrot.slane %v7303_v53, %v1281_v55 }
 0x319   : > { %4483 = vmatpush2.bf16.msra.mxu1 %v5819_v28  ;;  %v4158_v28 = vpop.f32.mrf.mxu1  ;;  %v4114_v41 = vadd.f32 %v4113_v9, %v1278_v24  ;;  %v1044_v9 = vld [vmem:[%s6862_s12 + $0x918] sm:$0xff] }
 0x31a   : > { %4484 = vmatprep.subr.bf16.mxu1 %v5812_v31  ;;  %v1068_v31 = vld [vmem:[%s6862_s12 + $0x9d8] sm:$0xff] }
 0x31b   : > { %4442 = vmatpush2.bf16.msra.mxu0 %v5683_v36  ;;  %v5635_v36 = vcombine.low %v820_v17, %v824_v18  ;;  %v4160_v42 = vpop.f32.mrf.mxu1  ;;  %v5883_v53 = vcombine.low %v1068_v31, %v1072_v32  ;;  %v1176_v17 = vld [vmem:[%s6862_s12 + $0xd38] sm:$0xff] }
 0x31c   : > { %4443 = vmatprep.subr.bf16.mxu0 %v5676_v39  ;;  %v5763_v39 = vcombine.low %v948_v19, %v952_v54 }
 0x31d   : > { %4485 = vmatpush2.bf16.msra.mxu1 %v5811_v38  ;;  %v4117_v38 = vpop.f32.mrf.mxu0 }
 0x31e   : > { %4486 = vmatprep.subr.bf16.mxu1 %v5804_v40  ;;  %v5884_v40 = vcombine.high %v1068_v31, %v1072_v32  ;;  %v1036_v31 = vld [vmem:[%s6862_s12 + $0x8d8] sm:$0xff] }
 0x31f   : > { %4444 = vmatpush2.bf16.msra.mxu0 %v5675_v44  ;;  %v1064_v44 = vld [vmem:[%s6862_s12 + $0x9b8] sm:$0xff]  ;;  %v4119_v47 = vpop.f32.mrf.mxu0 }
 0x320   : > { %4445 = vmatprep.subr.bf16.mxu0 %v5668_v45  ;;  %v1192_v45 = vld [vmem:[%s6862_s12 + $0xdb8] sm:$0xff]  ;;  %v5876_v49 = vcombine.high %v1060_v25, %v1064_v44 }
 0x321   : > { %4487 = vmatpush2.bf16.msra.mxu1 %v5803_v30  ;;  %v1188_v30 = vld [vmem:[%s6862_s12 + $0xd98] sm:$0xff] }
 0x322   : > { %4488 = vmatprep.subr.bf16.mxu1 %v5796_v46  ;;  %v4116_v46 = vadd.f32 %v4115_v58, %v1282_v35  ;;  %v6003_v6 = vcombine.low %v1188_v30, %v1192_v45  ;;  %v1040_v32 = vld [vmem:[%s6862_s12 + $0x8f8] sm:$0xff] }
 0x323   : > { %4446 = vmatpush2.bf16.msra.mxu0 %v5667_v51  ;;  %v4157_v51 = vadd.f32 %v4156_v15, %v4114_v41  ;;  %v1048_v15 = vld [vmem:[%s6862_s12 + $0x938] sm:$0xff]  ;;  %v5852_v41 = vcombine.high %v1036_v31, %v1040_v32 }
 0x324   : > { %4447 = vmatprep.subr.bf16.mxu0 %v5660_v21  ;;  %v4162_v21 = vpop.f32.mrf.mxu1 }
 0x325   : > { %4489 = vmatpush2.bf16.msra.mxu1 %v5795_v57  ;;  %v4118_v57 = vadd.f32 %v4117_v38, %v1278_v24 }
 0x326   : > { %4490 = vmatprep.subr.bf16.mxu1 %v5788_v22  ;;  %v6004_v22 = vcombine.high %v1188_v30, %v1192_v45  ;;  %v1032_v30 = vld [vmem:[%s6862_s12 + $0x8b8] sm:$0xff] }
 0x327   : > { %4448 = vmatpush2.bf16.msra.mxu0 %v5659_v27  ;;  %v5875_v27 = vcombine.low %v1060_v25, %v1064_v44  ;;  %v1028_v44 = vld [vmem:[%s6862_s12 + $0x898] sm:$0xff] }
 0x328   : > { %4449 = vmatprep.subr.bf16.mxu0 %v5652_v2  ;;  %v4120_v2 = vadd.f32 %v4119_v47, %v1282_v35  ;;  %v1168_v35 = vld [vmem:[%s6862_s12 + $0xcf8] sm:$0xff]  ;;  %v5851_v47 = vcombine.low %v1036_v31, %v1040_v32 }
 0x329   : > { %4491 = vmatpush2.bf16.msra.mxu1 %v5787_v1  ;;  %v4159_v1 = vadd.f32 %v4158_v28, %v4116_v46  ;;  %v5980_v25 = vcombine.high %v1164_v34, %v1168_v35  ;;  %v1156_v45 = vld [vmem:[%s6862_s12 + $0xc98] sm:$0xff] }
 0x32a   : > { %4492 = vmatprep.subr.bf16.mxu1 %v5780_v3  ;;  %v4163_v18 = vadd.f32 %v4162_v21, %v4120_v2  ;;  %v1160_v46 = vld [vmem:[%s6862_s12 + $0xcb8] sm:$0xff] }
 0x32b   : > { %4450 = vmatpush2.bf16.msra.mxu0 %v5651_v8  ;;  %v5996_v8 = vcombine.high %v1180_v61, %v1184_v62  ;;  %v1148_v21 = vld [vmem:[%s6862_s12 + $0xc58] sm:$0xff] }
 0x32c   : > { %4451 = vmatprep.subr.bf16.mxu0 %v5644_v12  ;;  %v1140_v2 = vld [vmem:[%s6862_s12 + $0xc18] sm:$0xff] }
 0x32d   : > { %4493 = vmatpush2.bf16.msra.mxu1 %v5779_v10  ;;  %v4161_v10 = vadd.f32 %v4160_v42, %v4118_v57  ;;  %v1024_v57 = vld [vmem:[%s6862_s12 + $0x878] sm:$0xff] }
 0x32e   : > { %4494 = vmatprep.subr.bf16.mxu1 %v5772_v16  ;;  %v1172_v16 = vld [vmem:[%s6862_s12 + $0xd18] sm:$0xff] }
 0x32f   : > { %4452 = vmatpush2.bf16.msra.mxu0 %v5643_v20  ;;  %v5867_v20 = vcombine.low %v1052_v50, %v1056_v60  ;;  %v5988_v24 = vcombine.high %v1172_v16, %v1176_v17  ;;  %v5972_v50 = vcombine.high %v1156_v45, %v1160_v46  ;;  %v5843_v60 = vcombine.low %v1028_v44, %v1032_v30  ;;  %v1108_v32 = vld [vmem:[%s6862_s12 + $0xb18] sm:$0xff] }
 0x330   : > { %4453 = vmatprep.subr.bf16.mxu0 %v5636_v23  ;;  %v5860_v23 = vcombine.high %v1044_v9, %v1048_v15 }
 0x331   : > { %4495 = vmatpush2.bf16.msra.mxu1 %v5771_v59  ;;  %v5995_v59 = vcombine.low %v1180_v61, %v1184_v62  ;;  %v5971_v61 = vcombine.low %v1156_v45, %v1160_v46 }
 0x332   : > { %4496 = vmatprep.subr.bf16.mxu1 %v5764_v29 }
 0x333   : > { %4454 = vmatpush2.bf16.msra.mxu0 %v5635_v36 }
 0x334   : > { %4509 = vmatprep.subr.bf16.mxu0 %v5884_v40  ;;  %v5987_v40 = vcombine.low %v1172_v16, %v1176_v17  ;;  %v1124_v17 = vld [vmem:[%s6862_s12 + $0xb98] sm:$0xff] }
 0x335   : > { %4497 = vmatpush2.bf16.msra.mxu1 %v5763_v39  ;;  %v5859_v39 = vcombine.low %v1044_v9, %v1048_v15  ;;  %v1136_v9 = vld [vmem:[%s6862_s12 + $0xbf8] sm:$0xff] }
 0x336   : > { %4552 = vmatprep.subr.bf16.mxu1 %v6012_v43  ;;  %v4199_v26 = vpop.f32.mrf.mxu0  ;;  %4456 = vmatmul.mubr.bf16.vlgmr.msra.gmra.mxu0 %v6993_v52 }
 0x337   : > { %v4200_v3 = vadd.f32 %v4199_v26, %v4157_v51  ;;  %4510 = vmatpush1.bf16.msra.mxu0 %v5883_v53  ;;  %4541 = vmatprep.mubr.bf16.mxu0 %v7016_v63  ;;  %v1020_v51 = vld [vmem:[%s6862_s12 + $0x858] sm:$0xff] }
 0x338   : > { %v4242_v4 = vpop.f32.mrf.mxu1  ;;  %4499 = vmatmul.mubr.bf16.vlgmr.msra.gmra.mxu1 %v7004_v56  ;;  %v4201_v5 = vpop.f32.mrf.mxu0  ;;  %4511 = vmatprep.subr.bf16.mxu0 %v5876_v49  ;;  %v5844_v49 = vcombine.high %v1028_v44, %v1032_v30  ;;  %v5836_v62 = vcombine.high %v1020_v51, %v1024_v57 }
 0x339   : > { %4553 = vmatpush1.bf16.msra.mxu1 %v6011_v48  ;;  %v4243_v52 = vadd.f32 %v4242_v4, %v4200_v3  ;;  %v4202_v12 = vadd.f32 %v4201_v5, %v4159_v1  ;;  %4584 = vmatprep.mubr.bf16.mxu1 %v7023_v0  ;;  %v5979_v48 = vcombine.low %v1164_v34, %v1168_v35  ;;  %v1016_v1 = vld [vmem:[%s6862_s12 + $0x838] sm:$0xff] }
 0x33a   : > { %v4244_v13 = vpop.f32.mrf.mxu1  ;;  %4554 = vmatprep.subr.bf16.mxu1 %v6004_v22  ;;  %v4203_v56 = vpop.f32.mrf.mxu0  ;;  %v1152_v22 = vld [vmem:[%s6862_s12 + $0xc78] sm:$0xff]  ;;  %v5835_v4 = vcombine.low %v1020_v51, %v1024_v57 }
 0x33b   : > { %v4245_v19 = vadd.f32 %v4244_v13, %v4202_v12  ;;  %v4204_v54 = vadd.f32 %v4203_v56, %v4161_v10  ;;  %4512 = vmatpush1.bf16.msra.mxu0 %v5875_v27  ;;  %v4597_v63 = vmax.f32 %v4243_v52, 0.0  ;;  %v5964_v26 = vcombine.high %v1148_v21, %v1152_v22  ;;  %v1012_v27 = vld [vmem:[%s6862_s12 + $0x818] sm:$0xff] }
 0x33c   : > { %v4246_v55 = vpop.f32.mrf.mxu1  ;;  %v4205_v58 = vpop.f32.mrf.mxu0  ;;  %4513 = vmatprep.subr.bf16.mxu0 %v5868_v7  ;;  %v1144_v3 = vld [vmem:[%s6862_s12 + $0xc38] sm:$0xff]  ;;  %v5963_v5 = vcombine.low %v1148_v21, %v1152_v22  ;;  %v5827_v12 = vcombine.low %v1012_v27, %v1016_v1 }
 0x33d   : > { %4555 = vmatpush1.bf16.msra.mxu1 %v6003_v6  ;;  %v4598_v28 = vmax.f32 %v4245_v19, 0.0  ;;  %v4247_v29 = vadd.f32 %v4246_v55, %v4204_v54  ;;  %v4206_v0 = vadd.f32 %v4205_v58, %v4163_v18  ;;  %v5828_v6 = vcombine.high %v1012_v27, %v1016_v1  ;;  %v1260_v10 = vld [vmem:[%s6862_s12 + $0xfd8] sm:$0xff] }
 0x33e   : > { %4556 = vmatprep.subr.bf16.mxu1 %v5996_v8  ;;  %v4248_v33 = vpop.f32.mrf.mxu1  ;;  %v5956_v7 = vcombine.high %v1140_v2, %v1144_v3  ;;  %v1132_v8 = vld [vmem:[%s6862_s12 + $0xbd8] sm:$0xff]  ;;  %v5955_v13 = vcombine.low %v1140_v2, %v1144_v3 }
 0x33f   : > { %v6175_v36 = vpack.c.bf16 %v4598_v28, %v4597_v63  ;;  %v4249_v38 = vadd.f32 %v4248_v33, %v4206_v0  ;;  %4514 = vmatpush1.bf16.msra.mxu0 %v5867_v20  ;;  %v4605_v42 = vmax.f32 %v4247_v29, 0.0  ;;  %v1264_v52 = vld [vmem:[%s6862_s12 + $0xff8] sm:$0xff]  ;;  %v5948_v15 = vcombine.high %v1132_v8, %v1136_v9 }
 0x340   : > { %4515 = vmatprep.subr.bf16.mxu0 %v5860_v23  ;;  %v6076_v16 = vcombine.high %v1260_v10, %v1264_v52  ;;  %v1128_v56 = vld [vmem:[%s6862_s12 + $0xbb8] sm:$0xff]  ;;  %v5947_v54 = vcombine.low %v1132_v8, %v1136_v9  ;;  %v6075_v55 = vcombine.low %v1260_v10, %v1264_v52 }
 0x341   : > { %4557 = vmatpush1.bf16.msra.mxu1 %v5995_v59  ;;  %4663 = vst [vmem:[%s7347_s10 + $0x8] sm:$0xff] %v6175_v36  ;;  %v4606_v43 = vmax.f32 %v4249_v38, 0.0  ;;  %v1252_v18 = vld [vmem:[%s6862_s12 + $0xf98] sm:$0xff]  ;;  %v5940_v20 = vcombine.high %v1124_v17, %v1128_v56  ;;  %v5939_v28 = vcombine.low %v1124_v17, %v1128_v56  ;;  %v1289_v17 = vsub.s32 5, %v7288_v37 }
 0x342   : > { %4558 = vmatprep.subr.bf16.mxu1 %v5988_v24  ;;  %v1256_v19 = vld [vmem:[%s6862_s12 + $0xfb8] sm:$0xff] }
 0x343   : > { %v6179_v53 = vpack.c.bf16 %v4606_v43, %v4605_v42  ;;  %4516 = vmatpush1.bf16.msra.mxu0 %v5859_v39  ;;  %v6068_v58 = vcombine.high %v1252_v18, %v1256_v19  ;;  %v1116_v59 = vld [vmem:[%s6862_s12 + $0xb58] sm:$0xff]  ;;  %v6067_v29 = vcombine.low %v1252_v18, %v1256_v19  ;;  %v6361_v18 = vld [vmem:[%s332_s24] sm:$0xff] }
 0x344   : > { %4517 = vmatprep.subr.bf16.mxu0 %v5852_v41  ;;  %v1120_v23 = vld [vmem:[%s6862_s12 + $0xb78] sm:$0xff] }
 0x345   : > { %4559 = vmatpush1.bf16.msra.mxu1 %v5987_v40  ;;  %4667 = vst [vmem:[%s7347_s10 + $0x28] sm:$0xff] %v6179_v53  ;;  %v1244_v24 = vld [vmem:[%s6862_s12 + $0xf58] sm:$0xff]  ;;  %v5932_v0 = vcombine.high %v1116_v59, %v1120_v23  ;;  %v5931_v36 = vcombine.low %v1116_v59, %v1120_v23 }
 0x346   : > { %4560 = vmatprep.subr.bf16.mxu1 %v5980_v25  ;;  %v1248_v63 = vld [vmem:[%s6862_s12 + $0xf78] sm:$0xff] }
 0x347   : > { %4518 = vmatpush1.bf16.msra.mxu0 %v5851_v47  ;;  %v6060_v31 = vcombine.high %v1244_v24, %v1248_v63  ;;  %v1112_v33 = vld [vmem:[%s6862_s12 + $0xb38] sm:$0xff]  ;;  %v6059_v38 = vcombine.low %v1244_v24, %v1248_v63 }
 0x348   : > { %4519 = vmatprep.subr.bf16.mxu0 %v5844_v49  ;;  %v1236_v34 = vld [vmem:[%s6862_s12 + $0xf18] sm:$0xff]  ;;  %v5924_v39 = vcombine.high %v1108_v32, %v1112_v33  ;;  %v5923_v44 = vcombine.low %v1108_v32, %v1112_v33 }
 0x349   : > { %4561 = vmatpush1.bf16.msra.mxu1 %v5979_v48  ;;  %v1240_v35 = vld [vmem:[%s6862_s12 + $0xf38] sm:$0xff] }
 0x34a   : > { %4562 = vmatprep.subr.bf16.mxu1 %v5972_v50  ;;  %v6052_v40 = vcombine.high %v1236_v34, %v1240_v35  ;;  %v1100_v41 = vld [vmem:[%s6862_s12 + $0xad8] sm:$0xff]  ;;  %v6051_v30 = vcombine.low %v1236_v34, %v1240_v35 }
 0x34b   : > { %4520 = vmatpush1.bf16.msra.mxu0 %v5843_v60  ;;  %v1104_v42 = vld [vmem:[%s6862_s12 + $0xaf8] sm:$0xff] }
 0x34c   : > { %4521 = vmatprep.subr.bf16.mxu0 %v5836_v62  ;;  %v1228_v43 = vld [vmem:[%s6862_s12 + $0xed8] sm:$0xff]  ;;  %v5916_v45 = vcombine.high %v1100_v41, %v1104_v42  ;;  %v5915_v50 = vcombine.low %v1100_v41, %v1104_v42 }
 0x34d   : > { %4563 = vmatpush1.bf16.msra.mxu1 %v5971_v61  ;;  %v1232_v25 = vld [vmem:[%s6862_s12 + $0xef8] sm:$0xff] }
 0x34e   : > { %4564 = vmatprep.subr.bf16.mxu1 %v5964_v26  ;;  %v6044_v46 = vcombine.high %v1228_v43, %v1232_v25  ;;  %v1092_v53 = vld [vmem:[%s6862_s12 + $0xa98] sm:$0xff]  ;;  %v6043_v51 = vcombine.low %v1228_v43, %v1232_v25 }
 0x34f   : > { %4522 = vmatpush1.bf16.msra.mxu0 %v5835_v4  ;;  %v1096_v47 = vld [vmem:[%s6862_s12 + $0xab8] sm:$0xff] }
 0x350   : > { %4523 = vmatprep.subr.bf16.mxu0 %v5828_v6  ;;  %v1220_v48 = vld [vmem:[%s6862_s12 + $0xe98] sm:$0xff]  ;;  %v5908_v57 = vcombine.high %v1092_v53, %v1096_v47  ;;  %v5907_v26 = vcombine.low %v1092_v53, %v1096_v47 }
 0x351   : > { %4565 = vmatpush1.bf16.msra.mxu1 %v5963_v5  ;;  %v1224_v49 = vld [vmem:[%s6862_s12 + $0xeb8] sm:$0xff] }
 0x352   : > { %4566 = vmatprep.subr.bf16.mxu1 %v5956_v7  ;;  %v6036_v21 = vcombine.high %v1220_v48, %v1224_v49  ;;  %v1084_v22 = vld [vmem:[%s6862_s12 + $0xa58] sm:$0xff]  ;;  %v6035_v27 = vcombine.low %v1220_v48, %v1224_v49 }
 0x353   : > { %4524 = vmatpush1.bf16.msra.mxu0 %v5827_v12  ;;  %v1088_v60 = vld [vmem:[%s6862_s12 + $0xa78] sm:$0xff] }
 0x354   : > { %4525 = vmatprep.subr.bf16.mxu0 %v5948_v15  ;;  %v1212_v61 = vld [vmem:[%s6862_s12 + $0xe58] sm:$0xff]  ;;  %v5900_v1 = vcombine.high %v1084_v22, %v1088_v60  ;;  %v5899_v7 = vcombine.low %v1084_v22, %v1088_v60  ;;  %v1285_v15 = vsub.s32 4, %v7288_v37  ;;  %v1297_v60 = vsub.s32 7, %v7288_v37 }
 0x355   : > { %4567 = vmatpush1.bf16.msra.mxu1 %v5955_v13  ;;  %v1216_v62 = vld [vmem:[%s6862_s12 + $0xe78] sm:$0xff] }
 0x356   : > { %4568 = vmatprep.subr.bf16.mxu1 %v6076_v16  ;;  %v6028_v2 = vcombine.high %v1212_v61, %v1216_v62  ;;  %v1076_v3 = vld [vmem:[%s6862_s12 + $0xa18] sm:$0xff]  ;;  %v6027_v8 = vcombine.low %v1212_v61, %v1216_v62  ;;  %v1286_v19 = vrot.slane %v6361_v18, %v1285_v15 }
 0x357   : > { %4526 = vmatpush2.bf16.msra.mxu0 %v5947_v54  ;;  %v1080_v4 = vld [vmem:[%s6862_s12 + $0xa38] sm:$0xff] }
 0x358   : > { %4527 = vmatprep.subr.bf16.mxu0 %v5940_v20  ;;  %v1204_v5 = vld [vmem:[%s6862_s12 + $0xe18] sm:$0xff]  ;;  %v5892_v9 = vcombine.high %v1076_v3, %v1080_v4  ;;  %v5891_v52 = vcombine.low %v1076_v3, %v1080_v4 }
 0x359   : > { %4569 = vmatpush2.bf16.msra.mxu1 %v6075_v55  ;;  %v1208_v6 = vld [vmem:[%s6862_s12 + $0xe38] sm:$0xff]  ;;  %v1290_v55 = vrot.slane %v6361_v18, %v1289_v17 }
 0x35a   : > { %4570 = vmatprep.subr.bf16.mxu1 %v6068_v58  ;;  %v6020_v10 = vcombine.high %v1204_v5, %v1208_v6  ;;  %v6019_v12 = vcombine.low %v1204_v5, %v1208_v6 }
 0x35b   : > { %4528 = vmatpush2.bf16.msra.mxu0 %v5939_v28 }
 0x35c   : > { %4529 = vmatprep.subr.bf16.mxu0 %v5932_v0 }
 0x35d   : > { %4571 = vmatpush2.bf16.msra.mxu1 %v6067_v29 }
 0x35e   : > { %4572 = vmatprep.subr.bf16.mxu1 %v6060_v31 }
 0x35f   : > { %4530 = vmatpush2.bf16.msra.mxu0 %v5931_v36 }
 0x360   : > { %4531 = vmatprep.subr.bf16.mxu0 %v5924_v39 }
 0x361   : > { %4573 = vmatpush2.bf16.msra.mxu1 %v6059_v38 }
 0x362   : > { %4574 = vmatprep.subr.bf16.mxu1 %v6052_v40 }
 0x363   : > { %4532 = vmatpush2.bf16.msra.mxu0 %v5923_v44 }
 0x364   : > { %4533 = vmatprep.subr.bf16.mxu0 %v5916_v45 }
 0x365   : > { %4575 = vmatpush2.bf16.msra.mxu1 %v6051_v30 }
 0x366   : > { %4576 = vmatprep.subr.bf16.mxu1 %v6044_v46 }
 0x367   : > { %4534 = vmatpush2.bf16.msra.mxu0 %v5915_v50 }
 0x368   : > { %4535 = vmatprep.subr.bf16.mxu0 %v5908_v57 }
 0x369   : > { %4577 = vmatpush2.bf16.msra.mxu1 %v6043_v51 }
 0x36a   : > { %4578 = vmatprep.subr.bf16.mxu1 %v6036_v21  ;;  %v1293_v21 = vsub.s32 6, %v7288_v37 }
 0x36b   : > { %4536 = vmatpush2.bf16.msra.mxu0 %v5907_v26 }
 0x36c   : > { %4537 = vmatprep.subr.bf16.mxu0 %v5900_v1  ;;  %v1294_v62 = vrot.slane %v6361_v18, %v1293_v21 }
 0x36d   : > { %4579 = vmatpush2.bf16.msra.mxu1 %v6035_v27  ;;  %v1298_v27 = vrot.slane %v6361_v18, %v1297_v60 }
 0x36e   : > { %4580 = vmatprep.subr.bf16.mxu1 %v6028_v2 }
 0x36f   : > { %4538 = vmatpush2.bf16.msra.mxu0 %v5899_v7 }
 0x370   : > { %4539 = vmatprep.subr.bf16.mxu0 %v5892_v9 }
 0x371   : > { %4581 = vmatpush2.bf16.msra.mxu1 %v6027_v8 }
 0x372   : > { %4582 = vmatprep.subr.bf16.mxu1 %v6020_v10 }
 0x373   : > { %4540 = vmatpush2.bf16.msra.mxu0 %v5891_v52 }
 0x375   : > { %4583 = vmatpush2.bf16.msra.mxu1 %v6019_v12 }
 0x376   : > { %4542 = vmatmul.mubr.bf16.vlgmr.msra.gmra.mxu0 %v7088_v11  ;;  %v4285_v13 = vpop.f32.mrf.mxu0 }
 0x377   : > { %v4286_v58 = vadd.f32 %v4285_v13, %v1286_v19 }
 0x378   : > { %4585 = vmatmul.mubr.bf16.vlgmr.msra.gmra.mxu1 %v7094_v14  ;;  %v4328_v16 = vpop.f32.mrf.mxu1  ;;  %v4287_v56 = vpop.f32.mrf.mxu0 }
 0x379   : > { %v4288_v23 = vadd.f32 %v4287_v56, %v1290_v55  ;;  %v4329_v11 = vadd.f32 %v4328_v16, %v4286_v58 }
 0x37a   : > { %v4330_v54 = vpop.f32.mrf.mxu1  ;;  %v4289_v20 = vpop.f32.mrf.mxu0 }
 0x37b   : > { %v4290_v63 = vadd.f32 %v4289_v20, %v1286_v19  ;;  %v4331_v29 = vadd.f32 %v4330_v54, %v4288_v23 }
 0x37c   : > { %v4332_v59 = vpop.f32.mrf.mxu1  ;;  %v4291_v24 = vpop.f32.mrf.mxu0 }
 0x37d   : > { %v4292_v0 = vadd.f32 %v4291_v24, %v1290_v55  ;;  %v4333_v34 = vadd.f32 %v4332_v59, %v4290_v63 }
 0x37e   : > { %v4334_v14 = vpop.f32.mrf.mxu1 }
 0x37f   : > { %v4335_v40 = vadd.f32 %v4334_v14, %v4292_v0 }
 0x3b6   : > { %v4371_v28 = vpop.f32.mrf.mxu0 }
 0x3b7   : > { %v4372_v31 = vadd.f32 %v4371_v28, %v4329_v11 }
 0x3b8   : > { %v4414_v32 = vpop.f32.mrf.mxu1  ;;  %v4373_v33 = vpop.f32.mrf.mxu0 }
 0x3b9   : > { %v4415_v35 = vadd.f32 %v4414_v32, %v4372_v31  ;;  %v4374_v36 = vadd.f32 %v4373_v33, %v4331_v29 }
 0x3ba   : > { %v4416_v38 = vpop.f32.mrf.mxu1  ;;  %v4375_v39 = vpop.f32.mrf.mxu0 }
 0x3bb   : > { %v4417_v41 = vadd.f32 %v4416_v38, %v4374_v36  ;;  %v4376_v42 = vadd.f32 %v4375_v39, %v4333_v34  ;;  %v4599_v44 = vmax.f32 %v4415_v35, 0.0 }
 0x3bc   : > { %v4418_v43 = vpop.f32.mrf.mxu1  ;;  %v4377_v25 = vpop.f32.mrf.mxu0 }
 0x3bd   : > { %v4600_v30 = vmax.f32 %v4417_v41, 0.0  ;;  %v4419_v45 = vadd.f32 %v4418_v43, %v4376_v42  ;;  %v4378_v46 = vadd.f32 %v4377_v25, %v4335_v40 }
 0x3be   : > { %v4420_v53 = vpop.f32.mrf.mxu1 }
 0x3bf   : > { %v6176_v47 = vpack.c.bf16 %v4600_v30, %v4599_v44  ;;  %v4421_v48 = vadd.f32 %v4420_v53, %v4378_v46  ;;  %v4607_v49 = vmax.f32 %v4419_v45, 0.0 }
 0x3c1   : > { %4664 = vst [vmem:[%s7347_s10 + $0x10] sm:$0xff] %v6176_v47  ;;  %v4608_v50 = vmax.f32 %v4421_v48, 0.0 }
 0x3c3   : > { %v6180_v51 = vpack.c.bf16 %v4608_v50, %v4607_v49 }
 0x3c5   : > { %4668 = vst [vmem:[%s7347_s10 + $0x30] sm:$0xff] %v6180_v51 }
 0x3f6   : > { %v4457_v57 = vpop.f32.mrf.mxu0 }
 0x3f7   : > { %v4458_v2 = vadd.f32 %v4457_v57, %v1294_v62 }
 0x3f8   : > { %v4500_v22 = vpop.f32.mrf.mxu1  ;;  %v4459_v61 = vpop.f32.mrf.mxu0 }
 0x3f9   : > { %v4460_v4 = vadd.f32 %v4459_v61, %v1298_v27  ;;  %v4501_v6 = vadd.f32 %v4500_v22, %v4458_v2 }
 0x3fa   : > { %v4502_v26 = vpop.f32.mrf.mxu1  ;;  %v4461_v1 = vpop.f32.mrf.mxu0 }
 0x3fb   : > { %v4462_v7 = vadd.f32 %v4461_v1, %v1294_v62  ;;  %v4503_v10 = vadd.f32 %v4502_v26, %v4460_v4 }
 0x3fc   : > { %v4504_v3 = vpop.f32.mrf.mxu1  ;;  %v4463_v5 = vpop.f32.mrf.mxu0 }
 0x3fd   : > { %v4464_v52 = vadd.f32 %v4463_v5, %v1298_v27  ;;  %v4505_v16 = vadd.f32 %v4504_v3, %v4462_v7 }
 0x3fe   : > { %v4506_v8 = vpop.f32.mrf.mxu1 }
 0x3ff   : > { %v4507_v19 = vadd.f32 %v4506_v8, %v4464_v52 }
 0x436   : > { %v4543_v9 = vpop.f32.mrf.mxu0 }
 0x437   : > { %v4544_v12 = vadd.f32 %v4543_v9, %v4501_v6 }
 0x438   : > { %v4586_v13 = vpop.f32.mrf.mxu1  ;;  %v4545_v15 = vpop.f32.mrf.mxu0 }
 0x439   : > { %v4587_v37 = vadd.f32 %v4586_v13, %v4544_v12  ;;  %v4546_v17 = vadd.f32 %v4545_v15, %v4503_v10 }
 0x43a   : > { %v4588_v56 = vpop.f32.mrf.mxu1  ;;  %v4547_v18 = vpop.f32.mrf.mxu0 }
 0x43b   : > { %v4589_v54 = vadd.f32 %v4588_v56, %v4546_v17  ;;  %v4548_v55 = vadd.f32 %v4547_v18, %v4505_v16  ;;  %v4601_v59 = vmax.f32 %v4587_v37, 0.0 }
 0x43c   : > { %v4590_v20 = vpop.f32.mrf.mxu1  ;;  %v4549_v58 = vpop.f32.mrf.mxu0 }
 0x43d   : > { %v4602_v23 = vmax.f32 %v4589_v54, 0.0  ;;  %v4591_v24 = vadd.f32 %v4590_v20, %v4548_v55  ;;  %v4550_v11 = vadd.f32 %v4549_v58, %v4507_v19 }
 0x43e   : > { %v4592_v63 = vpop.f32.mrf.mxu1 }
 0x43f   : > { %v6177_v14 = vpack.c.bf16 %v4602_v23, %v4601_v59  ;;  %v4593_v28 = vadd.f32 %v4592_v63, %v4550_v11  ;;  %v4609_v29 = vmax.f32 %v4591_v24, 0.0 }
 0x441   : > { %4665 = vst [vmem:[%s7347_s10 + $0x18] sm:$0xff] %v6177_v14  ;;  %v4610_v0 = vmax.f32 %v4593_v28, 0.0  ;;  %4673 = sbr.rel (%p6087_p8) target bundleno = 1366 (0x556), region = 80 }
 0x443   : > { %v6181_v31 = vpack.c.bf16 %v4610_v0, %v4609_v29 }
 0x445   : > { %4669 = vst [vmem:[%s7347_s10 + $0x38] sm:$0xff] %v6181_v31 }
 0x446   : > { %v6362_v32 = vld [vmem:[#allocation9 + $0x78] sm:$0xff]   ;;  %v6366_v36 = vld [vmem:[#allocation9 + $0x70] sm:$0xff]   ;;  %v6370_v41 = vld [vmem:[#allocation9 + $0x68] sm:$0xff]  }
 0x447   : > { %v6363_v33 = vld [vmem:[#allocation9 + $0xf8] sm:$0xff]   ;;  %6183 = vmatprep.subr.bf16.mxu0 %v6362_v32  ;;  %v6367_v38 = vld [vmem:[#allocation9 + $0xf0] sm:$0xff]   ;;  %v6371_v42 = vld [vmem:[#allocation9 + $0xe8] sm:$0xff]  }
 0x448   : > { %v6364_v34 = vld [vmem:[#allocation9 + $0x38] sm:$0xff]   ;;  %6205 = vmatprep.subr.bf16.mxu1 %v6363_v33  ;;  %v6368_v39 = vld [vmem:[#allocation9 + $0x30] sm:$0xff]   ;;  %v6372_v43 = vld [vmem:[#allocation9 + $0x28] sm:$0xff]  }
 0x449   : > { %v6365_v35 = vld [vmem:[#allocation9 + $0xb8] sm:$0xff]   ;;  %6184 = vmatpush3.bf16.msra.mxu0 %v6364_v34  ;;  %v6369_v40 = vld [vmem:[#allocation9 + $0xb0] sm:$0xff]   ;;  %v6373_v25 = vld [vmem:[#allocation9 + $0xa8] sm:$0xff]  }
 0x44a   : > { %6206 = vmatpush3.bf16.msra.mxu1 %v6365_v35  ;;  %6185 = vmatprep.subr.bf16.mxu0 %v6366_v36  ;;  %v6374_v44 = vld [vmem:[#allocation9 + $0x60] sm:$0xff]   ;;  %v6378_v53 = vld [vmem:[#allocation9 + $0x58] sm:$0xff]   ;;  %v6382_v50 = vld [vmem:[#allocation9 + $0x50] sm:$0xff]  }
 0x44b   : > { %6207 = vmatprep.subr.bf16.mxu1 %v6367_v38  ;;  %v6375_v30 = vld [vmem:[#allocation9 + $0xe0] sm:$0xff]   ;;  %v6379_v47 = vld [vmem:[#allocation9 + $0xd8] sm:$0xff]   ;;  %v6383_v51 = vld [vmem:[#allocation9 + $0xd0] sm:$0xff]  }
 0x44c   : > { %v6376_v45 = vld [vmem:[#allocation9 + $0x20] sm:$0xff]   ;;  %v6380_v48 = vld [vmem:[#allocation9 + $0x18] sm:$0xff]   ;;  %v6384_v57 = vld [vmem:[#allocation9 + $0x10] sm:$0xff]  }
 0x44d   : > { %6186 = vmatpush3.bf16.msra.mxu0 %v6368_v39  ;;  %v6377_v46 = vld [vmem:[#allocation9 + $0xa0] sm:$0xff]   ;;  %v6381_v49 = vld [vmem:[#allocation9 + $0x98] sm:$0xff]   ;;  %v6385_v21 = vld [vmem:[#allocation9 + $0x90] sm:$0xff]  }
 0x44e   : > { %6208 = vmatpush3.bf16.msra.mxu1 %v6369_v40  ;;  %6187 = vmatprep.subr.bf16.mxu0 %v6370_v41  ;;  %v6386_v22 = vld [vmem:[#allocation9 + $0x48] sm:$0xff]   ;;  %v6390_v26 = vld [vmem:[#allocation9 + $0x40] sm:$0xff]   ;;  %v4675_v5 = vld [vmem:[#allocation2 + $0x8] sm:$0xff] }
 0x44f   : > { %6209 = vmatprep.subr.bf16.mxu1 %v6371_v42  ;;  %v6387_v60 = vld [vmem:[#allocation9 + $0xc8] sm:$0xff]   ;;  %v6391_v27 = vld [vmem:[#allocation9 + $0xc0] sm:$0xff]   ;;  %v4679_v8 = vld [vmem:[#allocation2 + $0x28] sm:$0xff] }
 0x450   : > { %v6388_v61 = vld [vmem:[#allocation9 + $0x8] sm:$0xff]   ;;  %v6392_v1 = vld [vmem:[#allocation9] sm:$0xff]   ;;  %v6091_v9 = vcombine.low %v4675_v5, %v4679_v8  ;;  %v6092_v10 = vcombine.high %v4675_v5, %v4679_v8  ;;  %v6394_v52 = vld [vmem:[#allocation9 + $0x178] sm:$0xff]  }
 0x451   : > { %6188 = vmatpush3.bf16.msra.mxu0 %v6372_v43  ;;  %v6389_v62 = vld [vmem:[#allocation9 + $0x88] sm:$0xff]   ;;  %v6393_v2 = vld [vmem:[#allocation9 + $0x80] sm:$0xff]   ;;  %v6395_v12 = vld [vmem:[#allocation9 + $0x1f8] sm:$0xff]  }
 0x452   : > { %6210 = vmatpush3.bf16.msra.mxu1 %v6373_v25  ;;  %6189 = vmatprep.subr.bf16.mxu0 %v6374_v44  ;;  %v4674_v3 = vld [vmem:[#allocation2] sm:$0xff]  ;;  %v6396_v13 = vld [vmem:[#allocation9 + $0x138] sm:$0xff]   ;;  %v6398_v16 = vld [vmem:[#allocation9 + $0x170] sm:$0xff]  }
 0x453   : > { %6211 = vmatprep.subr.bf16.mxu1 %v6375_v30  ;;  %v4678_v4 = vld [vmem:[#allocation2 + $0x20] sm:$0xff]  ;;  %5314 = vmatprep.mubr.bf16.mxu1 %v6092_v10  ;;  %v6397_v15 = vld [vmem:[#allocation9 + $0x1b8] sm:$0xff]   ;;  %v6399_v37 = vld [vmem:[#allocation9 + $0x1f0] sm:$0xff]  }
 0x454   : > { %v6089_v6 = vcombine.low %v4674_v3, %v4678_v4  ;;  %v6090_v7 = vcombine.high %v4674_v3, %v4678_v4  ;;  %v6400_v17 = vld [vmem:[#allocation9 + $0x130] sm:$0xff]   ;;  %v6402_v18 = vld [vmem:[#allocation9 + $0x168] sm:$0xff]   ;;  %v6406_v20 = vld [vmem:[#allocation9 + $0x160] sm:$0xff]  }
 0x455   : > { %6190 = vmatpush3.bf16.msra.mxu0 %v6376_v45  ;;  %v6401_v56 = vld [vmem:[#allocation9 + $0x1b0] sm:$0xff]   ;;  %v6403_v19 = vld [vmem:[#allocation9 + $0x1e8] sm:$0xff]   ;;  %v6407_v58 = vld [vmem:[#allocation9 + $0x1e0] sm:$0xff]  }
 0x456   : > { %6212 = vmatpush3.bf16.msra.mxu1 %v6377_v46  ;;  %6191 = vmatprep.subr.bf16.mxu0 %v6378_v53  ;;  %v6404_v54 = vld [vmem:[#allocation9 + $0x128] sm:$0xff]   ;;  %v6408_v59 = vld [vmem:[#allocation9 + $0x120] sm:$0xff]   ;;  %v6410_v24 = vld [vmem:[#allocation9 + $0x158] sm:$0xff]  }
 0x457   : > { %6213 = vmatprep.subr.bf16.mxu1 %v6379_v47  ;;  %5273 = vmatprep.mubr.bf16.mxu0 %v6090_v7  ;;  %v6405_v55 = vld [vmem:[#allocation9 + $0x1a8] sm:$0xff]   ;;  %v6409_v23 = vld [vmem:[#allocation9 + $0x1a0] sm:$0xff]   ;;  %v6411_v11 = vld [vmem:[#allocation9 + $0x1d8] sm:$0xff]  }
 0x458   : > { %v6412_v63 = vld [vmem:[#allocation9 + $0x118] sm:$0xff]   ;;  %v6414_v28 = vld [vmem:[#allocation9 + $0x150] sm:$0xff]   ;;  %v6418_v32 = vld [vmem:[#allocation9 + $0x148] sm:$0xff]  }
 0x459   : > { %6192 = vmatpush3.bf16.msra.mxu0 %v6380_v48  ;;  %v6413_v14 = vld [vmem:[#allocation9 + $0x198] sm:$0xff]   ;;  %v6415_v29 = vld [vmem:[#allocation9 + $0x1d0] sm:$0xff]   ;;  %v6419_v33 = vld [vmem:[#allocation9 + $0x1c8] sm:$0xff]  }
 0x45a   : > { %6214 = vmatpush3.bf16.msra.mxu1 %v6381_v49  ;;  %6193 = vmatprep.subr.bf16.mxu0 %v6382_v50  ;;  %v6416_v0 = vld [vmem:[#allocation9 + $0x110] sm:$0xff]   ;;  %v6420_v34 = vld [vmem:[#allocation9 + $0x108] sm:$0xff]   ;;  %v6422_v36 = vld [vmem:[#allocation9 + $0x140] sm:$0xff]  }
 0x45b   : > { %6215 = vmatprep.subr.bf16.mxu1 %v6383_v51  ;;  %v6417_v31 = vld [vmem:[#allocation9 + $0x190] sm:$0xff]   ;;  %v6421_v35 = vld [vmem:[#allocation9 + $0x188] sm:$0xff]   ;;  %v6423_v38 = vld [vmem:[#allocation9 + $0x1c0] sm:$0xff]  }
 0x45c   : > { %v6424_v39 = vld [vmem:[#allocation9 + $0x100] sm:$0xff]   ;;  %v4676_v41 = vld [vmem:[#allocation2 + $0x10] sm:$0xff] }
 0x45d   : > { %6194 = vmatpush3.bf16.msra.mxu0 %v6384_v57  ;;  %v6425_v40 = vld [vmem:[#allocation9 + $0x180] sm:$0xff]   ;;  %v4680_v42 = vld [vmem:[#allocation2 + $0x30] sm:$0xff] }
 0x45e   : > { %6216 = vmatpush3.bf16.msra.mxu1 %v6385_v21  ;;  %6195 = vmatprep.subr.bf16.mxu0 %v6386_v22  ;;  %v6093_v43 = vcombine.low %v4676_v41, %v4680_v42  ;;  %v6094_v25 = vcombine.high %v4676_v41, %v4680_v42  ;;  %v4677_v44 = vld [vmem:[#allocation2 + $0x18] sm:$0xff] }
 0x45f   : > { %6217 = vmatprep.subr.bf16.mxu1 %v6387_v60  ;;  %v4681_v30 = vld [vmem:[#allocation2 + $0x38] sm:$0xff] }
 0x460   : > { %v6095_v45 = vcombine.low %v4677_v44, %v4681_v30  ;;  %v6096_v46 = vcombine.high %v4677_v44, %v4681_v30  ;;  %v6088_v21 = vld [vmem:[#allocation10] ss:$0 sm:$0xff] }
 0x461   : > { %6196 = vmatpush3.bf16.msra.mxu0 %v6388_v61 }
 0x462   : > { %6218 = vmatpush3.bf16.msra.mxu1 %v6389_v62  ;;  %6197 = vmatprep.subr.bf16.mxu0 %v6390_v26 }
 0x463   : > { %6219 = vmatprep.subr.bf16.mxu1 %v6391_v27 }
 0x465   : > { %6198 = vmatpush3.bf16.msra.mxu0 %v6392_v1 }
 0x466   : > { %6220 = vmatpush3.bf16.msra.mxu1 %v6393_v2  ;;  %6227 = vmatprep.subr.bf16.mxu0 %v6394_v52 }
 0x467   : > { %6249 = vmatprep.subr.bf16.mxu1 %v6395_v12 }
 0x468   : > { %5274 = vmatmul.mubr.bf16.vlgmr.msra.gmra.mxu0 %v6089_v6 }
 0x469   : > { %5315 = vmatmul.mubr.bf16.vlgmr.msra.gmra.mxu1 %v6091_v9  ;;  %6228 = vmatpush3.bf16.msra.mxu0 %v6396_v13 }
 0x46a   : > { %6250 = vmatpush3.bf16.msra.mxu1 %v6397_v15  ;;  %6229 = vmatprep.subr.bf16.mxu0 %v6398_v16 }
 0x46b   : > { %6251 = vmatprep.subr.bf16.mxu1 %v6399_v37  ;;  %5355 = vmatprep.mubr.bf16.mxu0 %v6094_v25 }
 0x46c   : > { %5396 = vmatprep.mubr.bf16.mxu1 %v6096_v46 }
 0x46d   : > { %6230 = vmatpush3.bf16.msra.mxu0 %v6400_v17 }
 0x46e   : > { %6252 = vmatpush3.bf16.msra.mxu1 %v6401_v56  ;;  %6231 = vmatprep.subr.bf16.mxu0 %v6402_v18 }
 0x46f   : > { %6253 = vmatprep.subr.bf16.mxu1 %v6403_v19 }
 0x471   : > { %6232 = vmatpush3.bf16.msra.mxu0 %v6404_v54 }
 0x472   : > { %6254 = vmatpush3.bf16.msra.mxu1 %v6405_v55  ;;  %6233 = vmatprep.subr.bf16.mxu0 %v6406_v20 }
 0x473   : > { %6255 = vmatprep.subr.bf16.mxu1 %v6407_v58 }
 0x475   : > { %6234 = vmatpush3.bf16.msra.mxu0 %v6408_v59 }
 0x476   : > { %6256 = vmatpush3.bf16.msra.mxu1 %v6409_v23  ;;  %6235 = vmatprep.subr.bf16.mxu0 %v6410_v24 }
 0x477   : > { %6257 = vmatprep.subr.bf16.mxu1 %v6411_v11 }
 0x479   : > { %6236 = vmatpush3.bf16.msra.mxu0 %v6412_v63 }
 0x47a   : > { %6258 = vmatpush3.bf16.msra.mxu1 %v6413_v14  ;;  %6237 = vmatprep.subr.bf16.mxu0 %v6414_v28 }
 0x47b   : > { %6259 = vmatprep.subr.bf16.mxu1 %v6415_v29 }
 0x47d   : > { %6238 = vmatpush3.bf16.msra.mxu0 %v6416_v0 }
 0x47e   : > { %6260 = vmatpush3.bf16.msra.mxu1 %v6417_v31  ;;  %6239 = vmatprep.subr.bf16.mxu0 %v6418_v32 }
 0x47f   : > { %6261 = vmatprep.subr.bf16.mxu1 %v6419_v33 }
 0x481   : > { %6240 = vmatpush3.bf16.msra.mxu0 %v6420_v34 }
 0x482   : > { %6262 = vmatpush3.bf16.msra.mxu1 %v6421_v35  ;;  %6241 = vmatprep.subr.bf16.mxu0 %v6422_v36 }
 0x483   : > { %6263 = vmatprep.subr.bf16.mxu1 %v6423_v38 }
 0x485   : > { %6242 = vmatpush3.bf16.msra.mxu0 %v6424_v39 }
 0x486   : > { %6264 = vmatpush3.bf16.msra.mxu1 %v6425_v40 }
 0x488   : > { %5356 = vmatmul.mubr.bf16.vlgmr.msra.gmra.mxu0 %v6093_v43 }
 0x489   : > { %5397 = vmatmul.mubr.bf16.vlgmr.msra.gmra.mxu1 %v6095_v45 }
 0x528   : > { %v6199_v53 = vpop.f32.mrf.mxu0 }
 0x529   : > { %v6221_v47 = vpop.f32.mrf.mxu1 }
 0x52a   : > { %v6200_v48 = vpop.f32.mrf.mxu0 }
 0x52b   : > { %v6222_v49 = vpop.f32.mrf.mxu1  ;;  %v6201_v51 = vadd.f32 %v6200_v48, %v6199_v53 }
 0x52c   : > { %v6202_v50 = vpop.f32.mrf.mxu0  ;;  %v6223_v61 = vadd.f32 %v6222_v49, %v6221_v47 }
 0x52d   : > { %v6224_v57 = vpop.f32.mrf.mxu1  ;;  %v5276_v60 = vadd.f32 %v6201_v51, %v6088_v21 }
 0x52e   : > { %v6203_v22 = vpop.f32.mrf.mxu0 }
 0x52f   : > { %v6204_v62 = vadd.f32 %v6203_v22, %v6202_v50  ;;  %v6225_v26 = vpop.f32.mrf.mxu1  ;;  %v5317_v3 = vadd.f32 %v6223_v61, %v5276_v60 }
 0x530   : > { %v6226_v8 = vadd.f32 %v6225_v26, %v6224_v57 }
 0x531   : > { %v5279_v4 = vadd.f32 %v6204_v62, %v6088_v21 }
 0x533   : > { %v5320_v13 = vadd.f32 %v6226_v8, %v5279_v4 }
 0x548   : > { %v6243_v27 = vpop.f32.mrf.mxu0 }
 0x549   : > { %v6265_v1 = vpop.f32.mrf.mxu1 }
 0x54a   : > { %v6244_v2 = vpop.f32.mrf.mxu0 }
 0x54b   : > { %v6245_v5 = vadd.f32 %v6244_v2, %v6243_v27  ;;  %v6266_v6 = vpop.f32.mrf.mxu1 }
 0x54c   : > { %v6246_v7 = vpop.f32.mrf.mxu0  ;;  %v6267_v10 = vadd.f32 %v6266_v6, %v6265_v1 }
 0x54d   : > { %v5358_v9 = vadd.f32 %v6245_v5, %v5317_v3  ;;  %v6268_v52 = vpop.f32.mrf.mxu1 }
 0x54e   : > { %v6247_v12 = vpop.f32.mrf.mxu0 }
 0x54f   : > { %v5399_v15 = vadd.f32 %v6267_v10, %v5358_v9  ;;  %v6248_v16 = vadd.f32 %v6247_v12, %v6246_v7  ;;  %v6269_v37 = vpop.f32.mrf.mxu1 }
 0x550   : > { %v6270_v56 = vadd.f32 %v6269_v37, %v6268_v52 }
 0x551   : > { %5405 = vst [vmem:[%s7576_s7] sm:$0xff] %v5399_v15  ;;  %v5361_v17 = vadd.f32 %v6248_v16, %v5320_v13 }
 0x553   : > { %v5402_v18 = vadd.f32 %v6270_v56, %v5361_v17 }
 0x555   : > { %5406 = vst [vmem:[%s7576_s7 + $0x8] sm:$0xff] %v5402_v18 }
 0x556 PF: > { %p17_p2 = scmp.ge.s32.totalorder %s6755_s21, 4   ;;  %s7602_s24 = smov %s6628_s25 }
 0x557   : > { %s7603_s25 = smov %s6632_s26  ;;  %s7604_s26 = smov %s6766_s8 }
 0x558   : > { %s7605_s27 = smov %s6755_s21  ;;  %19 = sbr.rel (!%p17_p2) target bundleno = 4 (0x4), region = 120 }
 0x55d   :  { %5418 = vsyncpa [#allocation4], 1 }
 0x55e   :  { %5420 = vsyncpa [#allocation4 + $0x1], 1 }
 0x55f   :  { %5421 = vsyncpa [#allocation6], 1 }
 0x560   :  { %5422 = vsyncpa [#allocation11], 1 }

</bundles_post_ra>
